<compile_context>
chip_gen: v7x
topology: tpu7x:2x2x1
jax: 0.10.0
libtpu: 0.0.40
codegen_flags: <defaults>
</compile_context>

<pallas_src>
import functools

import jax
import jax.numpy as jnp
from jax.experimental import pallas as pl
from jax.experimental.pallas import tpu as pltpu

# ----------------------------- config ---------------------------------------
IMAGE_MEAN = jnp.array([0.485, 0.456, 0.406], jnp.float32)
IMAGE_STD = jnp.array([0.229, 0.224, 0.225], jnp.float32)
C_FEAT = 16          # backbone output channels
NUM_ANCHORS = 3      # anchors per spatial location (1 size x 3 aspect ratios)
TOP_N = 32           # proposals kept per image (fixed; see TODO on NMS)
REPR_SIZE = 64       # TwoMLPHead representation size
NUM_CLASSES = 5      # incl. background (class 0)
ROI_SIZE = 7


# --------------------------- Pallas kernels ----------------------------------
def _conv_accum_relu(x_ref, w_ref, b_ref, *, Wp, M_ext, Cin):
    """3x3/s1/p1 conv + bias + ReLU over a flat padded image held in VMEM.

    x_ref : ((H+3)*(W+2), Cin)  flat zero-padded image (1 top / 1 left /
            1 right / 2 bottom rows of padding).
    For tap k = di*3+dj the required input rows for the *extended* output
    grid (i, j_ext) with j_ext in [0, W+2) form one contiguous slice of the
    flat image starting at di*(W+2)+dj, so the conv is 9 accumulating MXU
    passes over shifted views -- no HBM patch matrix.  The last 2 columns of
    each extended output row are wrap-around garbage and are cropped by the
    caller.
    """
    acc = None
    for k in range(9):
        di, dj = divmod(k, 3)
        part = jnp.dot(x_ref[pl.ds(di * Wp + dj, M_ext), :],
                       w_ref[pl.ds(k * Cin, Cin), :],
                       preferred_element_type=jnp.float32)
        acc = part if acc is None else acc + part
    return jnp.maximum(acc + b_ref[...], 0.0)


def _conv3x3_kernel(x_ref, w_ref, b_ref, o_ref, *, Wp, M_ext, Cin):
    t = _conv_accum_relu(x_ref, w_ref, b_ref, Wp=Wp, M_ext=M_ext, Cin=Cin)
    o_ref[...] = t.astype(o_ref.dtype)


def _conv3x3_head_kernel(x_ref, w_ref, b_ref, hw_ref, hb_ref, o_ref,
                         *, Wp, M_ext, Cin):
    # conv activation stays in VMEM/vregs; only the narrow head output is stored.
    t = _conv_accum_relu(x_ref, w_ref, b_ref, Wp=Wp, M_ext=M_ext, Cin=Cin)
    t = t.astype(jnp.bfloat16)
    out = jnp.dot(t, hw_ref[...], preferred_element_type=jnp.float32) + hb_ref[...]
    o_ref[...] = out.astype(o_ref.dtype)


def conv3x3(x_pad_flat, conv_w, conv_b, H, W, *, head_w=None, head_b=None,
            out_dtype=jnp.bfloat16):
    """Per-image fused conv3x3(+ReLU)[+1x1 head] Pallas call.

    x_pad_flat : (N, (H+3)*(W+2), Cin) bf16, conv_w : (9*Cin, Cc) bf16,
    conv_b : (1, Cc) f32.  Returns (N, H*(W+2), Cout); the trailing 2 columns
    per row are garbage and must be cropped.
    """
    N, R, Cin = x_pad_flat.shape
    Wp = W + 2
    M_ext = H * Wp
    assert R == (H + 3) * Wp
    Cc = conv_w.shape[1]
    fused = head_w is not None
    Cout = head_w.shape[1] if fused else Cc

    in_specs = [pl.BlockSpec((None, R, Cin), lambda n: (n, 0, 0)),
                pl.BlockSpec((9 * Cin, Cc), lambda n: (0, 0)),     # VMEM-resident
                pl.BlockSpec((1, Cc), lambda n: (0, 0))]
    args = [x_pad_flat, conv_w, conv_b]
    flops = 2 * N * M_ext * 9 * Cin * Cc
    bytes_acc = (N * R * Cin * 2 + 9 * Cin * Cc * 2 + Cc * 4
                 + N * M_ext * Cout * jnp.dtype(out_dtype).itemsize)
    if fused:
        kernel = functools.partial(_conv3x3_head_kernel, Wp=Wp, M_ext=M_ext, Cin=Cin)
        in_specs += [pl.BlockSpec((Cc, Cout), lambda n: (0, 0)),
                     pl.BlockSpec((1, Cout), lambda n: (0, 0))]
        args += [head_w, head_b]
        flops += 2 * N * M_ext * Cc * Cout
        bytes_acc += Cc * Cout * 2 + Cout * 4
    else:
        kernel = functools.partial(_conv3x3_kernel, Wp=Wp, M_ext=M_ext, Cin=Cin)

    # TODO(synk): at real image resolutions the per-image block should become a
    # row band (with halo) sized against v7x's 64 MiB VMEM; whole-image blocks
    # are used here since the test images are tiny.
    return pl.pallas_call(
        kernel,
        out_shape=jax.ShapeDtypeStruct((N, M_ext, Cout), out_dtype),
        grid=(N,),
        in_specs=in_specs,
        out_specs=pl.BlockSpec((None, M_ext, Cout), lambda n: (n, 0, 0)),
        compiler_params=pltpu.CompilerParams(
            dimension_semantics=("parallel",)),
        cost_estimate=pl.CostEstimate(flops=flops, transcendentals=0,
                                      bytes_accessed=bytes_acc),
    )(*args)


def _roi_head_kernel(x_ref, w6_ref, b6_ref, w7_ref, b7_ref, wp_ref, bp_ref,
                     o_ref):
    """fc6 -> ReLU -> fc7 -> ReLU -> fused cls/bbox predictor, all in VMEM."""
    h = jnp.dot(x_ref[...], w6_ref[...], preferred_element_type=jnp.float32)
    h = jnp.maximum(h + b6_ref[...], 0.0).astype(jnp.bfloat16)
    h = jnp.dot(h, w7_ref[...], preferred_element_type=jnp.float32)
    h = jnp.maximum(h + b7_ref[...], 0.0).astype(jnp.bfloat16)
    o_ref[...] = (jnp.dot(h, wp_ref[...], preferred_element_type=jnp.float32)
                  + bp_ref[...])


def roi_head_fused(box_features_bf16, prep):
    """Single-step fused TwoMLPHead + FastRCNNPredictor (M = N*TOP_N is tiny:
    splitting it would only add grid-step overhead / duplicated weight DMAs)."""
    R, K = box_features_bf16.shape
    n_out = prep["pred_w"].shape[1]
    flops = 2 * R * (K * REPR_SIZE + REPR_SIZE * REPR_SIZE + REPR_SIZE * n_out)
    bytes_acc = (R * K * 2
                 + (K * REPR_SIZE + REPR_SIZE * REPR_SIZE + REPR_SIZE * n_out) * 2
                 + (2 * REPR_SIZE + n_out) * 4 + R * n_out * 4)
    return pl.pallas_call(
        _roi_head_kernel,
        out_shape=jax.ShapeDtypeStruct((R, n_out), jnp.float32),
        cost_estimate=pl.CostEstimate(flops=flops, transcendentals=0,
                                      bytes_accessed=bytes_acc),
    )(box_features_bf16, prep["fc6_w"], prep["fc6_b"], prep["fc7_w"],
      prep["fc7_b"], prep["pred_w"], prep["pred_b"])


# ------------------------------ JAX glue -------------------------------------
def pad_and_flatten(x_nhwc):
    """Zero-pad for the in-kernel shifted-slice conv and flatten (rows, cols).

    Pad 1 top / 1 left / 1 right (the conv's p=1) plus 2 extra bottom rows so
    the wrap-around of the last extended output row stays in bounds.
    """
    N, H, W, C = x_nhwc.shape
    xp = jnp.pad(x_nhwc, ((0, 0), (1, 2), (1, 1), (0, 0)))
    return xp.reshape(N, (H + 3) * (W + 2), C)


def crop_extended(y_ext, H, W):
    """(N, H*(W+2), C) extended conv output -> (N, H, W, C) valid region."""
    N, _, C = y_ext.shape
    return y_ext.reshape(N, H, W + 2, C)[:, :, :W, :]


def generate_anchors(Hf, Wf, stride, size=4.0, ratios=(0.5, 1.0, 2.0)):
    ratios = jnp.array(ratios, jnp.float32)
    h_r = jnp.sqrt(ratios)
    w_r = 1.0 / h_r
    ws = w_r * size
    hs = h_r * size
    base = jnp.stack([-ws / 2, -hs / 2, ws / 2, hs / 2], axis=1)   # (A,4)
    shift_x = (jnp.arange(Wf, dtype=jnp.float32) + 0.5) * stride
    shift_y = (jnp.arange(Hf, dtype=jnp.float32) + 0.5) * stride
    sy, sx = jnp.meshgrid(shift_y, shift_x, indexing="ij")
    shifts = jnp.stack([sx, sy, sx, sy], axis=-1).reshape(-1, 4)   # (Hf*Wf,4)
    anchors = (shifts[:, None, :] + base[None, :, :]).reshape(-1, 4)
    return anchors                                                 # (Hf*Wf*A,4)


def decode_boxes(deltas, anchors):
    # TODO(synk): torchvision box coder uses weights (10,10,5,5) and clamp
    # log(1000/16); simplified coder (weights 1, clamp 4) kept here.
    wa = anchors[..., 2] - anchors[..., 0]
    ha = anchors[..., 3] - anchors[..., 1]
    xa = anchors[..., 0] + 0.5 * wa
    ya = anchors[..., 1] + 0.5 * ha
    dx, dy = deltas[..., 0], deltas[..., 1]
    dw = jnp.clip(deltas[..., 2], -4.0, 4.0)
    dh = jnp.clip(deltas[..., 3], -4.0, 4.0)
    cx = dx * wa + xa
    cy = dy * ha + ya
    w = jnp.exp(dw) * wa
    h = jnp.exp(dh) * ha
    return jnp.stack([cx - 0.5 * w, cy - 0.5 * h,
                      cx + 0.5 * w, cy + 0.5 * h], axis=-1)


def clip_boxes(boxes, size_hw):
    H, W = size_hw
    return jnp.stack([jnp.clip(boxes[..., 0], 0.0, W),
                      jnp.clip(boxes[..., 1], 0.0, H),
                      jnp.clip(boxes[..., 2], 0.0, W),
                      jnp.clip(boxes[..., 3], 0.0, H)], axis=-1)


def roi_align(feat_hwc, boxes, out_size=ROI_SIZE):
    """Bilinear ROI align (1 sample/bin) as two interpolation-matrix matmuls.

    pooled[r,p,q,c] = sum_{h,w} Ry[r,p,h] * Rx[r,q,w] * feat[h,w,c], where
    Ry/Rx carry the bilinear weights -> gather-free and MXU-friendly.
    feat:(H,W,C), boxes:(R,4) in feature coords.
    """
    H, W, _ = feat_hwc.shape
    x1, y1, x2, y2 = boxes[:, 0], boxes[:, 1], boxes[:, 2], boxes[:, 3]
    bw = jnp.maximum(x2 - x1, 1.0)
    bh = jnp.maximum(y2 - y1, 1.0)
    grid = (jnp.arange(out_size, dtype=jnp.float32) + 0.5) / out_size
    ys = jnp.clip(y1[:, None] + grid[None, :] * bh[:, None] - 0.5, 0.0, H - 1.0)
    xs = jnp.clip(x1[:, None] + grid[None, :] * bw[:, None] - 0.5, 0.0, W - 1.0)

    def interp_matrix(coords, size):
        lo = jnp.floor(coords)                       # (R,S)
        w_hi = (coords - lo)[..., None]              # (R,S,1)
        hi = jnp.minimum(lo + 1.0, size - 1.0)[..., None]
        lo = lo[..., None]
        idx = jnp.arange(size, dtype=jnp.float32)    # (size,)
        return (idx == lo) * (1.0 - w_hi) + (idx == hi) * w_hi   # (R,S,size)

    Ry = interp_matrix(ys, H)                        # (R,S,H)
    Rx = interp_matrix(xs, W)                        # (R,S,W)
    f32 = feat_hwc.astype(jnp.float32)
    tmp = jnp.einsum("rph,hwc->rpwc", Ry, f32)       # (R,S,W,C)
    return jnp.einsum("rpwc,rqw->rpqc", tmp, Rx)     # (R,S,S,C)
    # TODO(synk): torchvision MultiScaleRoIAlign uses adaptive sampling_ratio
    # and aligned=False; single-sample aligned variant kept here.


# ------------------------------ parameters ----------------------------------
def init_params(key):
    ks = jax.random.split(key, 8)

    def w(k, shape):
        return jax.random.normal(k, shape, jnp.float32) * 0.01

    return {
        # backbone: Conv2d(3, C_FEAT, 3, s=1, p=1) + ReLU ((kh*kw*Cin, Cout))
        "backbone_w": w(ks[0], (3 * 3 * 3, C_FEAT)),
        "backbone_b": jnp.zeros((C_FEAT,), jnp.float32),
        # RPNHead
        "rpn_conv_w": w(ks[1], (3 * 3 * C_FEAT, C_FEAT)),
        "rpn_conv_b": jnp.zeros((C_FEAT,), jnp.float32),
        "rpn_cls_w": w(ks[2], (C_FEAT, NUM_ANCHORS)),
        "rpn_cls_b": jnp.zeros((NUM_ANCHORS,), jnp.float32),
        "rpn_bbox_w": w(ks[3], (C_FEAT, 4 * NUM_ANCHORS)),
        "rpn_bbox_b": jnp.zeros((4 * NUM_ANCHORS,), jnp.float32),
        # TwoMLPHead
        "fc6_w": w(ks[4], (C_FEAT * ROI_SIZE * ROI_SIZE, REPR_SIZE)),
        "fc6_b": jnp.zeros((REPR_SIZE,), jnp.float32),
        "fc7_w": w(ks[5], (REPR_SIZE, REPR_SIZE)),
        "fc7_b": jnp.zeros((REPR_SIZE,), jnp.float32),
        # FastRCNNPredictor
        "cls_w": w(ks[6], (REPR_SIZE, NUM_CLASSES)),
        "cls_b": jnp.zeros((NUM_CLASSES,), jnp.float32),
        "bbox_w": w(ks[7], (REPR_SIZE, NUM_CLASSES * 4)),
        "bbox_b": jnp.zeros((NUM_CLASSES * 4,), jnp.float32),
    }


def prepare_inference_params(params):
    """One-time prep: fold 1/std into the backbone conv, fuse paired heads,
    cast weights to bf16, reshape biases to (1,N) f32."""
    # conv weight row order is (kh, kw, Cin) -> channel of row k is k % 3.
    col_inv_std = jnp.tile(1.0 / IMAGE_STD, 3 * 3)           # (27,)

    def w(x):
        return x.astype(jnp.bfloat16)

    def b(x):
        return x.astype(jnp.float32).reshape(1, -1)

    return {
        "backbone_w": w(params["backbone_w"] * col_inv_std[:, None]),
        "backbone_b": b(params["backbone_b"]),
        "rpn_conv_w": w(params["rpn_conv_w"]),
        "rpn_conv_b": b(params["rpn_conv_b"]),
        # fused RPN head: [objectness (3) | bbox deltas (12)]
        "rpn_head_w": w(jnp.concatenate([params["rpn_cls_w"],
                                         params["rpn_bbox_w"]], axis=1)),
        "rpn_head_b": b(jnp.concatenate([params["rpn_cls_b"],
                                         params["rpn_bbox_b"]])),
        "fc6_w": w(params["fc6_w"]),
        "fc6_b": b(params["fc6_b"]),
        "fc7_w": w(params["fc7_w"]),
        "fc7_b": b(params["fc7_b"]),
        # fused predictor: [class logits (5) | box regression (20)]
        "pred_w": w(jnp.concatenate([params["cls_w"], params["bbox_w"]], axis=1)),
        "pred_b": b(jnp.concatenate([params["cls_b"], params["bbox_b"]])),
    }


# ------------------------------ forward --------------------------------------
def frcnn_forward(prep, images_nchw):
    """Inference path of ModGeneralizedRCNN.forward -> (boxes, scores, labels)."""
    N, _, H, W = images_nchw.shape

    # ---- transform ----
    # 1/std is folded into the backbone conv weights; mean-subtract is one
    # cheap fuseable XLA op (done before padding so zero borders stay zero).
    x = jnp.transpose(images_nchw, (0, 2, 3, 1)).astype(jnp.float32)   # NHWC
    x = (x - IMAGE_MEAN).astype(jnp.bfloat16)
    # TODO(synk): GeneralizedRCNNTransform.resize / batching-pad skipped
    # (all inputs already share one size), so postprocess ratio == 1.

    # ---- backbone (conv3x3 + ReLU, im2col done in-kernel) ----
    x_flat = pad_and_flatten(x)                                        # (N,(H+3)(W+2),3)
    feat_ext = conv3x3(x_flat, prep["backbone_w"], prep["backbone_b"],
                       H, W, out_dtype=jnp.bfloat16)
    Hf, Wf = H, W
    features = crop_extended(feat_ext, Hf, Wf)                         # (N,Hf,Wf,16) bf16

    # ---- RPN (conv3x3 + ReLU + cls/bbox head fused in one kernel) ----
    feat_flat = pad_and_flatten(features)                              # (N,(Hf+3)(Wf+2),16)
    rpn_ext = conv3x3(feat_flat, prep["rpn_conv_w"], prep["rpn_conv_b"],
                      Hf, Wf, head_w=prep["rpn_head_w"],
                      head_b=prep["rpn_head_b"], out_dtype=jnp.float32)
    rpn_out = crop_extended(rpn_ext, Hf, Wf)                           # (N,Hf,Wf,15) f32

    objectness = rpn_out[..., :NUM_ANCHORS].reshape(N, Hf * Wf * NUM_ANCHORS)
    deltas_all = rpn_out[..., NUM_ANCHORS:].reshape(N, Hf * Wf * NUM_ANCHORS, 4)
    anchors = generate_anchors(Hf, Wf, stride=H // Hf)                 # (Hf*Wf*A,4)

    # top-K first, then decode/clip only the kept proposals.
    _, top_idx = jax.lax.top_k(objectness, TOP_N)                      # (N,TOP_N)
    top_deltas = jnp.take_along_axis(deltas_all, top_idx[..., None], axis=1)
    top_anchors = anchors[top_idx]                                     # (N,TOP_N,4)
    proposals = clip_boxes(decode_boxes(top_deltas, top_anchors), (H, W))
    # TODO(synk): RPN NMS + min-size filtering skipped (data-dependent output
    # counts); a fixed TOP_N proposals per image is kept instead.

    # ---- roi_heads ----
    spatial_scale = Hf / H
    pooled = jax.vmap(lambda f, bx: roi_align(f, bx * spatial_scale))(
        features, proposals)                                           # (N,TOP_N,7,7,C)
    box_features = pooled.reshape(
        N * TOP_N, ROI_SIZE * ROI_SIZE * C_FEAT).astype(jnp.bfloat16)
    pred = roi_head_fused(box_features, prep)                          # (N*TOP_N,25) f32
    class_logits = pred[:, :NUM_CLASSES]
    box_regression = pred[:, NUM_CLASSES:]

    # ---- postprocess_detections ----
    scores_all = jax.nn.softmax(class_logits, axis=-1)                 # (R,num_classes)
    deltas = box_regression.reshape(N * TOP_N, NUM_CLASSES, 4)
    props_flat = proposals.reshape(N * TOP_N, 4)
    pred_boxes = clip_boxes(decode_boxes(deltas, props_flat[:, None, :]), (H, W))
    fg_scores = scores_all[:, 1:]                                      # drop background
    labels = jnp.argmax(fg_scores, axis=-1) + 1
    best_scores = jnp.max(fg_scores, axis=-1)
    best_boxes = jnp.take_along_axis(
        pred_boxes, labels[:, None, None], axis=1)[:, 0, :]
    # TODO(synk): per-class NMS and score thresholding skipped (dynamic shapes).

    boxes = best_boxes.reshape(N, TOP_N, 4)
    scores = best_scores.reshape(N, TOP_N)
    labels = labels.reshape(N, TOP_N)

    # ---- transform.postprocess: rescale to original image sizes (ratio 1) ----
    boxes = boxes * jnp.float32(1.0)
    return boxes, scores, labels


# ------------------------------ main ------------------------------------------
if __name__ == "__main__":
    key = jax.random.PRNGKey(0)
    k_img, k_par = jax.random.split(key)
    images = jax.random.uniform(k_img, (2, 3, 16, 16), jnp.float32)  # NCHW
    params = init_params(k_par)
    prep = prepare_inference_params(params)       # one-time fold/fuse/bf16 cast

    fwd = jax.jit(functools.partial(frcnn_forward, prep))
    boxes, scores, labels = fwd(images)
    jax.block_until_ready((boxes, scores, labels))

    assert boxes.shape == (2, TOP_N, 4)
    assert scores.shape == (2, TOP_N)
    assert labels.shape == (2, TOP_N)
    print("KERNEL_OK")
</pallas_src>

<mosaic_0001>
module attributes {stable_mosaic.version = 11 : i64} {
  func.func @_conv3x3_head_kernel(%arg0: i32, %arg1: memref<1x342x16xbf16, #tpu.memory_space<vmem>>, %arg2: memref<144x16xbf16, #tpu.memory_space<vmem>>, %arg3: memref<1x16xf32, #tpu.memory_space<vmem>>, %arg4: memref<16x15xbf16, #tpu.memory_space<vmem>>, %arg5: memref<1x15xf32, #tpu.memory_space<vmem>>, %arg6: memref<1x288x15xf32, #tpu.memory_space<vmem>>) attributes {dimension_semantics = [#tpu.dimension_semantics<parallel>], iteration_bounds = array<i64: 2>, scalar_prefetch = 0 : i64, scratch_operands = 0 : i64, tpu.core_type = #tpu.core_type<tc>, window_params = [{transform_indices = @transform_0, window_bounds = array<i64: 1, 342, 16>}, {pipeline_mode = #tpu.pipeline_mode<synchronous>, transform_indices = @transform_1, window_bounds = array<i64: 144, 16>}, {pipeline_mode = #tpu.pipeline_mode<synchronous>, transform_indices = @transform_2, window_bounds = array<i64: 1, 16>}, {pipeline_mode = #tpu.pipeline_mode<synchronous>, transform_indices = @transform_3, window_bounds = array<i64: 16, 15>}, {pipeline_mode = #tpu.pipeline_mode<synchronous>, transform_indices = @transform_4, window_bounds = array<i64: 1, 15>}, {transform_indices = @transform_5, window_bounds = array<i64: 1, 288, 15>}]} {
    %c0 = arith.constant 0 : index
    %c0_0 = arith.constant 0 : index
    %c0_1 = arith.constant 0 : index
    %0 = vector.load %arg1[%c0, %c0_0, %c0_1] : memref<1x342x16xbf16, #tpu.memory_space<vmem>>, vector<1x288x16xbf16>
    %1 = vector.shape_cast %0 : vector<1x288x16xbf16> to vector<288x16xbf16>
    %c0_2 = arith.constant 0 : index
    %c0_3 = arith.constant 0 : index
    %2 = vector.load %arg2[%c0_2, %c0_3] : memref<144x16xbf16, #tpu.memory_space<vmem>>, vector<16x16xbf16>
    %cst = arith.constant dense<0.000000e+00> : vector<288x16xf32>
    %3 = tpu.matmul %1, %2, %cst {dimension_numbers = #tpu.dot_dimension_numbers<[1], [0], [0], [1], [0, 0, 1, 1], [], []>} : vector<288x16xbf16>, vector<16x16xbf16>, vector<288x16xf32> -> vector<288x16xf32>
    %c0_4 = arith.constant 0 : index
    %c1 = arith.constant 1 : index
    %c0_5 = arith.constant 0 : index
    %4 = vector.load %arg1[%c0_4, %c1, %c0_5] : memref<1x342x16xbf16, #tpu.memory_space<vmem>>, vector<1x288x16xbf16>
    %5 = vector.shape_cast %4 : vector<1x288x16xbf16> to vector<288x16xbf16>
    %c16 = arith.constant 16 : index
    %c0_6 = arith.constant 0 : index
    %6 = vector.load %arg2[%c16, %c0_6] : memref<144x16xbf16, #tpu.memory_space<vmem>>, vector<16x16xbf16>
    %cst_7 = arith.constant dense<0.000000e+00> : vector<288x16xf32>
    %7 = tpu.matmul %5, %6, %cst_7 {dimension_numbers = #tpu.dot_dimension_numbers<[1], [0], [0], [1], [0, 0, 1, 1], [], []>} : vector<288x16xbf16>, vector<16x16xbf16>, vector<288x16xf32> -> vector<288x16xf32>
    %8 = arith.addf %3, %7 : vector<288x16xf32>
    %c0_8 = arith.constant 0 : index
    %c2 = arith.constant 2 : index
    %c0_9 = arith.constant 0 : index
    %9 = vector.load %arg1[%c0_8, %c2, %c0_9] : memref<1x342x16xbf16, #tpu.memory_space<vmem>>, vector<1x288x16xbf16>
    %10 = vector.shape_cast %9 : vector<1x288x16xbf16> to vector<288x16xbf16>
    %c32 = arith.constant 32 : index
    %c0_10 = arith.constant 0 : index
    %11 = vector.load %arg2[%c32, %c0_10] : memref<144x16xbf16, #tpu.memory_space<vmem>>, vector<16x16xbf16>
    %cst_11 = arith.constant dense<0.000000e+00> : vector<288x16xf32>
    %12 = tpu.matmul %10, %11, %cst_11 {dimension_numbers = #tpu.dot_dimension_numbers<[1], [0], [0], [1], [0, 0, 1, 1], [], []>} : vector<288x16xbf16>, vector<16x16xbf16>, vector<288x16xf32> -> vector<288x16xf32>
    %13 = arith.addf %8, %12 : vector<288x16xf32>
    %c0_12 = arith.constant 0 : index
    %c18 = arith.constant 18 : index
    %c0_13 = arith.constant 0 : index
    %14 = vector.load %arg1[%c0_12, %c18, %c0_13] : memref<1x342x16xbf16, #tpu.memory_space<vmem>>, vector<1x288x16xbf16>
    %15 = vector.shape_cast %14 : vector<1x288x16xbf16> to vector<288x16xbf16>
    %c48 = arith.constant 48 : index
    %c0_14 = arith.constant 0 : index
    %16 = vector.load %arg2[%c48, %c0_14] : memref<144x16xbf16, #tpu.memory_space<vmem>>, vector<16x16xbf16>
    %cst_15 = arith.constant dense<0.000000e+00> : vector<288x16xf32>
    %17 = tpu.matmul %15, %16, %cst_15 {dimension_numbers = #tpu.dot_dimension_numbers<[1], [0], [0], [1], [0, 0, 1, 1], [], []>} : vector<288x16xbf16>, vector<16x16xbf16>, vector<288x16xf32> -> vector<288x16xf32>
    %18 = arith.addf %13, %17 : vector<288x16xf32>
    %c0_16 = arith.constant 0 : index
    %c19 = arith.constant 19 : index
    %c0_17 = arith.constant 0 : index
    %19 = vector.load %arg1[%c0_16, %c19, %c0_17] : memref<1x342x16xbf16, #tpu.memory_space<vmem>>, vector<1x288x16xbf16>
    %20 = vector.shape_cast %19 : vector<1x288x16xbf16> to vector<288x16xbf16>
    %c64 = arith.constant 64 : index
    %c0_18 = arith.constant 0 : index
    %21 = vector.load %arg2[%c64, %c0_18] : memref<144x16xbf16, #tpu.memory_space<vmem>>, vector<16x16xbf16>
    %cst_19 = arith.constant dense<0.000000e+00> : vector<288x16xf32>
    %22 = tpu.matmul %20, %21, %cst_19 {dimension_numbers = #tpu.dot_dimension_numbers<[1], [0], [0], [1], [0, 0, 1, 1], [], []>} : vector<288x16xbf16>, vector<16x16xbf16>, vector<288x16xf32> -> vector<288x16xf32>
    %23 = arith.addf %18, %22 : vector<288x16xf32>
    %c0_20 = arith.constant 0 : index
    %c20 = arith.constant 20 : index
    %c0_21 = arith.constant 0 : index
    %24 = vector.load %arg1[%c0_20, %c20, %c0_21] : memref<1x342x16xbf16, #tpu.memory_space<vmem>>, vector<1x288x16xbf16>
    %25 = vector.shape_cast %24 : vector<1x288x16xbf16> to vector<288x16xbf16>
    %c80 = arith.constant 80 : index
    %c0_22 = arith.constant 0 : index
    %26 = vector.load %arg2[%c80, %c0_22] : memref<144x16xbf16, #tpu.memory_space<vmem>>, vector<16x16xbf16>
    %cst_23 = arith.constant dense<0.000000e+00> : vector<288x16xf32>
    %27 = tpu.matmul %25, %26, %cst_23 {dimension_numbers = #tpu.dot_dimension_numbers<[1], [0], [0], [1], [0, 0, 1, 1], [], []>} : vector<288x16xbf16>, vector<16x16xbf16>, vector<288x16xf32> -> vector<288x16xf32>
    %28 = arith.addf %23, %27 : vector<288x16xf32>
    %c0_24 = arith.constant 0 : index
    %c36 = arith.constant 36 : index
    %c0_25 = arith.constant 0 : index
    %29 = vector.load %arg1[%c0_24, %c36, %c0_25] : memref<1x342x16xbf16, #tpu.memory_space<vmem>>, vector<1x288x16xbf16>
    %30 = vector.shape_cast %29 : vector<1x288x16xbf16> to vector<288x16xbf16>
    %c96 = arith.constant 96 : index
    %c0_26 = arith.constant 0 : index
    %31 = vector.load %arg2[%c96, %c0_26] : memref<144x16xbf16, #tpu.memory_space<vmem>>, vector<16x16xbf16>
    %cst_27 = arith.constant dense<0.000000e+00> : vector<288x16xf32>
    %32 = tpu.matmul %30, %31, %cst_27 {dimension_numbers = #tpu.dot_dimension_numbers<[1], [0], [0], [1], [0, 0, 1, 1], [], []>} : vector<288x16xbf16>, vector<16x16xbf16>, vector<288x16xf32> -> vector<288x16xf32>
    %33 = arith.addf %28, %32 : vector<288x16xf32>
    %c0_28 = arith.constant 0 : index
    %c37 = arith.constant 37 : index
    %c0_29 = arith.constant 0 : index
    %34 = vector.load %arg1[%c0_28, %c37, %c0_29] : memref<1x342x16xbf16, #tpu.memory_space<vmem>>, vector<1x288x16xbf16>
    %35 = vector.shape_cast %34 : vector<1x288x16xbf16> to vector<288x16xbf16>
    %c112 = arith.constant 112 : index
    %c0_30 = arith.constant 0 : index
    %36 = vector.load %arg2[%c112, %c0_30] : memref<144x16xbf16, #tpu.memory_space<vmem>>, vector<16x16xbf16>
    %cst_31 = arith.constant dense<0.000000e+00> : vector<288x16xf32>
    %37 = tpu.matmul %35, %36, %cst_31 {dimension_numbers = #tpu.dot_dimension_numbers<[1], [0], [0], [1], [0, 0, 1, 1], [], []>} : vector<288x16xbf16>, vector<16x16xbf16>, vector<288x16xf32> -> vector<288x16xf32>
    %38 = arith.addf %33, %37 : vector<288x16xf32>
    %c0_32 = arith.constant 0 : index
    %c38 = arith.constant 38 : index
    %c0_33 = arith.constant 0 : index
    %39 = vector.load %arg1[%c0_32, %c38, %c0_33] : memref<1x342x16xbf16, #tpu.memory_space<vmem>>, vector<1x288x16xbf16>
    %40 = vector.shape_cast %39 : vector<1x288x16xbf16> to vector<288x16xbf16>
    %c128 = arith.constant 128 : index
    %c0_34 = arith.constant 0 : index
    %41 = vector.load %arg2[%c128, %c0_34] : memref<144x16xbf16, #tpu.memory_space<vmem>>, vector<16x16xbf16>
    %cst_35 = arith.constant dense<0.000000e+00> : vector<288x16xf32>
    %42 = tpu.matmul %40, %41, %cst_35 {dimension_numbers = #tpu.dot_dimension_numbers<[1], [0], [0], [1], [0, 0, 1, 1], [], []>} : vector<288x16xbf16>, vector<16x16xbf16>, vector<288x16xf32> -> vector<288x16xf32>
    %43 = arith.addf %38, %42 : vector<288x16xf32>
    %c0_36 = arith.constant 0 : index
    %c0_37 = arith.constant 0 : index
    %44 = vector.load %arg3[%c0_36, %c0_37] : memref<1x16xf32, #tpu.memory_space<vmem>>, vector<1x16xf32>
    %45 = vector.broadcast %44 : vector<1x16xf32> to vector<288x16xf32>
    %46 = arith.addf %43, %45 : vector<288x16xf32>
    %cst_38 = arith.constant 0.000000e+00 : f32
    %47 = vector.broadcast %cst_38 : f32 to vector<288x16xf32>
    %48 = arith.maximumf %46, %47 : vector<288x16xf32>
    %49 = arith.truncf %48 : vector<288x16xf32> to vector<288x16xbf16>
    %c0_39 = arith.constant 0 : index
    %c0_40 = arith.constant 0 : index
    %50 = vector.load %arg4[%c0_39, %c0_40] : memref<16x15xbf16, #tpu.memory_space<vmem>>, vector<16x15xbf16>
    %cst_41 = arith.constant dense<0.000000e+00> : vector<288x15xf32>
    %51 = tpu.matmul %49, %50, %cst_41 {dimension_numbers = #tpu.dot_dimension_numbers<[1], [0], [0], [1], [0, 0, 1, 1], [], []>} : vector<288x16xbf16>, vector<16x15xbf16>, vector<288x15xf32> -> vector<288x15xf32>
    %c0_42 = arith.constant 0 : index
    %c0_43 = arith.constant 0 : index
    %52 = vector.load %arg5[%c0_42, %c0_43] : memref<1x15xf32, #tpu.memory_space<vmem>>, vector<1x15xf32>
    %53 = vector.broadcast %52 : vector<1x15xf32> to vector<288x15xf32>
    %54 = arith.addf %51, %53 : vector<288x15xf32>
    %c0_44 = arith.constant 0 : index
    %c0_45 = arith.constant 0 : index
    %c0_46 = arith.constant 0 : index
    %55 = vector.load %arg6[%c0_44, %c0_45, %c0_46] : memref<1x288x15xf32, #tpu.memory_space<vmem>>, vector<1x288x15xf32>
    %56 = vector.shape_cast %55 : vector<1x288x15xf32> to vector<288x15xf32>
    %57 = vector.shape_cast %54 : vector<288x15xf32> to vector<1x288x15xf32>
    tpu.vector_store %arg6[%c0_44, %c0_45, %c0_46], %57 {strides = array<i32>} : memref<1x288x15xf32, #tpu.memory_space<vmem>>, vector<1x288x15xf32>,
    return
  }
  func.func @transform_0(%arg0: i32) -> (i32, i32, i32) {
    %c0_i32 = arith.constant 0 : i32
    %c0_i32_0 = arith.constant 0 : i32
    %c0_i32_1 = arith.constant 0 : i32
    return %arg0, %c0_i32, %c0_i32_0 : i32, i32, i32
  }
  func.func @transform_1(%arg0: i32) -> (i32, i32) {
    %c0_i32 = arith.constant 0 : i32
    %c0_i32_0 = arith.constant 0 : i32
    %c0_i32_1 = arith.constant 0 : i32
    return %c0_i32, %c0_i32_0 : i32, i32
  }
  func.func @transform_2(%arg0: i32) -> (i32, i32) {
    %c0_i32 = arith.constant 0 : i32
    %c0_i32_0 = arith.constant 0 : i32
    %c0_i32_1 = arith.constant 0 : i32
    return %c0_i32, %c0_i32_0 : i32, i32
  }
  func.func @transform_3(%arg0: i32) -> (i32, i32) {
    %c0_i32 = arith.constant 0 : i32
    %c0_i32_0 = arith.constant 0 : i32
    %c0_i32_1 = arith.constant 0 : i32
    return %c0_i32, %c0_i32_0 : i32, i32
  }
  func.func @transform_4(%arg0: i32) -> (i32, i32) {
    %c0_i32 = arith.constant 0 : i32
    %c0_i32_0 = arith.constant 0 : i32
    %c0_i32_1 = arith.constant 0 : i32
    return %c0_i32, %c0_i32_0 : i32, i32
  }
  func.func @transform_5(%arg0: i32) -> (i32, i32, i32) {
    %c0_i32 = arith.constant 0 : i32
    %c0_i32_0 = arith.constant 0 : i32
    %c0_i32_1 = arith.constant 0 : i32
    return %arg0, %c0_i32, %c0_i32_0 : i32, i32, i32
  }
}

module attributes {stable_mosaic.version = 11 : i64} {
  func.func @_conv3x3_kernel(%arg0: i32, %arg1: memref<1x342x3xbf16, #tpu.memory_space<vmem>>, %arg2: memref<27x16xbf16, #tpu.memory_space<vmem>>, %arg3: memref<1x16xf32, #tpu.memory_space<vmem>>, %arg4: memref<1x288x16xbf16, #tpu.memory_space<vmem>>) attributes {dimension_semantics = [#tpu.dimension_semantics<parallel>], iteration_bounds = array<i64: 2>, scalar_prefetch = 0 : i64, scratch_operands = 0 : i64, tpu.core_type = #tpu.core_type<tc>, window_params = [{transform_indices = @transform_0, window_bounds = array<i64: 1, 342, 3>}, {pipeline_mode = #tpu.pipeline_mode<synchronous>, transform_indices = @transform_1, window_bounds = array<i64: 27, 16>}, {pipeline_mode = #tpu.pipeline_mode<synchronous>, transform_indices = @transform_2, window_bounds = array<i64: 1, 16>}, {transform_indices = @transform_3, window_bounds = array<i64: 1, 288, 16>}]} {
    %c0 = arith.constant 0 : index
    %c0_0 = arith.constant 0 : index
    %c0_1 = arith.constant 0 : index
    %0 = vector.load %arg1[%c0, %c0_0, %c0_1] : memref<1x342x3xbf16, #tpu.memory_space<vmem>>, vector<1x288x3xbf16>
    %1 = vector.shape_cast %0 : vector<1x288x3xbf16> to vector<288x3xbf16>
    %c0_2 = arith.constant 0 : index
    %c0_3 = arith.constant 0 : index
    %2 = vector.load %arg2[%c0_2, %c0_3] : memref<27x16xbf16, #tpu.memory_space<vmem>>, vector<3x16xbf16>
    %cst = arith.constant dense<0.000000e+00> : vector<288x16xf32>
    %3 = tpu.matmul %1, %2, %cst {dimension_numbers = #tpu.dot_dimension_numbers<[1], [0], [0], [1], [0, 0, 1, 1], [], []>} : vector<288x3xbf16>, vector<3x16xbf16>, vector<288x16xf32> -> vector<288x16xf32>
    %c0_4 = arith.constant 0 : index
    %c1 = arith.constant 1 : index
    %c0_5 = arith.constant 0 : index
    %4 = vector.load %arg1[%c0_4, %c1, %c0_5] : memref<1x342x3xbf16, #tpu.memory_space<vmem>>, vector<1x288x3xbf16>
    %5 = vector.shape_cast %4 : vector<1x288x3xbf16> to vector<288x3xbf16>
    %c3 = arith.constant 3 : index
    %c0_6 = arith.constant 0 : index
    %6 = vector.load %arg2[%c3, %c0_6] : memref<27x16xbf16, #tpu.memory_space<vmem>>, vector<3x16xbf16>
    %cst_7 = arith.constant dense<0.000000e+00> : vector<288x16xf32>
    %7 = tpu.matmul %5, %6, %cst_7 {dimension_numbers = #tpu.dot_dimension_numbers<[1], [0], [0], [1], [0, 0, 1, 1], [], []>} : vector<288x3xbf16>, vector<3x16xbf16>, vector<288x16xf32> -> vector<288x16xf32>
    %8 = arith.addf %3, %7 : vector<288x16xf32>
    %c0_8 = arith.constant 0 : index
    %c2 = arith.constant 2 : index
    %c0_9 = arith.constant 0 : index
    %9 = vector.load %arg1[%c0_8, %c2, %c0_9] : memref<1x342x3xbf16, #tpu.memory_space<vmem>>, vector<1x288x3xbf16>
    %10 = vector.shape_cast %9 : vector<1x288x3xbf16> to vector<288x3xbf16>
    %c6 = arith.constant 6 : index
    %c0_10 = arith.constant 0 : index
    %11 = vector.load %arg2[%c6, %c0_10] : memref<27x16xbf16, #tpu.memory_space<vmem>>, vector<3x16xbf16>
    %cst_11 = arith.constant dense<0.000000e+00> : vector<288x16xf32>
    %12 = tpu.matmul %10, %11, %cst_11 {dimension_numbers = #tpu.dot_dimension_numbers<[1], [0], [0], [1], [0, 0, 1, 1], [], []>} : vector<288x3xbf16>, vector<3x16xbf16>, vector<288x16xf32> -> vector<288x16xf32>
    %13 = arith.addf %8, %12 : vector<288x16xf32>
    %c0_12 = arith.constant 0 : index
    %c18 = arith.constant 18 : index
    %c0_13 = arith.constant 0 : index
    %14 = vector.load %arg1[%c0_12, %c18, %c0_13] : memref<1x342x3xbf16, #tpu.memory_space<vmem>>, vector<1x288x3xbf16>
    %15 = vector.shape_cast %14 : vector<1x288x3xbf16> to vector<288x3xbf16>
    %c9 = arith.constant 9 : index
    %c0_14 = arith.constant 0 : index
    %16 = vector.load %arg2[%c9, %c0_14] : memref<27x16xbf16, #tpu.memory_space<vmem>>, vector<3x16xbf16>
    %cst_15 = arith.constant dense<0.000000e+00> : vector<288x16xf32>
    %17 = tpu.matmul %15, %16, %cst_15 {dimension_numbers = #tpu.dot_dimension_numbers<[1], [0], [0], [1], [0, 0, 1, 1], [], []>} : vector<288x3xbf16>, vector<3x16xbf16>, vector<288x16xf32> -> vector<288x16xf32>
    %18 = arith.addf %13, %17 : vector<288x16xf32>
    %c0_16 = arith.constant 0 : index
    %c19 = arith.constant 19 : index
    %c0_17 = arith.constant 0 : index
    %19 = vector.load %arg1[%c0_16, %c19, %c0_17] : memref<1x342x3xbf16, #tpu.memory_space<vmem>>, vector<1x288x3xbf16>
    %20 = vector.shape_cast %19 : vector<1x288x3xbf16> to vector<288x3xbf16>
    %c12 = arith.constant 12 : index
    %c0_18 = arith.constant 0 : index
    %21 = vector.load %arg2[%c12, %c0_18] : memref<27x16xbf16, #tpu.memory_space<vmem>>, vector<3x16xbf16>
    %cst_19 = arith.constant dense<0.000000e+00> : vector<288x16xf32>
    %22 = tpu.matmul %20, %21, %cst_19 {dimension_numbers = #tpu.dot_dimension_numbers<[1], [0], [0], [1], [0, 0, 1, 1], [], []>} : vector<288x3xbf16>, vector<3x16xbf16>, vector<288x16xf32> -> vector<288x16xf32>
    %23 = arith.addf %18, %22 : vector<288x16xf32>
    %c0_20 = arith.constant 0 : index
    %c20 = arith.constant 20 : index
    %c0_21 = arith.constant 0 : index
    %24 = vector.load %arg1[%c0_20, %c20, %c0_21] : memref<1x342x3xbf16, #tpu.memory_space<vmem>>, vector<1x288x3xbf16>
    %25 = vector.shape_cast %24 : vector<1x288x3xbf16> to vector<288x3xbf16>
    %c15 = arith.constant 15 : index
    %c0_22 = arith.constant 0 : index
    %26 = vector.load %arg2[%c15, %c0_22] : memref<27x16xbf16, #tpu.memory_space<vmem>>, vector<3x16xbf16>
    %cst_23 = arith.constant dense<0.000000e+00> : vector<288x16xf32>
    %27 = tpu.matmul %25, %26, %cst_23 {dimension_numbers = #tpu.dot_dimension_numbers<[1], [0], [0], [1], [0, 0, 1, 1], [], []>} : vector<288x3xbf16>, vector<3x16xbf16>, vector<288x16xf32> -> vector<288x16xf32>
    %28 = arith.addf %23, %27 : vector<288x16xf32>
    %c0_24 = arith.constant 0 : index
    %c36 = arith.constant 36 : index
    %c0_25 = arith.constant 0 : index
    %29 = vector.load %arg1[%c0_24, %c36, %c0_25] : memref<1x342x3xbf16, #tpu.memory_space<vmem>>, vector<1x288x3xbf16>
    %30 = vector.shape_cast %29 : vector<1x288x3xbf16> to vector<288x3xbf16>
    %c18_26 = arith.constant 18 : index
    %c0_27 = arith.constant 0 : index
    %31 = vector.load %arg2[%c18_26, %c0_27] : memref<27x16xbf16, #tpu.memory_space<vmem>>, vector<3x16xbf16>
    %cst_28 = arith.constant dense<0.000000e+00> : vector<288x16xf32>
    %32 = tpu.matmul %30, %31, %cst_28 {dimension_numbers = #tpu.dot_dimension_numbers<[1], [0], [0], [1], [0, 0, 1, 1], [], []>} : vector<288x3xbf16>, vector<3x16xbf16>, vector<288x16xf32> -> vector<288x16xf32>
    %33 = arith.addf %28, %32 : vector<288x16xf32>
    %c0_29 = arith.constant 0 : index
    %c37 = arith.constant 37 : index
    %c0_30 = arith.constant 0 : index
    %34 = vector.load %arg1[%c0_29, %c37, %c0_30] : memref<1x342x3xbf16, #tpu.memory_space<vmem>>, vector<1x288x3xbf16>
    %35 = vector.shape_cast %34 : vector<1x288x3xbf16> to vector<288x3xbf16>
    %c21 = arith.constant 21 : index
    %c0_31 = arith.constant 0 : index
    %36 = vector.load %arg2[%c21, %c0_31] : memref<27x16xbf16, #tpu.memory_space<vmem>>, vector<3x16xbf16>
    %cst_32 = arith.constant dense<0.000000e+00> : vector<288x16xf32>
    %37 = tpu.matmul %35, %36, %cst_32 {dimension_numbers = #tpu.dot_dimension_numbers<[1], [0], [0], [1], [0, 0, 1, 1], [], []>} : vector<288x3xbf16>, vector<3x16xbf16>, vector<288x16xf32> -> vector<288x16xf32>
    %38 = arith.addf %33, %37 : vector<288x16xf32>
    %c0_33 = arith.constant 0 : index
    %c38 = arith.constant 38 : index
    %c0_34 = arith.constant 0 : index
    %39 = vector.load %arg1[%c0_33, %c38, %c0_34] : memref<1x342x3xbf16, #tpu.memory_space<vmem>>, vector<1x288x3xbf16>
    %40 = vector.shape_cast %39 : vector<1x288x3xbf16> to vector<288x3xbf16>
    %c24 = arith.constant 24 : index
    %c0_35 = arith.constant 0 : index
    %41 = vector.load %arg2[%c24, %c0_35] : memref<27x16xbf16, #tpu.memory_space<vmem>>, vector<3x16xbf16>
    %cst_36 = arith.constant dense<0.000000e+00> : vector<288x16xf32>
    %42 = tpu.matmul %40, %41, %cst_36 {dimension_numbers = #tpu.dot_dimension_numbers<[1], [0], [0], [1], [0, 0, 1, 1], [], []>} : vector<288x3xbf16>, vector<3x16xbf16>, vector<288x16xf32> -> vector<288x16xf32>
    %43 = arith.addf %38, %42 : vector<288x16xf32>
    %c0_37 = arith.constant 0 : index
    %c0_38 = arith.constant 0 : index
    %44 = vector.load %arg3[%c0_37, %c0_38] : memref<1x16xf32, #tpu.memory_space<vmem>>, vector<1x16xf32>
    %45 = vector.broadcast %44 : vector<1x16xf32> to vector<288x16xf32>
    %46 = arith.addf %43, %45 : vector<288x16xf32>
    %cst_39 = arith.constant 0.000000e+00 : f32
    %47 = vector.broadcast %cst_39 : f32 to vector<288x16xf32>
    %48 = arith.maximumf %46, %47 : vector<288x16xf32>
    %49 = arith.truncf %48 : vector<288x16xf32> to vector<288x16xbf16>
    %c0_40 = arith.constant 0 : index
    %c0_41 = arith.constant 0 : index
    %c0_42 = arith.constant 0 : index
    %50 = vector.load %arg4[%c0_40, %c0_41, %c0_42] : memref<1x288x16xbf16, #tpu.memory_space<vmem>>, vector<1x288x16xbf16>
    %51 = vector.shape_cast %50 : vector<1x288x16xbf16> to vector<288x16xbf16>
    %52 = vector.shape_cast %49 : vector<288x16xbf16> to vector<1x288x16xbf16>
    tpu.vector_store %arg4[%c0_40, %c0_41, %c0_42], %52 {strides = array<i32>} : memref<1x288x16xbf16, #tpu.memory_space<vmem>>, vector<1x288x16xbf16>,
    return
  }
  func.func @transform_0(%arg0: i32) -> (i32, i32, i32) {
    %c0_i32 = arith.constant 0 : i32
    %c0_i32_0 = arith.constant 0 : i32
    %c0_i32_1 = arith.constant 0 : i32
    return %arg0, %c0_i32, %c0_i32_0 : i32, i32, i32
  }
  func.func @transform_1(%arg0: i32) -> (i32, i32) {
    %c0_i32 = arith.constant 0 : i32
    %c0_i32_0 = arith.constant 0 : i32
    %c0_i32_1 = arith.constant 0 : i32
    return %c0_i32, %c0_i32_0 : i32, i32
  }
  func.func @transform_2(%arg0: i32) -> (i32, i32) {
    %c0_i32 = arith.constant 0 : i32
    %c0_i32_0 = arith.constant 0 : i32
    %c0_i32_1 = arith.constant 0 : i32
    return %c0_i32, %c0_i32_0 : i32, i32
  }
  func.func @transform_3(%arg0: i32) -> (i32, i32, i32) {
    %c0_i32 = arith.constant 0 : i32
    %c0_i32_0 = arith.constant 0 : i32
    %c0_i32_1 = arith.constant 0 : i32
    return %arg0, %c0_i32, %c0_i32_0 : i32, i32, i32
  }
}

module attributes {stable_mosaic.version = 11 : i64} {
  func.func @_roi_head_kernel(%arg0: memref<64x784xbf16, #tpu.memory_space<vmem>>, %arg1: memref<784x64xbf16, #tpu.memory_space<vmem>>, %arg2: memref<1x64xf32, #tpu.memory_space<vmem>>, %arg3: memref<64x64xbf16, #tpu.memory_space<vmem>>, %arg4: memref<1x64xf32, #tpu.memory_space<vmem>>, %arg5: memref<64x25xbf16, #tpu.memory_space<vmem>>, %arg6: memref<1x25xf32, #tpu.memory_space<vmem>>, %arg7: memref<64x25xf32, #tpu.memory_space<vmem>>) attributes {dimension_semantics = [], scalar_prefetch = 0 : i64, scratch_operands = 0 : i64, tpu.core_type = #tpu.core_type<tc>} {
    %c0 = arith.constant 0 : index
    %c0_0 = arith.constant 0 : index
    %0 = vector.load %arg0[%c0, %c0_0] : memref<64x784xbf16, #tpu.memory_space<vmem>>, vector<64x784xbf16>
    %c0_1 = arith.constant 0 : index
    %c0_2 = arith.constant 0 : index
    %1 = vector.load %arg1[%c0_1, %c0_2] : memref<784x64xbf16, #tpu.memory_space<vmem>>, vector<784x64xbf16>
    %cst = arith.constant dense<0.000000e+00> : vector<64x64xf32>
    %2 = tpu.matmul %0, %1, %cst {dimension_numbers = #tpu.dot_dimension_numbers<[1], [0], [0], [1], [0, 0, 1, 1], [], []>} : vector<64x784xbf16>, vector<784x64xbf16>, vector<64x64xf32> -> vector<64x64xf32>
    %c0_3 = arith.constant 0 : index
    %c0_4 = arith.constant 0 : index
    %3 = vector.load %arg2[%c0_3, %c0_4] : memref<1x64xf32, #tpu.memory_space<vmem>>, vector<1x64xf32>
    %4 = vector.broadcast %3 : vector<1x64xf32> to vector<64x64xf32>
    %5 = arith.addf %2, %4 : vector<64x64xf32>
    %cst_5 = arith.constant 0.000000e+00 : f32
    %6 = vector.broadcast %cst_5 : f32 to vector<64x64xf32>
    %7 = arith.maximumf %5, %6 : vector<64x64xf32>
    %8 = arith.truncf %7 : vector<64x64xf32> to vector<64x64xbf16>
    %c0_6 = arith.constant 0 : index
    %c0_7 = arith.constant 0 : index
    %9 = vector.load %arg3[%c0_6, %c0_7] : memref<64x64xbf16, #tpu.memory_space<vmem>>, vector<64x64xbf16>
    %cst_8 = arith.constant dense<0.000000e+00> : vector<64x64xf32>
    %10 = tpu.matmul %8, %9, %cst_8 {dimension_numbers = #tpu.dot_dimension_numbers<[1], [0], [0], [1], [0, 0, 1, 1], [], []>} : vector<64x64xbf16>, vector<64x64xbf16>, vector<64x64xf32> -> vector<64x64xf32>
    %c0_9 = arith.constant 0 : index
    %c0_10 = arith.constant 0 : index
    %11 = vector.load %arg4[%c0_9, %c0_10] : memref<1x64xf32, #tpu.memory_space<vmem>>, vector<1x64xf32>
    %12 = vector.broadcast %11 : vector<1x64xf32> to vector<64x64xf32>
    %13 = arith.addf %10, %12 : vector<64x64xf32>
    %cst_11 = arith.constant 0.000000e+00 : f32
    %14 = vector.broadcast %cst_11 : f32 to vector<64x64xf32>
    %15 = arith.maximumf %13, %14 : vector<64x64xf32>
    %16 = arith.truncf %15 : vector<64x64xf32> to vector<64x64xbf16>
    %c0_12 = arith.constant 0 : index
    %c0_13 = arith.constant 0 : index
    %17 = vector.load %arg5[%c0_12, %c0_13] : memref<64x25xbf16, #tpu.memory_space<vmem>>, vector<64x25xbf16>
    %cst_14 = arith.constant dense<0.000000e+00> : vector<64x25xf32>
    %18 = tpu.matmul %16, %17, %cst_14 {dimension_numbers = #tpu.dot_dimension_numbers<[1], [0], [0], [1], [0, 0, 1, 1], [], []>} : vector<64x64xbf16>, vector<64x25xbf16>, vector<64x25xf32> -> vector<64x25xf32>
    %c0_15 = arith.constant 0 : index
    %c0_16 = arith.constant 0 : index
    %19 = vector.load %arg6[%c0_15, %c0_16] : memref<1x25xf32, #tpu.memory_space<vmem>>, vector<1x25xf32>
    %20 = vector.broadcast %19 : vector<1x25xf32> to vector<64x25xf32>
    %21 = arith.addf %18, %20 : vector<64x25xf32>
    %c0_17 = arith.constant 0 : index
    %c0_18 = arith.constant 0 : index
    %22 = vector.load %arg7[%c0_17, %c0_18] : memref<64x25xf32, #tpu.memory_space<vmem>>, vector<64x25xf32>
    tpu.vector_store %arg7[%c0_17, %c0_18], %21 {strides = array<i32>} : memref<64x25xf32, #tpu.memory_space<vmem>>, vector<64x25xf32>,
    return
  }
}

</mosaic_0001>

<bundles_post_ra>
// kernel: frcnn_forward.4
= control target key start
LH: loop header
LB: loop body
LE: loop exit
PB: predicated region body
PF: predicated region fallthrough
CT: control target
= control target key end

     0   :  { %s5390_s18 = smov 0   ;;  %s6445_s0 = inlined_call_operand.vmem [shape: bf16[2,342,16], index: 0, kind: input, shape index: {}]   ;;  %s6446_s1 = inlined_call_operand.vmem [shape: bf16[144,16], index: 1, kind: input, shape index: {}]   ;;  %s6447_s2 = inlined_call_operand.vmem [shape: f32[1,16], index: 2, kind: input, shape index: {}]   ;;  %s6448_s3 = inlined_call_operand.vmem [shape: bf16[16,15], index: 3, kind: input, shape index: {}]   ;;  %s6449_s4 = inlined_call_operand.vmem [shape: f32[1,15], index: 4, kind: input, shape index: {}]   ;;  %s6450_s5 = inlined_call_operand.vmem [shape: f32[2,288,15], index: 5, kind: output, shape index: {}]  }
   0x1 LB: > { %s4136_s19 = sadd.s32 4294967295, %s5358_s18   ;;  %p4140_p0 = scmp.ge.s32.totalorder %s5358_s18, 1  ;;  %s5358_s18 = sphi %s5390_s18, %s15_s18  }
   0x2   : > { %p187_p1 = scmp.lt.s32.totalorder %s5358_s18, 3 }
   0x4   : > { %p188_p2 = pnand %p4140_p0, %p187_p1 }
   0x6   : > { %191 = sbr.rel (%p188_p2) target bundleno = 827 (0x33b), region = 40 }
   0xd   : > { %v5267_v0 = vld [vmem:[%s6446_s1 + $0x20] sm:$0xff]   ;;  %p215_p3 = scmp.lt.s32.totalorder %s4136_s19, 1  ;;  %v5268_v1 = vld [vmem:[%s6446_s1 + $0x8] sm:$0xff]   ;;  %vm360_vm0 = vsmask.f32 7424  ;;  %vm515_vm1 = vcmask 130048  }
   0xe   : > { %4741 = vmatprep.subr.bf16.mxu0 %v5267_v0  ;;  %v5409_v2 = vld [vmem:[%s6446_s1 + $0x28] sm:$0xff]   ;;  %4589 = vmatprep.subr.bf16.mxu1 %v5268_v1  ;;  %v5308_v3 = vld [vmem:[%s6446_s1] sm:$0xff]   ;;  %vm1731_vm2 = vsmask.f32 6400  ;;  %v5490_v55 = vld [vmem:[%s6446_s1 + $0x30] sm:$0xff]   ;;  %vm2181_vm3 = vcmask 1045504  }
   0xf   : > { %s6466_s19 = smov (!%p215_p3, %s4136_s19), 1  ;;  %4742 = vmatpush3.bf16.msra.mxu0 %v5267_v0  ;;  %4590 = vmatpush3.bf16.msra.mxu1 %v5268_v1  ;;  %vm972_vm4 = vcmask 1046528   ;;  %vm2940_vm5 = vsmask.f32 5376  ;;  %vm3390_vm6 = vcmask 1044480   ;;  %vm4044_vm7 = vcmask 121856  }
  0x10   : > { %s5257_s26 = smul.u32 172, %s6466_s19  ;;  %4779 = vmatprep.subr.bf16.mxu0 %v5409_v2  ;;  %4627 = vmatprep.subr.bf16.mxu1 %v5308_v3 }
  0x11   : > { %s5258_s23 = smul.u32 288, %s6466_s19 }
  0x12   : > { %s5419_s6 = scalar_lea.vmem %s6445_s0, %s5257_s26 }
  0x13   : > { %v226_v4 = vld [vmem:[%s5419_s6] sm:$0xf]  ;;  %v5423_v5 = vld [vmem:[%s5419_s6 + $0x4] sm:$0xf]  ;;  %v5429_v7 = vld [vmem:[%s5419_s6 + $0x8] sm:$0xff]   ;;  %s6332_s28 = scalar_lea.vmem %s6450_s5, %s5258_s23 }
  0x14   : > { %6457 = vst [vmem:[#allocation2_spill] sm:$0xff] %v5423_v5  ;;  %v5426_v6 = vcombine.low %v226_v4, %v5423_v5  ;;  %v1283_v8 = vld [vmem:[%s5419_s6 + $0x8] sm:$0xe]  ;;  %v5433_v9 = vld [vmem:[%s5419_s6 + $0xc] sm:$0xf]  ;;  %v369_v12 = vshll.u32 %v5429_v7, 16 }
  0x15   : > { %v373_v13 = vshrl.u32 %v5429_v7, 16  ;;  %v5440_v14 = vld [vmem:[%s5419_s6 + $0x10] sm:$0xff]   ;;  %v5446_v16 = vcombine.low %v1283_v8, %v5433_v9  ;;  %v5454_v24 = vld [vmem:[%s5419_s6 + $0x18] sm:$0xff]   ;;  %v5460_v30 = vld [vmem:[%s5419_s6 + $0x20] sm:$0xff]  }
  0x16   : > { %v362_v10 = vshrl.u32 %v5426_v6, 16  ;;  %v364_v11 = vshll.u32 %v5426_v6, 16  ;;  %v5443_v15 = vld [vmem:[%s5419_s6 + $0x10] sm:$0xff]   ;;  %v371_v18 = vrot.slane %v369_v12, 1  ;;  %v1741_v19 = vshrl.u32 %v5440_v14, 16  ;;  %v5457_v29 = vld [vmem:[%s5419_s6 + $0x18] sm:$0xff]  }
  0x17   : > { %6458 = vst [vmem:[#allocation3_spill] sm:$0xff] %v5446_v16  ;;  %v1744_v20 = vshll.u32 %v5440_v14, 16  ;;  %v1733_v21 = vshrl.u32 %v5446_v16, 16  ;;  %v1736_v22 = vshll.u32 %v5446_v16, 16  ;;  %v377_v23 = vshll.u32 %v5443_v15, 16  ;;  %v5470_v43 = vld [vmem:[%s5419_s6 + $0x20] sm:$0xff]  }
  0x18   : > { %v366_v17 = vrot.slane %v364_v11, 1  ;;  %v375_v26 = vor.u32 %v373_v13, %v371_v18  ;;  %v1743_v27 = vrot.slane %v1741_v19, 1  ;;  %v1750_v34 = vshrl.u32 %v5454_v24, 16  ;;  %v5473_v44 = vld [vmem:[%s5419_s6 + $0x28] sm:$0xff]   ;;  %v5485_v54 = vld [vmem:[%s5419_s6 + $0x30] sm:$0xff]  }
  0x19   : > { %v1746_v28 = vrot.slane %v1744_v20, 2  ;;  %v1735_v31 = vrot.slane %v1733_v21, 1  ;;  %v1738_v32 = vrot.slane %v1736_v22, 2  ;;  %v379_v33 = vrot.slane %v377_v23, 1  ;;  %v5479_v49 = vld [vmem:[%s5419_s6 + $0x28] sm:$0xff]   ;;  %v5495_v60 = vld [vmem:[%s5419_s6 + $0x30] sm:$0xff]  }
  0x1a   : > { %v367_v25 = vor.u32 %v366_v17, %v362_v10  ;;  %v1753_v37 = vshll.u32 %v5454_v24, 16  ;;  %v381_v38 = vshrl.u32 %v5443_v15, 16  ;;  %v1752_v41 = vrot.slane %v1750_v34, 1  ;;  %v5507_v17 = vld [vmem:[%s5419_s6 + $0x38] sm:$0xff]  }
  0x1b   : > { %v1747_v36 = vor.u32 %v1746_v28, %v1743_v27  ;;  %v1739_v39 = vor.u32 %v1738_v32, %v1735_v31  ;;  %v380_v40 = vsel %vm360_vm0, %v375_v26, %v379_v33  ;;  %v385_v42 = vshll.u32 %v5457_v29, 16  ;;  %v5516_v27 = vld [vmem:[%s5419_s6 + $0x38] sm:$0xff]  }
  0x1c   : > { %v372_v35 = vsel %vm360_vm0, %v367_v25, %v371_v18  ;;  %v1755_v45 = vrot.slane %v1753_v37, 2  ;;  %v383_v46 = vor.u32 %v381_v38, %v379_v33  ;;  %v1759_v47 = vshrl.u32 %v5460_v30, 16  ;;  %v5526_v37 = vld [vmem:[%s5419_s6 + $0x40] sm:$0xff]  }
  0x1d   : > { %4591 = vmatprep.mubr.msk.bf16.mxu1 %vm515_vm1, %v372_v35  ;;  %v1762_v48 = vshll.u32 %v5460_v30, 16  ;;  %v1748_v50 = vsel %vm1731_vm2, %v1739_v39, %v1747_v36  ;;  %v387_v51 = vrot.slane %v385_v42, 1  ;;  %v389_v52 = vshrl.u32 %v5457_v29, 16  ;;  %v5531_v42 = vld [vmem:[%s5419_s6 + $0x40] sm:$0xff]  }
  0x1e   : > { %4592 = vmatmul.mubr.msk.bf16.vlgmr.msra.gmra.mrb[0].mxu1 %vm515_vm1, %v380_v40  ;;  %v393_v53 = vshll.u32 %v5470_v43, 16  ;;  %4743 = vmatprep.mubr.msk.bf16.mxu0 %vm515_vm1, %v1748_v50  ;;  %v1756_v56 = vor.u32 %v1755_v45, %v1752_v41  ;;  %v1761_v57 = vrot.slane %v1759_v47, 1  ;;  %v1768_v59 = vshrl.u32 %v5473_v44, 16 }
  0x1f   : > { %4628 = vmatpush3.bf16.msra.mxu1 %v5308_v3  ;;  %v1764_v58 = vrot.slane %v1762_v48, 2  ;;  %v388_v61 = vsel %vm360_vm0, %v383_v46, %v387_v51  ;;  %v391_v62 = vor.u32 %v389_v52, %v387_v51  ;;  %v1771_v0 = vshll.u32 %v5473_v44, 16 }
  0x20   : > { %v395_v63 = vrot.slane %v393_v53, 1  ;;  %v1757_v1 = vsel %vm1731_vm2, %v1747_v36, %v1756_v56  ;;  %4595 = vmatprep.mubr.msk.bf16.mxu1 %vm515_vm1, %v388_v61  ;;  %v1770_v4 = vrot.slane %v1768_v59, 1  ;;  %v397_v8 = vshrl.u32 %v5470_v43, 16 }
  0x21   : > { %v1765_v3 = vor.u32 %v1764_v58, %v1761_v57  ;;  %4744 = vmatmul.mubr.msk.bf16.vlgmr.msra.gmra.mrb[0].mxu0 %vm515_vm1, %v1757_v1  ;;  %v1773_v11 = vrot.slane %v1771_v0, 2  ;;  %v401_v12 = vshll.u32 %v5479_v49, 16  ;;  %v1777_v13 = vshrl.u32 %v5485_v54, 16  ;;  %v5542_v57 = vld [vmem:[%s5419_s6 + $0x48] sm:$0xff]   ;;  %v5551_v1 = vld [vmem:[%s5419_s6 + $0x50] sm:$0xff]  }
  0x22   : > { %v396_v10 = vsel %vm360_vm0, %v391_v62, %v395_v63  ;;  %4780 = vmatpush3.bf16.msra.mxu0 %v5409_v2  ;;  %v399_v19 = vor.u32 %v397_v8, %v395_v63  ;;  %v1780_v20 = vshll.u32 %v5485_v54, 16  ;;  %v405_v21 = vshrl.u32 %v5479_v49, 16 }
  0x23   : > { %v1766_v18 = vsel %vm1731_vm2, %v1756_v56, %v1765_v3  ;;  %v1774_v22 = vor.u32 %v1773_v11, %v1770_v4  ;;  %v403_v23 = vrot.slane %v401_v12, 1  ;;  %v1779_v25 = vrot.slane %v1777_v13, 1  ;;  %4817 = vmatprep.subr.bf16.mxu0 %v5490_v55  ;;  %v5539_v56 = vld [vmem:[%s5419_s6 + $0x48] sm:$0xff]   ;;  %v5559_v13 = vld [vmem:[%s5419_s6 + $0x50] sm:$0xff]  }
  0x24   : > { %4747 = vmatprep.mubr.msk.bf16.mxu0 %vm515_vm1, %v1766_v18  ;;  %v409_v26 = vshll.u32 %v5495_v60, 16  ;;  %v1782_v2 = vrot.slane %v1780_v20, 2  ;;  %v1786_v28 = vshrl.u32 %v5507_v17, 16  ;;  %v1789_v31 = vshll.u32 %v5507_v17, 16  ;;  %v5564_v20 = vld [vmem:[%s5419_s6 + $0x58] sm:$0xff]  }
  0x25   : > { %v413_v32 = vshrl.u32 %v5495_v60, 16  ;;  %v1775_v33 = vsel %vm1731_vm2, %v1765_v3, %v1774_v22  ;;  %v404_v34 = vsel %vm360_vm0, %v399_v19, %v403_v23  ;;  %v407_v35 = vor.u32 %v405_v21, %v403_v23 }
  0x26   : > { %4596 = vmatmul.mubr.msk.bf16.gmra.mrb[4].mxu1 %vm515_vm1, %v396_v10  ;;  %v411_v36 = vrot.slane %v409_v26, 1  ;;  %v1783_v38 = vor.u32 %v1782_v2, %v1779_v25  ;;  %v1788_v39 = vrot.slane %v1786_v28, 1  ;;  %v1791_v40 = vrot.slane %v1789_v31, 2 }
  0x27   : > { %4599 = vmatprep.mubr.msk.bf16.mxu1 %vm515_vm1, %v404_v34  ;;  %v417_v41 = vshll.u32 %v5516_v27, 16  ;;  %v1795_v47 = vshrl.u32 %v5526_v37, 16  ;;  %v1798_v48 = vshll.u32 %v5526_v37, 16  ;;  %v421_v53 = vshrl.u32 %v5516_v27, 16 }
  0x28   : > { %v412_v45 = vsel %vm360_vm0, %v407_v35, %v411_v36  ;;  %v415_v46 = vor.u32 %v413_v32, %v411_v36  ;;  %v1784_v50 = vsel %vm1731_vm2, %v1774_v22, %v1783_v38  ;;  %v1792_v51 = vor.u32 %v1791_v40, %v1788_v39  ;;  %v5569_v32 = vld [vmem:[%s5419_s6 + $0x58] sm:$0xff]  }
  0x29   : > { %v419_v52 = vrot.slane %v417_v41, 1  ;;  %4748 = vmatmul.mubr.msk.bf16.gmra.mrb[4].mxu0 %vm515_vm1, %v1775_v33  ;;  %v1797_v58 = vrot.slane %v1795_v47, 1  ;;  %v1800_v59 = vrot.slane %v1798_v48, 2  ;;  %v425_v61 = vshll.u32 %v5531_v42, 16 }
  0x2a   : > { %v429_v62 = vshrl.u32 %v5531_v42, 16  ;;  %4751 = vmatprep.mubr.msk.bf16.mxu0 %vm515_vm1, %v1784_v50  ;;  %v1804_v0 = vshrl.u32 %v5539_v56, 16  ;;  %v1807_v4 = vshll.u32 %v5539_v56, 16  ;;  %v433_v8 = vshll.u32 %v5542_v57, 16 }
  0x2b   : > { %v420_v63 = vsel %vm360_vm0, %v415_v46, %v419_v52  ;;  %v1801_v3 = vor.u32 %v1800_v59, %v1797_v58  ;;  %v427_v10 = vrot.slane %v425_v61, 1  ;;  %v1813_v11 = vshrl.u32 %v5551_v1, 16 }
  0x2c   : > { %v1816_v12 = vshll.u32 %v5551_v1, 16  ;;  %v1793_v18 = vsel %vm1731_vm2, %v1783_v38, %v1792_v51  ;;  %v423_v19 = vor.u32 %v421_v53, %v419_v52  ;;  %v1806_v21 = vrot.slane %v1804_v0, 1  ;;  %v5577_v38 = vld [vmem:[%s5419_s6 + $0x60] sm:$0xff]   ;;  %v5590_v52 = vld [vmem:[%s5419_s6 + $0x68] sm:$0xff]  }
  0x2d   : > { %v1809_v22 = vrot.slane %v1807_v4, 2  ;;  %v431_v23 = vor.u32 %v429_v62, %v427_v10  ;;  %v435_v25 = vrot.slane %v433_v8, 1  ;;  %v1802_v26 = vsel %vm1731_vm2, %v1792_v51, %v1801_v3  ;;  %v5587_v51 = vld [vmem:[%s5419_s6 + $0x60] sm:$0xff]   ;;  %v5595_v0 = vld [vmem:[%s5419_s6 + $0x68] sm:$0xff]  }
  0x2e   : > { %4600 = vmatmul.mubr.msk.bf16.gmra.mrb[8].mxu1 %vm515_vm1, %v412_v45  ;;  %v1815_v2 = vrot.slane %v1813_v11, 1  ;;  %v1818_v28 = vrot.slane %v1816_v12, 2  ;;  %v441_v31 = vshll.u32 %v5559_v13, 16  ;;  %v428_v33 = vsel %vm360_vm0, %v423_v19, %v427_v10  ;;  %v5599_v11 = vld [vmem:[%s5419_s6 + $0x70] sm:$0xff]  }
  0x2f   : > { %4603 = vmatprep.mubr.msk.bf16.mxu1 %vm515_vm1, %v420_v63  ;;  %v437_v34 = vshrl.u32 %v5542_v57, 16  ;;  %v1822_v35 = vshrl.u32 %v5564_v20, 16  ;;  %v1825_v36 = vshll.u32 %v5564_v20, 16  ;;  %v1810_v39 = vor.u32 %v1809_v22, %v1806_v21 }
  0x30   : > { %v436_v40 = vsel %vm360_vm0, %v431_v23, %v435_v25  ;;  %v445_v41 = vshrl.u32 %v5559_v13, 16  ;;  %v449_v45 = vshll.u32 %v5569_v32, 16  ;;  %v1819_v46 = vor.u32 %v1818_v28, %v1815_v2 }
  0x31   : > { %4752 = vmatmul.mubr.msk.bf16.gmra.mrb[8].mxu0 %vm515_vm1, %v1793_v18  ;;  %v1831_v47 = vshrl.u32 %v5577_v38, 16  ;;  %v1834_v48 = vshll.u32 %v5577_v38, 16  ;;  %v443_v50 = vrot.slane %v441_v31, 1  ;;  %v439_v53 = vor.u32 %v437_v34, %v435_v25 }
  0x32   : > { %4755 = vmatprep.mubr.msk.bf16.mxu0 %vm515_vm1, %v1802_v26  ;;  %v1824_v58 = vrot.slane %v1822_v35, 1  ;;  %v1827_v59 = vrot.slane %v1825_v36, 2  ;;  %v1811_v61 = vsel %vm1731_vm2, %v1801_v3, %v1810_v39  ;;  %v451_v63 = vrot.slane %v449_v45, 1  ;;  %v5615_v35 = vld [vmem:[%s5419_s6 + $0x70] sm:$0xff]  }
  0x33   : > { %v447_v62 = vor.u32 %v445_v41, %v443_v50  ;;  %v1820_v4 = vsel %vm1731_vm2, %v1810_v39, %v1819_v46  ;;  %v1833_v8 = vrot.slane %v1831_v47, 1  ;;  %v1836_v10 = vrot.slane %v1834_v48, 2  ;;  %v5623_v48 = vld [vmem:[%s5419_s6 + $0x78] sm:$0xff]  }
  0x34   : > { %v457_v12 = vshll.u32 %v5587_v51, 16  ;;  %v1840_v18 = vshrl.u32 %v5590_v52, 16  ;;  %v444_v19 = vsel %vm360_vm0, %v439_v53, %v443_v50  ;;  %v453_v3 = vshrl.u32 %v5569_v32, 16  ;;  %6459 = vst [vmem:[#allocation4_spill] sm:$0xff] %v5623_v48 }
  0x35   : > { %v1843_v21 = vshll.u32 %v5590_v52, 16  ;;  %v1828_v22 = vor.u32 %v1827_v59, %v1824_v58  ;;  %v452_v23 = vsel %vm360_vm0, %v447_v62, %v451_v63  ;;  %v461_v25 = vshrl.u32 %v5587_v51, 16  ;;  %v5627_v59 = vld [vmem:[%s5419_s6 + $0x80] sm:$0xff]  }
  0x36   : > { %4604 = vmatmul.mubr.msk.bf16.gmra.mrb[12].mxu1 %vm515_vm1, %v428_v33  ;;  %v465_v26 = vshll.u32 %v5595_v0, 16  ;;  %v1837_v2 = vor.u32 %v1836_v10, %v1833_v8  ;;  %v1849_v28 = vshrl.u32 %v5599_v11, 16  ;;  %v1852_v31 = vshll.u32 %v5599_v11, 16  ;;  %v5637_v8 = vld [vmem:[%s6446_s1 + $0x10] sm:$0xff]  }
  0x37   : > { %4607 = vmatprep.mubr.msk.bf16.mxu1 %vm515_vm1, %v436_v40  ;;  %v459_v33 = vrot.slane %v457_v12, 1  ;;  %v1842_v34 = vrot.slane %v1840_v18, 1  ;;  %v455_v36 = vor.u32 %v453_v3, %v451_v63  ;;  %v1845_v39 = vrot.slane %v1843_v21, 2  ;;  %v5619_v40 = vld [vmem:[%s5419_s6 + $0x78] sm:$0xff]   ;;  %4665 = vmatprep.subr.bf16.mxu1 %v5637_v8 }
  0x38   : > { %v1829_v41 = vsel %vm1731_vm2, %v1819_v46, %v1828_v22  ;;  %v467_v47 = vrot.slane %v465_v26, 1  ;;  %v1838_v50 = vsel %vm1731_vm2, %v1828_v22, %v1837_v2  ;;  %v1851_v53 = vrot.slane %v1849_v28, 1  ;;  %v5649_v26 = vld [vmem:[%s5419_s6 + $0x80] sm:$0xff]  }
  0x39   : > { %4756 = vmatmul.mubr.msk.bf16.gmra.mrb[12].mxu0 %vm515_vm1, %v1811_v61  ;;  %v463_v45 = vor.u32 %v461_v25, %v459_v33  ;;  %v1854_v58 = vrot.slane %v1852_v31, 2  ;;  %v469_v61 = vshrl.u32 %v5595_v0, 16  ;;  %v473_v62 = vshll.u32 %v5615_v35, 16  ;;  %6460 = vst [vmem:[#allocation5_spill] sm:$0xff] %v5649_v26  ;;  %v5654_v31 = vld [vmem:[%s5419_s6 + $0x88] sm:$0xff]  }
  0x3a   : > { %4759 = vmatprep.mubr.msk.bf16.mxu0 %vm515_vm1, %v1820_v4  ;;  %v460_v63 = vsel %vm360_vm0, %v455_v36, %v459_v33  ;;  %v1846_v46 = vor.u32 %v1845_v39, %v1842_v34  ;;  %v1858_v4 = vshrl.u32 %v5619_v40, 16  ;;  %v1861_v12 = vshll.u32 %v5619_v40, 16 }
  0x3b   : > { %v468_v10 = vsel %vm360_vm0, %v463_v45, %v467_v47  ;;  %v477_v18 = vshrl.u32 %v5615_v35, 16  ;;  %v1855_v3 = vor.u32 %v1854_v58, %v1851_v53  ;;  %v1867_v21 = vshrl.u32 %v5627_v59, 16  ;;  %v5660_v45 = vld [vmem:[%s5419_s6 + $0x90] sm:$0xff]  }
  0x3c   : > { %v1870_v22 = vshll.u32 %v5627_v59, 16  ;;  %v475_v25 = vrot.slane %v473_v62, 1  ;;  %v1847_v28 = vsel %vm1731_vm2, %v1837_v2, %v1846_v46  ;;  %v1860_v33 = vrot.slane %v1858_v4, 1 }
  0x3d   : > { %v1863_v34 = vrot.slane %v1861_v12, 2  ;;  %v489_v58 = vshll.u32 %v5649_v26, 16  ;;  %v1876_v62 = vshrl.u32 %v5654_v31, 16  ;;  %v493_v4 = vshrl.u32 %v5649_v26, 16 }
  0x3e   : > { %4608 = vmatmul.mubr.msk.bf16.gmra.mrb[16].mxu1 %vm515_vm1, %v444_v19  ;;  %v481_v19 = vshll.u32 %v5623_v48, 16  ;;  %v479_v36 = vor.u32 %v477_v18, %v475_v25  ;;  %v1872_v53 = vrot.slane %v1870_v22, 2  ;;  %v1885_v18 = vshrl.u32 %v5660_v45, 16 }
  0x3f   : > { %4611 = vmatprep.mubr.msk.bf16.mxu1 %vm515_vm1, %v452_v23  ;;  %v471_v23 = vor.u32 %v469_v61, %v467_v47  ;;  %v1856_v47 = vsel %vm1731_vm2, %v1846_v46, %v1855_v3  ;;  %v485_v61 = vshrl.u32 %v5623_v48, 16  ;;  %v1864_v46 = vor.u32 %v1863_v34, %v1860_v33 }
  0x40   : > { %v483_v39 = vrot.slane %v481_v19, 1  ;;  %v5675_v19 = vld [vmem:[%s5419_s6 + $0x90] ss:$0 sps:$4 sm:$0x11]   ;;  %v1888_v22 = vshll.u32 %v5660_v45, 16  ;;  %v1887_v48 = vrot.slane %v1885_v18, 1 }
  0x41   : > { %4760 = vmatmul.mubr.msk.bf16.gmra.mrb[16].mxu0 %vm515_vm1, %v1829_v41  ;;  %v5657_v41 = vld [vmem:[%s5419_s6 + $0x88] sm:$0xff]   ;;  %v476_v2 = vsel %vm360_vm0, %v471_v23, %v475_v25  ;;  %v5307_v23 = vld [vmem:[%s5419_s6 + $0x98] ss:$0 sps:$4 sm:$0x33]   ;;  %v491_v25 = vrot.slane %v489_v58, 1  ;;  %v1865_v33 = vsel %vm1731_vm2, %v1855_v3, %v1864_v46  ;;  %v505_v5 = vshll.u32 %v5675_v19, 16 }
  0x42   : > { %4763 = vmatprep.mubr.msk.bf16.mxu0 %vm515_vm1, %v1838_v50  ;;  %v1869_v50 = vrot.slane %v1867_v21, 1  ;;  %v497_v12 = vshll.u32 %v5657_v41, 16  ;;  %v2215_v3 = vrot.slane %v5660_v45, 2 }
  0x43   : > { %v507_v18 = vrot.slane %v505_v5, 1 }
  0x44   : > { %v1873_v21 = vor.u32 %v1872_v53, %v1869_v50  ;;  %v499_v16 = vrot.slane %v497_v12, 1  ;;  %v1890_v50 = vrot.slane %v1888_v22, 2  ;;  %v501_v53 = vshrl.u32 %v5657_v41, 16 }
  0x46   : > { %4612 = vmatmul.mubr.msk.bf16.gmra.mrb[20].mxu1 %vm515_vm1, %v460_v63  ;;  %v1879_v63 = vshll.u32 %v5654_v31, 16  ;;  %v1874_v26 = vsel %vm1731_vm2, %v1864_v46, %v1873_v21  ;;  %v2175_v46 = vld [vmem:[%s5419_s6 + $0x8] sm:$0xc]  ;;  %v503_v12 = vor.u32 %v501_v53, %v499_v16 }
  0x47   : > { %4615 = vmatprep.mubr.msk.bf16.mxu1 %vm515_vm1, %v468_v10  ;;  %v484_v10 = vsel %vm360_vm0, %v479_v36, %v483_v39  ;;  %v495_v36 = vor.u32 %v493_v4, %v491_v25  ;;  %v1891_v4 = vor.u32 %v1890_v50, %v1887_v48 }
  0x48   : > { %v1881_v34 = vrot.slane %v1879_v63, 2  ;;  %v2217_v63 = vrot.slane %v5307_v23, 2 }
  0x49   : > { %4764 = vmatmul.mubr.msk.bf16.gmra.mrb[20].mxu0 %vm515_vm1, %v1847_v28  ;;  %v487_v28 = vor.u32 %v485_v61, %v483_v39  ;;  %v500_v61 = vsel %vm360_vm0, %v495_v36, %v499_v16  ;;  %v2185_v16 = vrot.slane %v5454_v24, 2  ;;  %v5724_v36 = vld [vmem:[%s6446_s1 + $0x38] sm:$0xff]   ;;  %v2189_v24 = vrot.slane %v5473_v44, 2 }
  0x4a   : > { %4767 = vmatprep.mubr.msk.bf16.mxu0 %vm515_vm1, %v1856_v47  ;;  %v1878_v47 = vrot.slane %v1876_v62, 1  ;;  %v1897_v62 = vshll.u32 %v5307_v23, 16  ;;  %v5742_v44 = vld [vmem:[%s6446_s1 + $0x18] sm:$0xff]  }
  0x4b   : > { %v492_v39 = vsel %vm360_vm0, %v487_v28, %v491_v25  ;;  %v4278_v28 = vcombine.low %v2175_v46, %v5433_v9 }
  0x4c   : > { %v1882_v58 = vor.u32 %v1881_v34, %v1878_v47  ;;  %v1899_v25 = vrot.slane %v1897_v62, 2  ;;  %v2183_v34 = vrot.slane %v5440_v14, 2 }
  0x4e   : > { %4616 = vmatmul.mubr.msk.bf16.gmra.mrb[24].mxu1 %vm515_vm1, %v476_v2  ;;  %v1894_v2 = vshrl.u32 %v5307_v23, 16  ;;  %v1892_v48 = vsel %vm1731_vm2, %v1882_v58, %v1891_v4  ;;  %v508_v23 = vsel %vm360_vm0, %v503_v12, %v507_v18  ;;  %v966_v18 = vld [vmem:[%s5419_s6] sm:$0xe] }
  0x4f   : > { %4619 = vmatprep.mubr.msk.bf16.mxu1 %vm515_vm1, %v484_v10  ;;  %v5695_v10 = vsel %vm2181_vm3, %v2215_v3, %v2217_v63  ;;  %v2205_v63 = vrot.slane %v5590_v52, 2  ;;  %v2209_v52 = vrot.slane %v5619_v40, 2 }
  0x50   : > { %v1896_v22 = vrot.slane %v1894_v2, 1 }
  0x51   : > { %4768 = vmatmul.mubr.msk.bf16.gmra.mrb[24].mxu0 %vm515_vm1, %v1865_v33  ;;  %v2182_v33 = vrot.slane %v4278_v28, 2  ;;  %v6462_v28 = vld [vmem:[#allocation4_spill] sm:$0xff] }
  0x52   : > { %4771 = vmatprep.mubr.msk.bf16.mxu0 %vm515_vm1, %v1874_v26  ;;  %v1883_v26 = vsel %vm1731_vm2, %v1873_v21, %v1882_v58  ;;  %v1900_v47 = vor.u32 %v1899_v25, %v1896_v22  ;;  %v2187_v21 = vrot.slane %v5460_v30, 2  ;;  %v2191_v30 = vrot.slane %v5485_v54, 2  ;;  %v6461_v22 = vld [vmem:[#allocation2_spill] sm:$0xff] }
  0x53   : > { %v2184_v9 = vsel %vm2181_vm3, %v2182_v33, %v2183_v34  ;;  %v2193_v54 = vrot.slane %v5507_v17, 2  ;;  %v2197_v17 = vrot.slane %v5539_v56, 2  ;;  %v2203_v56 = vrot.slane %v5577_v38, 2 }
  0x54   : > { %v1901_v5 = vsel %vm1731_vm2, %v1891_v4, %v1900_v47  ;;  %v2188_v14 = vsel %vm2181_vm3, %v2185_v16, %v2187_v21  ;;  %v2192_v50 = vsel %vm2181_vm3, %v2189_v24, %v2191_v30  ;;  %v4200_v25 = vcombine.low %v966_v18, %v6461_v22  ;;  %v6463_v47 = vld [vmem:[#allocation5_spill] sm:$0xff] }
  0x55   : > { %v2194_v53 = vsel %vm2181_vm3, %v2191_v30, %v2193_v54  ;;  %v2206_v38 = vsel %vm2181_vm3, %v2203_v56, %v2205_v63  ;;  %v978_v30 = vrot.slane %v5457_v29, 1 }
  0x56   : > { %4620 = vmatmul.mubr.msk.bf16.gmra.mrb[28].mxu1 %vm515_vm1, %v492_v39 }
  0x57   : > { %4623 = vmatprep.mubr.msk.bf16.mxu1 %vm515_vm1, %v500_v61  ;;  %v2201_v61 = vrot.slane %v5564_v20, 2  ;;  %v2207_v20 = vrot.slane %v5599_v11, 2  ;;  %v2211_v11 = vrot.slane %v5627_v59, 2 }
  0x59   : > { %4772 = vmatmul.mubr.msk.bf16.gmra.mrb[28].mxu0 %vm515_vm1, %v1883_v26  ;;  %v2204_v62 = vsel %vm2181_vm3, %v2201_v61, %v2203_v56  ;;  %v2208_v4 = vsel %vm2181_vm3, %v2205_v63, %v2207_v20  ;;  %v2210_v46 = vsel %vm2181_vm3, %v2207_v20, %v2209_v52  ;;  %v2212_v12 = vsel %vm2181_vm3, %v2209_v52, %v2211_v11  ;;  %v5878_v20 = vld [vmem:[%s5419_s6 + $0x48] sm:$0xff]  }
  0x5a   : > { %4775 = vmatprep.mubr.msk.bf16.mxu0 %vm515_vm1, %v1892_v48  ;;  %v2213_v26 = vrot.slane %v5654_v31, 2  ;;  %v2492_v48 = vld [vmem:[%s5419_s6 + $0x10] sm:$0xc]  ;;  %v984_v56 = vrot.slane %v5495_v60, 1  ;;  %v2637_v52 = vrot.slane %v5878_v20, 2 }
  0x5c   : > { %v2214_v33 = vsel %vm2181_vm3, %v2211_v11, %v2213_v26 }
  0x5e   : > { %4624 = vmatmul.mubr.msk.bf16.gmra.mrb[32].mxu1 %vm515_vm1, %v508_v23  ;;  %v5803_v23 = vld [vmem:[%s5419_s6 + $0x14] sm:$0xf] }
  0x5f   : > { %4629 = vmatprep.mubr.msk.bf16.mxu1 %vm515_vm1, %v5426_v6  ;;  %v2186_v6 = vsel %vm2181_vm3, %v2183_v34, %v2185_v16  ;;  %v973_v34 = vrot.slane %v4200_v25, 1  ;;  %v5813_v16 = vcombine.low %v2492_v48, %v5803_v23 }
  0x61   : > { %4776 = vmatmul.mubr.msk.bf16.gmra.mrb[32].mxu0 %vm515_vm1, %v1901_v5  ;;  %v974_v5 = vrot.slane %v5429_v7, 1 }
  0x62   : > { %4781 = vmatprep.mubr.msk.bf16.mxu0 %vm515_vm1, %v2184_v9  ;;  %v2216_v9 = vsel %vm2181_vm3, %v2213_v26, %v2215_v3  ;;  %v976_v3 = vrot.slane %v5443_v15, 1  ;;  %v5896_v26 = vld [vmem:[%s5419_s6 + $0x58] sm:$0xff]  }
  0x63   : > { %v2641_v48 = vrot.slane %v5896_v26, 2 }
  0x66   : > { %4630 = vmatmul.mubr.msk.bf16.vlgmr.msra.gmra.mrb[0].mxu1 %vm515_vm1, %v5429_v7 }
  0x67   : > { %4633 = vmatprep.mubr.msk.bf16.mxu1 %vm515_vm1, %v5443_v15  ;;  %4666 = vmatpush3.bf16.msra.mxu1 %v5637_v8  ;;  %v2190_v8 = vsel %vm2181_vm3, %v2187_v21, %v2189_v24  ;;  %v5816_v21 = vld [vmem:[%s5419_s6 + $0x18] sm:$0xff]   ;;  %v5828_v24 = vld [vmem:[%s5419_s6 + $0x20] sm:$0xff]   ;;  %v979_v15 = vsel %vm972_vm4, %v976_v3, %v978_v30 }
  0x68   : > { %4703 = vmatprep.subr.bf16.mxu1 %v5742_v44  ;;  %v2625_v7 = vrot.slane %v5816_v21, 2 }
  0x69   : > { %4782 = vmatmul.mubr.msk.bf16.vlgmr.msra.gmra.mrb[0].mxu0 %vm515_vm1, %v2186_v6  ;;  %v975_v6 = vsel %vm972_vm4, %v973_v34, %v974_v5  ;;  %v5909_v34 = vld [vmem:[%s5419_s6 + $0x60] sm:$0xff]  }
  0x6a   : > { %4818 = vmatpush3.bf16.msra.mxu0 %v5490_v55  ;;  %4785 = vmatprep.mubr.msk.bf16.mxu0 %vm515_vm1, %v2188_v14  ;;  %v2195_v55 = vrot.slane %v5526_v37, 2  ;;  %v2199_v37 = vrot.slane %v5551_v1, 2  ;;  %v2624_v14 = vrot.slane %v5813_v16, 2 }
  0x6b   : > { %4855 = vmatprep.subr.bf16.mxu0 %v5724_v36 }
  0x6c   : > { %v2196_v39 = vsel %vm2181_vm3, %v2193_v54, %v2195_v55  ;;  %v2198_v2 = vsel %vm2181_vm3, %v2195_v55, %v2197_v17  ;;  %v2200_v58 = vsel %vm2181_vm3, %v2197_v17, %v2199_v37  ;;  %v2202_v1 = vsel %vm2181_vm3, %v2199_v37, %v2201_v61 }
  0x6d   : > { %v977_v54 = vsel %vm972_vm4, %v974_v5, %v976_v3  ;;  %v2627_v55 = vrot.slane %v5828_v24, 2  ;;  %v982_v17 = vrot.slane %v5479_v49, 1  ;;  %v994_v5 = vrot.slane %v5569_v32, 1 }
  0x6e   : > { %4634 = vmatmul.mubr.msk.bf16.gmra.mrb[4].mxu1 %vm515_vm1, %v5457_v29  ;;  %v980_v29 = vrot.slane %v5470_v43, 1 }
  0x6f   : > { %4637 = vmatprep.mubr.msk.bf16.mxu1 %vm515_vm1, %v5470_v43 }
  0x70   : > { %v981_v43 = vsel %vm972_vm4, %v978_v30, %v980_v29 }
  0x71   : > { %4786 = vmatmul.mubr.msk.bf16.gmra.mrb[4].mxu0 %vm515_vm1, %v2190_v8  ;;  %v2626_v8 = vsel %vm2181_vm3, %v2624_v14, %v2625_v7 }
  0x72   : > { %4789 = vmatprep.mubr.msk.bf16.mxu0 %vm515_vm1, %v2192_v50  ;;  %v5833_v50 = vld [vmem:[%s5419_s6 + $0x28] sm:$0xff]  }
  0x76   : > { %4638 = vmatmul.mubr.msk.bf16.gmra.mrb[8].mxu1 %vm515_vm1, %v5479_v49 }
  0x77   : > { %4641 = vmatprep.mubr.msk.bf16.mxu1 %vm515_vm1, %v5495_v60 }
  0x79   : > { %4790 = vmatmul.mubr.msk.bf16.gmra.mrb[8].mxu0 %vm515_vm1, %v2194_v53  ;;  %v2629_v53 = vrot.slane %v5833_v50, 2 }
  0x7a   : > { %4793 = vmatprep.mubr.msk.bf16.mxu0 %vm515_vm1, %v2196_v39  ;;  %v5848_v39 = vld [vmem:[%s5419_s6 + $0x30] sm:$0xff]  }
  0x7b   : > { %v2630_v37 = vsel %vm2181_vm3, %v2627_v55, %v2629_v53  ;;  %v2631_v49 = vrot.slane %v5848_v39, 2 }
  0x7e   : > { %4642 = vmatmul.mubr.msk.bf16.gmra.mrb[12].mxu1 %vm515_vm1, %v5516_v27 }
  0x7f   : > { %4645 = vmatprep.mubr.msk.bf16.mxu1 %vm515_vm1, %v5531_v42 }
  0x81   : > { %4794 = vmatmul.mubr.msk.bf16.gmra.mrb[12].mxu0 %vm515_vm1, %v2198_v2  ;;  %v5853_v2 = vld [vmem:[%s5419_s6 + $0x38] sm:$0xff]  }
  0x82   : > { %4797 = vmatprep.mubr.msk.bf16.mxu0 %vm515_vm1, %v2200_v58  ;;  %v5858_v58 = vld [vmem:[%s6446_s1 + $0x40] sm:$0xff]   ;;  %v2633_v61 = vrot.slane %v5853_v2, 2 }
  0x84   : > { %v2634_v63 = vsel %vm2181_vm3, %v2631_v49, %v2633_v61 }
  0x86   : > { %4646 = vmatmul.mubr.msk.bf16.gmra.mrb[16].mxu1 %vm515_vm1, %v5542_v57 }
  0x87   : > { %4649 = vmatprep.mubr.msk.bf16.mxu1 %vm515_vm1, %v5559_v13 }
  0x89   : > { %4798 = vmatmul.mubr.msk.bf16.gmra.mrb[16].mxu0 %vm515_vm1, %v2202_v1  ;;  %v2632_v1 = vsel %vm2181_vm3, %v2629_v53, %v2631_v49 }
  0x8a   : > { %4801 = vmatprep.mubr.msk.bf16.mxu0 %vm515_vm1, %v2204_v62  ;;  %v986_v62 = vrot.slane %v5516_v27, 1  ;;  %v988_v27 = vrot.slane %v5531_v42, 1 }
  0x8c   : > { %v989_v22 = vsel %vm972_vm4, %v986_v62, %v988_v27 }
  0x8e   : > { %4650 = vmatmul.mubr.msk.bf16.gmra.mrb[20].mxu1 %vm515_vm1, %v5569_v32  ;;  %v996_v32 = vrot.slane %v5587_v51, 1 }
  0x8f   : > { %4653 = vmatprep.mubr.msk.bf16.mxu1 %vm515_vm1, %v5587_v51 }
  0x90   : > { %v997_v53 = vsel %vm972_vm4, %v994_v5, %v996_v32 }
  0x91   : > { %4802 = vmatmul.mubr.msk.bf16.gmra.mrb[20].mxu0 %vm515_vm1, %v2206_v38  ;;  %v985_v38 = vsel %vm972_vm4, %v982_v17, %v984_v56 }
  0x92   : > { %4805 = vmatprep.mubr.msk.bf16.mxu0 %vm515_vm1, %v2208_v4  ;;  %v987_v4 = vsel %vm972_vm4, %v984_v56, %v986_v62 }
  0x96   : > { %4654 = vmatmul.mubr.msk.bf16.gmra.mrb[24].mxu1 %vm515_vm1, %v5595_v0 }
  0x97   : > { %4657 = vmatprep.mubr.msk.bf16.mxu1 %vm515_vm1, %v5615_v35 }
  0x99   : > { %4806 = vmatmul.mubr.msk.bf16.gmra.mrb[24].mxu0 %vm515_vm1, %v2210_v46  ;;  %v5891_v46 = vld [vmem:[%s5419_s6 + $0x50] sm:$0xff]  }
  0x9a   : > { %4809 = vmatprep.mubr.msk.bf16.mxu0 %vm515_vm1, %v2212_v12  ;;  %v990_v12 = vrot.slane %v5542_v57, 1  ;;  %v2639_v42 = vrot.slane %v5891_v46, 2  ;;  %v992_v57 = vrot.slane %v5559_v13, 1  ;;  %v2643_v13 = vrot.slane %v5909_v34, 2 }
  0x9c   : > { %v991_v25 = vsel %vm972_vm4, %v988_v27, %v990_v12  ;;  %v993_v14 = vsel %vm972_vm4, %v990_v12, %v992_v57  ;;  %v2644_v30 = vsel %vm2181_vm3, %v2641_v48, %v2643_v13  ;;  %v2945_v12 = vshll.u32 %v5813_v16, 16 }
  0x9e   : > { %4658 = vmatmul.mubr.msk.bf16.gmra.mrb[28].mxu1 %vm515_vm1, %v6462_v28 }
  0x9f   : > { %4661 = vmatprep.mubr.msk.bf16.mxu1 %vm515_vm1, %v6463_v47 }
  0xa1   : > { %4810 = vmatmul.mubr.msk.bf16.gmra.mrb[28].mxu0 %vm515_vm1, %v2214_v33  ;;  %v2640_v33 = vsel %vm2181_vm3, %v2637_v52, %v2639_v42 }
  0xa2   : > { %4813 = vmatprep.mubr.msk.bf16.mxu0 %vm515_vm1, %v2216_v9  ;;  %v2642_v9 = vsel %vm2181_vm3, %v2639_v42, %v2641_v48  ;;  %v1008_v42 = vrot.slane %v5675_v19, 1 }
  0xa6   : > { %4662 = vmatmul.mubr.msk.bf16.gmra.mrb[32].mxu1 %vm515_vm1, %v5657_v41 }
  0xa7   : > { %4667 = vmatprep.mubr.msk.bf16.mxu1 %vm515_vm1, %v975_v6  ;;  %v5914_v6 = vld [vmem:[%s5419_s6 + $0x68] sm:$0xff]  }
  0xa8   : > { %v2645_v3 = vrot.slane %v5914_v6, 2 }
  0xa9   : > { %4814 = vmatmul.mubr.msk.bf16.gmra.mrb[32].mxu0 %vm515_vm1, %v5695_v10  ;;  %v2628_v10 = vsel %vm2181_vm3, %v2625_v7, %v2627_v55  ;;  %v995_v7 = vsel %vm972_vm4, %v992_v57, %v994_v5  ;;  %v5332_v57 = vld [vmem:[%s5419_s6 + $0xa0] ss:$0 sps:$4 sm:$0x33]  }
  0xaa   : > { %4819 = vmatprep.mubr.msk.bf16.mxu0 %vm515_vm1, %v2626_v8  ;;  %v5927_v8 = vld [vmem:[%s5419_s6 + $0x70] sm:$0xff]   ;;  %v2646_v55 = vsel %vm2181_vm3, %v2643_v13, %v2645_v3  ;;  %v2947_v13 = vrot.slane %v2945_v12, 3  ;;  %v2659_v19 = vrot.slane %v5332_v57, 2  ;;  %v2989_v12 = vshll.u32 %v5853_v2, 16 }
  0xab   : > { %v2647_v51 = vrot.slane %v5927_v8, 2  ;;  %v5343_v57 = vld [vmem:[%s5419_s6 + $0x30] sm:$0xff]  }
  0xae   : > { %4668 = vmatmul.mubr.msk.bf16.vlgmr.msra.gmra.mrb[0].mxu1 %vm515_vm1, %v977_v54  ;;  %v998_v54 = vrot.slane %v5595_v0, 1  ;;  %v1000_v0 = vrot.slane %v5615_v35, 1 }
  0xaf   : > { %4671 = vmatprep.mubr.msk.bf16.mxu1 %vm515_vm1, %v979_v15  ;;  %4704 = vmatpush3.bf16.msra.mxu1 %v5742_v44  ;;  %v983_v44 = vsel %vm972_vm4, %v980_v29, %v982_v17  ;;  %v5932_v15 = vld [vmem:[%s5419_s6 + $0x78] sm:$0xff]   ;;  %v2648_v17 = vsel %vm2181_vm3, %v2645_v3, %v2647_v51 }
  0xb0   : > { %v999_v29 = vsel %vm972_vm4, %v996_v32, %v998_v54 }
  0xb1   : > { %4820 = vmatmul.mubr.msk.bf16.vlgmr.msra.gmra.mrb[0].mxu0 %vm515_vm1, %v2628_v10  ;;  %v2649_v10 = vrot.slane %v5932_v15, 2 }
  0xb2   : > { %4856 = vmatpush3.bf16.msra.mxu0 %v5724_v36  ;;  %4823 = vmatprep.mubr.msk.bf16.mxu0 %vm515_vm1, %v2630_v37  ;;  %v5873_v36 = vld [vmem:[%s5419_s6 + $0x40] sm:$0xff]  }
  0xb3   : > { %4893 = vmatprep.subr.bf16.mxu0 %v5858_v58  ;;  %v2635_v60 = vrot.slane %v5873_v36, 2  ;;  %v5945_v37 = vld [vmem:[%s5419_s6 + $0x80] sm:$0xff]   ;;  %v2650_v49 = vsel %vm2181_vm3, %v2647_v51, %v2649_v10 }
  0xb4   : > { %v2651_v35 = vrot.slane %v5945_v37, 2 }
  0xb5   : > { %v2636_v11 = vsel %vm2181_vm3, %v2633_v61, %v2635_v60  ;;  %v2638_v18 = vsel %vm2181_vm3, %v2635_v60, %v2637_v52  ;;  %v1001_v61 = vsel %vm972_vm4, %v998_v54, %v1000_v0  ;;  %v5967_v60 = vld [vmem:[%s5419_s6 + $0x98] sm:$0xff]   ;;  %v2959_v54 = vshrl.u32 %v5828_v24, 16 }
  0xb6   : > { %4672 = vmatmul.mubr.msk.bf16.gmra.mrb[4].mxu1 %vm515_vm1, %v981_v43  ;;  %v1002_v43 = vrot.slane %v6462_v28, 1  ;;  %v1004_v28 = vrot.slane %v6463_v47, 1  ;;  %v2652_v62 = vsel %vm2181_vm3, %v2649_v10, %v2651_v35  ;;  %v2971_v10 = vshll.u32 %v5833_v50, 16 }
  0xb7   : > { %4675 = vmatprep.mubr.msk.bf16.mxu1 %vm515_vm1, %v983_v44  ;;  %v5950_v44 = vld [vmem:[%s5419_s6 + $0x88] sm:$0xff]  }
  0xb8   : > { %v1003_v56 = vsel %vm972_vm4, %v1000_v0, %v1002_v43  ;;  %v1005_v52 = vsel %vm972_vm4, %v1002_v43, %v1004_v28  ;;  %v5340_v0 = vld [vmem:[%s5419_s6 + $0x18] sm:$0xff]  }
  0xb9   : > { %4824 = vmatmul.mubr.msk.bf16.gmra.mrb[4].mxu0 %vm515_vm1, %v2632_v1  ;;  %v2653_v1 = vrot.slane %v5950_v44, 2 }
  0xba   : > { %4827 = vmatprep.mubr.msk.bf16.mxu0 %vm515_vm1, %v2634_v63  ;;  %v5963_v63 = vld [vmem:[%s5419_s6 + $0x90] sm:$0xff]  }
  0xbb   : > { %v2655_v47 = vrot.slane %v5963_v63, 2 }
  0xbe   : > { %4676 = vmatmul.mubr.msk.bf16.gmra.mrb[8].mxu1 %vm515_vm1, %v985_v38  ;;  %v1006_v38 = vrot.slane %v5657_v41, 1  ;;  %v2942_v41 = vshrl.u32 %v5813_v16, 16 }
  0xbf   : > { %4679 = vmatprep.mubr.msk.bf16.mxu1 %vm515_vm1, %v987_v4  ;;  %v2654_v4 = vsel %vm2181_vm3, %v2651_v35, %v2653_v1  ;;  %v5341_v35 = vld [vmem:[%s5419_s6 + $0x20] sm:$0xff]  }
  0xc0   : > { %v1007_v27 = vsel %vm972_vm4, %v1004_v28, %v1006_v38  ;;  %v2944_v16 = vrot.slane %v2942_v41, 2  ;;  %v1009_v32 = vsel %vm972_vm4, %v1006_v38, %v1008_v42  ;;  %v2986_v41 = vshrl.u32 %v5853_v2, 16 }
  0xc1   : > { %4828 = vmatmul.mubr.msk.bf16.gmra.mrb[8].mxu0 %vm515_vm1, %v2636_v11  ;;  %v2657_v11 = vrot.slane %v5967_v60, 2 }
  0xc2   : > { %4831 = vmatprep.mubr.msk.bf16.mxu0 %vm515_vm1, %v2638_v18  ;;  %v2950_v18 = vshrl.u32 %v5816_v21, 16 }
  0xc3   : > { %v2658_v48 = vsel %vm2181_vm3, %v2655_v47, %v2657_v11  ;;  %v2660_v43 = vsel %vm2181_vm3, %v2657_v11, %v2659_v19 }
  0xc6   : > { %4680 = vmatmul.mubr.msk.bf16.gmra.mrb[12].mxu1 %vm515_vm1, %v989_v22  ;;  %v2953_v22 = vshll.u32 %v5816_v21, 16 }
  0xc7   : > { %4683 = vmatprep.mubr.msk.bf16.mxu1 %vm515_vm1, %v991_v25  ;;  %v2656_v25 = vsel %vm2181_vm3, %v2653_v1, %v2655_v47  ;;  %v2977_v47 = vshrl.u32 %v5848_v39, 16 }
  0xc8   : > { %v2955_v3 = vrot.slane %v2953_v22, 3 }
  0xc9   : > { %4832 = vmatmul.mubr.msk.bf16.gmra.mrb[12].mxu0 %vm515_vm1, %v2640_v33  ;;  %v6464_v33 = vld [vmem:[#allocation3_spill] sm:$0xff] }
  0xca   : > { %4835 = vmatprep.mubr.msk.bf16.mxu0 %vm515_vm1, %v2642_v9  ;;  %v1415_v5 = vrot.slane %v6464_v33, 1  ;;  %v5339_v9 = vld [vmem:[%s5419_s6 + $0x10] sm:$0xff]   ;;  %v1424_v33 = vrot.slane %v5343_v57, 1 }
  0xce   : > { %4684 = vmatmul.mubr.msk.bf16.gmra.mrb[16].mxu1 %vm515_vm1, %v993_v14  ;;  %v1416_v14 = vrot.slane %v5339_v9, 1  ;;  %v2988_v9 = vrot.slane %v2986_v41, 2 }
  0xcf   : > { %4687 = vmatprep.mubr.msk.bf16.mxu1 %vm515_vm1, %v995_v7  ;;  %v2952_v7 = vrot.slane %v2950_v18, 2  ;;  %v5342_v18 = vld [vmem:[%s5419_s6 + $0x28] sm:$0xff]  }
  0xd0   : > { %v1422_v22 = vrot.slane %v5342_v18, 1 }
  0xd1   : > { %4836 = vmatmul.mubr.msk.bf16.gmra.mrb[16].mxu0 %vm515_vm1, %v2644_v30  ;;  %v1417_v30 = vsel %vm972_vm4, %v1415_v5, %v1416_v14  ;;  %v2956_v51 = vor.u32 %v2955_v3, %v2952_v7  ;;  %v2995_v3 = vshrl.u32 %v5873_v36, 16 }
  0xd2   : > { %4839 = vmatprep.mubr.msk.bf16.mxu0 %vm515_vm1, %v2646_v55  ;;  %v2962_v55 = vshll.u32 %v5828_v24, 16  ;;  %v1425_v7 = vsel %vm972_vm4, %v1422_v22, %v1424_v33 }
  0xd6   : > { %4688 = vmatmul.mubr.msk.bf16.gmra.mrb[20].mxu1 %vm515_vm1, %v997_v53  ;;  %v2948_v53 = vor.u32 %v2947_v13, %v2944_v16 }
  0xd7   : > { %4691 = vmatprep.mubr.msk.bf16.mxu1 %vm515_vm1, %v999_v29  ;;  %v2968_v29 = vshrl.u32 %v5833_v50, 16 }
  0xd8   : > { %v2957_v1 = vsel %vm2940_vm5, %v2948_v53, %v2956_v51 }
  0xd9   : > { %4840 = vmatmul.mubr.msk.bf16.gmra.mrb[20].mxu0 %vm515_vm1, %v2648_v17  ;;  %v1418_v17 = vrot.slane %v5340_v0, 1  ;;  %v2970_v28 = vrot.slane %v2968_v29, 2 }
  0xda   : > { %4843 = vmatprep.mubr.msk.bf16.mxu0 %vm515_vm1, %v2650_v49  ;;  %v2961_v49 = vrot.slane %v2959_v54, 2  ;;  %v3007_v54 = vshll.u32 %v5878_v20, 16 }
  0xdb   : > { %v1419_v38 = vsel %vm972_vm4, %v1416_v14, %v1418_v17  ;;  %v2991_v14 = vrot.slane %v2989_v12, 3  ;;  %v5347_v12 = vld [vmem:[%s5419_s6 + $0x50] sm:$0xff]  }
  0xdc   : > { %v1432_v18 = vrot.slane %v5347_v12, 1 }
  0xdd   : > { %v2992_v19 = vor.u32 %v2991_v14, %v2988_v9  ;;  %v3034_v9 = vshll.u32 %v5909_v34, 16 }
  0xde   : > { %4692 = vmatmul.mubr.msk.bf16.gmra.mrb[24].mxu1 %vm515_vm1, %v1001_v61  ;;  %v2964_v61 = vrot.slane %v2962_v55, 3 }
  0xdf   : > { %4695 = vmatprep.mubr.msk.bf16.mxu1 %vm515_vm1, %v1003_v56  ;;  %v1420_v56 = vrot.slane %v5341_v35, 1 }
  0xe1   : > { %4844 = vmatmul.mubr.msk.bf16.gmra.mrb[24].mxu0 %vm515_vm1, %v2652_v62  ;;  %v2973_v62 = vrot.slane %v2971_v10, 3  ;;  %v1423_v16 = vsel %vm972_vm4, %v1420_v56, %v1422_v22  ;;  %v5345_v10 = vld [vmem:[%s5419_s6 + $0x40] sm:$0xff]  }
  0xe2   : > { %4847 = vmatprep.mubr.msk.bf16.mxu0 %vm515_vm1, %v2654_v4  ;;  %v2965_v4 = vor.u32 %v2964_v61, %v2961_v49  ;;  %v1428_v0 = vrot.slane %v5345_v10, 1  ;;  %v3009_v49 = vrot.slane %v3007_v54, 3  ;;  %v5349_v54 = vld [vmem:[%s5419_s6 + $0x60] sm:$0xff]  }
  0xe3   : > { %v2974_v11 = vor.u32 %v2973_v62, %v2970_v28  ;;  %v3016_v28 = vshll.u32 %v5891_v46, 16 }
  0xe4   : > { %v2966_v42 = vsel %vm2940_vm5, %v2956_v51, %v2965_v4  ;;  %v2997_v51 = vrot.slane %v2995_v3, 2 }
  0xe5   : > { %v2975_v5 = vsel %vm2940_vm5, %v2965_v4, %v2974_v11  ;;  %v3025_v4 = vshll.u32 %v5896_v26, 16  ;;  %v3018_v41 = vrot.slane %v3016_v28, 3 }
  0xe6   : > { %4696 = vmatmul.mubr.msk.bf16.gmra.mrb[28].mxu1 %vm515_vm1, %v1005_v52  ;;  %v1421_v52 = vsel %vm972_vm4, %v1418_v17, %v1420_v56 }
  0xe7   : > { %4699 = vmatprep.mubr.msk.bf16.mxu1 %vm515_vm1, %v1007_v27  ;;  %v2980_v27 = vshll.u32 %v5848_v39, 16 }
  0xe9   : > { %4848 = vmatmul.mubr.msk.bf16.gmra.mrb[28].mxu0 %vm515_vm1, %v2656_v25  ;;  %v2979_v25 = vrot.slane %v2977_v47, 2 }
  0xea   : > { %4851 = vmatprep.mubr.msk.bf16.mxu0 %vm515_vm1, %v2658_v48  ;;  %v2982_v48 = vrot.slane %v2980_v27, 3 }
  0xec   : > { %v2983_v13 = vor.u32 %v2982_v48, %v2979_v25  ;;  %v3027_v25 = vrot.slane %v3025_v4, 3  ;;  %v5351_v4 = vld [vmem:[%s5419_s6 + $0x70] sm:$0xff]  }
  0xee   : > { %4700 = vmatmul.mubr.msk.bf16.gmra.mrb[32].mxu1 %vm515_vm1, %v1009_v32  ;;  %v2998_v32 = vshll.u32 %v5873_v36, 16  ;;  %v2984_v53 = vsel %vm2940_vm5, %v2974_v11, %v2983_v13  ;;  %v2993_v17 = vsel %vm2940_vm5, %v2983_v13, %v2992_v19  ;;  %v3043_v13 = vshll.u32 %v5914_v6, 16 }
  0xef   : > { %4705 = vmatprep.mubr.msk.bf16.mxu1 %vm515_vm1, %v1417_v30  ;;  %v3004_v30 = vshrl.u32 %v5878_v20, 16 }
  0xf0   : > { %v3000_v29 = vrot.slane %v2998_v32, 3 }
  0xf1   : > { %4852 = vmatmul.mubr.msk.bf16.gmra.mrb[32].mxu0 %vm515_vm1, %v2660_v43  ;;  %v3006_v43 = vrot.slane %v3004_v30, 2  ;;  %v3036_v30 = vrot.slane %v3034_v9, 3 }
  0xf2   : > { %4857 = vmatprep.mubr.msk.bf16.mxu0 %vm515_vm1, %v2957_v1  ;;  %v3001_v35 = vor.u32 %v3000_v29, %v2997_v51  ;;  %v3013_v1 = vshrl.u32 %v5891_v46, 16  ;;  %v3045_v51 = vrot.slane %v3043_v13, 3 }
  0xf3   : > { %v3010_v62 = vor.u32 %v3009_v49, %v3006_v43  ;;  %v3052_v43 = vshll.u32 %v5927_v8, 16 }
  0xf4   : > { %v3002_v27 = vsel %vm2940_vm5, %v2992_v19, %v3001_v35  ;;  %v3015_v11 = vrot.slane %v3013_v1, 2 }
  0xf5   : > { %v3011_v22 = vsel %vm2940_vm5, %v3001_v35, %v3010_v62  ;;  %v3061_v35 = vshll.u32 %v5932_v15, 16 }
  0xf6   : > { %4706 = vmatmul.mubr.msk.bf16.vlgmr.msra.gmra.mrb[0].mxu1 %vm515_vm1, %v1419_v38  ;;  %v3022_v38 = vshrl.u32 %v5896_v26, 16  ;;  %v3019_v57 = vor.u32 %v3018_v41, %v3015_v11 }
  0xf7   : > { %4709 = vmatprep.mubr.msk.bf16.mxu1 %vm515_vm1, %v1421_v52  ;;  %v5346_v52 = vld [vmem:[%s5419_s6 + $0x48] sm:$0xff]   ;;  %v3063_v11 = vrot.slane %v3061_v35, 3 }
  0xf8   : > { %v1430_v47 = vrot.slane %v5346_v52, 1  ;;  %v3020_v32 = vsel %vm2940_vm5, %v3010_v62, %v3019_v57  ;;  %v1440_v52 = vrot.slane %v5351_v4, 1 }
  0xf9   : > { %4858 = vmatmul.mubr.msk.bf16.vlgmr.msra.gmra.mrb[0].mxu0 %vm515_vm1, %v2966_v42  ;;  %v3024_v42 = vrot.slane %v3022_v38, 2  ;;  %v3054_v38 = vrot.slane %v3052_v43, 3 }
  0xfa   : > { %4894 = vmatpush3.bf16.msra.mxu0 %v5858_v58  ;;  %4861 = vmatprep.mubr.msk.bf16.mxu0 %vm515_vm1, %v2975_v5  ;;  %v5344_v58 = vld [vmem:[%s5419_s6 + $0x38] sm:$0xff]   ;;  %v1431_v48 = vsel %vm972_vm4, %v1428_v0, %v1430_v47  ;;  %v3031_v5 = vshrl.u32 %v5909_v34, 16 }
  0xfb   : > { %v1426_v55 = vrot.slane %v5344_v58, 1  ;;  %v3028_v14 = vor.u32 %v3027_v25, %v3024_v42  ;;  %v1436_v58 = vrot.slane %v5349_v54, 1  ;;  %v3070_v42 = vshll.u32 %v5945_v37, 16 }
  0xfc   : > { %v3033_v19 = vrot.slane %v3031_v5, 2  ;;  %v3088_v54 = vshll.u32 %v5963_v63, 16 }
  0xfd   : > { %v1427_v61 = vsel %vm972_vm4, %v1424_v33, %v1426_v55  ;;  %v1429_v56 = vsel %vm972_vm4, %v1426_v55, %v1428_v0  ;;  %v1433_v33 = vsel %vm972_vm4, %v1430_v47, %v1432_v18  ;;  %v3029_v55 = vsel %vm2940_vm5, %v3019_v57, %v3028_v14 }
  0xfe   : > { %4710 = vmatmul.mubr.msk.bf16.gmra.mrb[4].mxu1 %vm515_vm1, %v1423_v16  ;;  %v3040_v16 = vshrl.u32 %v5914_v6, 16  ;;  %v3037_v10 = vor.u32 %v3036_v30, %v3033_v19  ;;  %v3079_v57 = vshll.u32 %v5950_v44, 16  ;;  %v3085_v30 = vshrl.u32 %v5963_v63, 16 }
  0xff   : > { %4713 = vmatprep.mubr.msk.bf16.mxu1 %vm515_vm1, %v1425_v7  ;;  %v5348_v7 = vld [vmem:[%s5419_s6 + $0x58] sm:$0xff]  }
 0x100   : > { %v1434_v3 = vrot.slane %v5348_v7, 1  ;;  %v3038_v28 = vsel %vm2940_vm5, %v3028_v14, %v3037_v10  ;;  %v3072_v14 = vrot.slane %v3070_v42, 3  ;;  %v3392_v42 = vrot.slane %v5816_v21, 3 }
 0x101   : > { %4862 = vmatmul.mubr.msk.bf16.gmra.mrb[4].mxu0 %vm515_vm1, %v2984_v53  ;;  %v3042_v53 = vrot.slane %v3040_v16, 2  ;;  %v1444_v16 = vrot.slane %v5627_v59, 1  ;;  %v3094_v59 = vshrl.u32 %v5967_v60, 16  ;;  %v3398_v21 = vrot.slane %v5848_v39, 3 }
 0x102   : > { %4865 = vmatprep.mubr.msk.bf16.mxu0 %vm515_vm1, %v2993_v17  ;;  %v1435_v29 = vsel %vm972_vm4, %v1432_v18, %v1434_v3  ;;  %v1437_v0 = vsel %vm972_vm4, %v1434_v3, %v1436_v58  ;;  %v3049_v17 = vshrl.u32 %v5927_v8, 16  ;;  %v3081_v3 = vrot.slane %v3079_v57, 3 }
 0x103   : > { %v3046_v49 = vor.u32 %v3045_v51, %v3042_v53  ;;  %v1446_v53 = vrot.slane %v5654_v31, 1  ;;  %v3396_v57 = vrot.slane %v5833_v50, 3  ;;  %v3404_v50 = vrot.slane %v5878_v20, 3 }
 0x104   : > { %v3051_v62 = vrot.slane %v3049_v17, 2  ;;  %v6101_v17 = vld [vmem:[%s5419_s6 + $0xa0] ss:$0 sps:$4 sm:$0x77]   ;;  %v3406_v39 = vrot.slane %v5891_v46, 3  ;;  %v3412_v46 = vrot.slane %v5914_v6, 3 }
 0x105   : > { %v3047_v47 = vsel %vm2940_vm5, %v3037_v10, %v3046_v49  ;;  %v3090_v10 = vrot.slane %v3088_v54, 3  ;;  %v1447_v35 = vsel %vm972_vm4, %v1444_v16, %v1446_v53  ;;  %v3420_v6 = vrot.slane %v5950_v44, 3 }
 0x106   : > { %4714 = vmatmul.mubr.msk.bf16.gmra.mrb[8].mxu1 %vm515_vm1, %v1427_v61  ;;  %v3058_v61 = vshrl.u32 %v5932_v15, 16  ;;  %v3055_v12 = vor.u32 %v3054_v38, %v3051_v62  ;;  %v3384_v38 = vld [vmem:[%s5419_s6 + $0x10] sm:$0x8] }
 0x107   : > { %4717 = vmatprep.mubr.msk.bf16.mxu1 %vm515_vm1, %v1429_v56  ;;  %v5350_v56 = vld [vmem:[%s5419_s6 + $0x68] sm:$0xff]  }
 0x108   : > { %v1438_v1 = vrot.slane %v5350_v56, 1  ;;  %v3056_v5 = vsel %vm2940_vm5, %v3046_v49, %v3055_v12  ;;  %v3096_v49 = vrot.slane %v3094_v59, 2  ;;  %v5335_v56 = vld [vmem:[%s5419_s6 + $0x98] ss:$0 sps:$4 sm:$0x11]  }
 0x109   : > { %4866 = vmatmul.mubr.msk.bf16.gmra.mrb[8].mxu0 %vm515_vm1, %v3002_v27  ;;  %v3060_v27 = vrot.slane %v3058_v61, 2  ;;  %v1450_v4 = vrot.slane %v5335_v56, 1 }
 0x10a   : > { %4869 = vmatprep.mubr.msk.bf16.mxu0 %vm515_vm1, %v3011_v22  ;;  %v1439_v41 = vsel %vm972_vm4, %v1436_v58, %v1438_v1  ;;  %v1441_v18 = vsel %vm972_vm4, %v1438_v1, %v1440_v52  ;;  %v3067_v22 = vshrl.u32 %v5945_v37, 16 }
 0x10b   : > { %v3064_v25 = vor.u32 %v3063_v11, %v3060_v27 }
 0x10c   : > { %v3069_v9 = vrot.slane %v3067_v22, 2 }
 0x10d   : > { %v3065_v13 = vsel %vm2940_vm5, %v3055_v12, %v3064_v25 }
 0x10e   : > { %4718 = vmatmul.mubr.msk.bf16.gmra.mrb[12].mxu1 %vm515_vm1, %v1431_v48  ;;  %v3076_v48 = vshrl.u32 %v5950_v44, 16  ;;  %v3073_v19 = vor.u32 %v3072_v14, %v3069_v9  ;;  %v3400_v9 = vrot.slane %v5853_v2, 3  ;;  %v3399_v14 = vsel %vm3390_vm6, %v3396_v57, %v3398_v21  ;;  %v5338_v2 = vld [vmem:[%s6448_s3] sm:$0xff]  }
 0x10f   : > { %4721 = vmatprep.mubr.msk.bf16.mxu1 %vm515_vm1, %v1433_v33  ;;  %v1442_v33 = vrot.slane %v5619_v40, 1  ;;  %4931 = vmatprep.subr.bf16.mxu1 %v5338_v2 }
 0x110   : > { %v3078_v7 = vrot.slane %v3076_v48, 2  ;;  %v3074_v51 = vsel %vm2940_vm5, %v3064_v25, %v3073_v19  ;;  %4932 = vmatpush3.bf16.msra.mxu1 %v5338_v2 }
 0x111   : > { %4870 = vmatmul.mubr.msk.bf16.gmra.mrb[12].mxu0 %vm515_vm1, %v3020_v32  ;;  %v1443_v32 = vsel %vm972_vm4, %v1440_v52, %v1442_v33  ;;  %v1445_v40 = vsel %vm972_vm4, %v1442_v33, %v1444_v16  ;;  %v3401_v16 = vsel %vm3390_vm6, %v3398_v21, %v3400_v9 }
 0x112   : > { %4873 = vmatprep.mubr.msk.bf16.mxu0 %vm515_vm1, %v3029_v55  ;;  %v3082_v58 = vor.u32 %v3081_v3, %v3078_v7  ;;  %v3097_v55 = vshll.u32 %v5967_v60, 16  ;;  %v3408_v3 = vrot.slane %v5896_v26, 3  ;;  %v3414_v26 = vrot.slane %v5927_v8, 3 }
 0x113   : > { %v3422_v8 = vrot.slane %v5963_v63, 3 }
 0x114   : > { %v3083_v43 = vsel %vm2940_vm5, %v3073_v19, %v3082_v58  ;;  %v3099_v61 = vrot.slane %v3097_v55, 3  ;;  %v3409_v20 = vsel %vm3390_vm6, %v3406_v39, %v3408_v3  ;;  %v3415_v54 = vsel %vm3390_vm6, %v3412_v46, %v3414_v26 }
 0x116   : > { %4722 = vmatmul.mubr.msk.bf16.gmra.mrb[16].mxu1 %vm515_vm1, %v1435_v29  ;;  %v3087_v29 = vrot.slane %v3085_v30, 2  ;;  %v3100_v62 = vor.u32 %v3099_v61, %v3096_v49  ;;  %v3416_v30 = vrot.slane %v5932_v15, 3  ;;  %v3424_v15 = vrot.slane %v5967_v60, 3 }
 0x117   : > { %4725 = vmatprep.mubr.msk.bf16.mxu1 %vm515_vm1, %v1437_v0  ;;  %v1448_v0 = vrot.slane %v5660_v45, 1  ;;  %v3106_v45 = vshll.u32 %v6101_v17, 16 }
 0x118   : > { %v3091_v31 = vor.u32 %v3090_v10, %v3087_v29 }
 0x119   : > { %4874 = vmatmul.mubr.msk.bf16.gmra.mrb[16].mxu0 %vm515_vm1, %v3038_v28  ;;  %v1449_v1 = vsel %vm972_vm4, %v1446_v53, %v1448_v0  ;;  %v3103_v28 = vshrl.u32 %v6101_v17, 16  ;;  %v3108_v27 = vrot.slane %v3106_v45, 3  ;;  %v1451_v12 = vsel %vm972_vm4, %v1448_v0, %v1450_v4 }
 0x11a   : > { %4877 = vmatprep.mubr.msk.bf16.mxu0 %vm515_vm1, %v3047_v47  ;;  %v3092_v52 = vsel %vm2940_vm5, %v3082_v58, %v3091_v31  ;;  %v3101_v11 = vsel %vm2940_vm5, %v3091_v31, %v3100_v62  ;;  %v3417_v58 = vsel %vm3390_vm6, %v3414_v26, %v3416_v30  ;;  %v3423_v53 = vsel %vm3390_vm6, %v3420_v6, %v3422_v8 }
 0x11b   : > { %v3105_v47 = vrot.slane %v3103_v28, 2 }
 0x11e   : > { %4726 = vmatmul.mubr.msk.bf16.gmra.mrb[20].mxu1 %vm515_vm1, %v1439_v41  ;;  %v4356_v41 = vcombine.low %v3384_v38, %v5803_v23  ;;  %v3394_v23 = vrot.slane %v5828_v24, 3  ;;  %v3402_v24 = vrot.slane %v5873_v36, 3  ;;  %v3407_v36 = vsel %vm3390_vm6, %v3404_v50, %v3406_v39 }
 0x11f   : > { %4729 = vmatprep.mubr.msk.bf16.mxu1 %vm515_vm1, %v1441_v18  ;;  %v3109_v18 = vor.u32 %v3108_v27, %v3105_v47 }
 0x120   : > { %v3391_v22 = vrot.slane %v4356_v41, 3  ;;  %v3395_v33 = vsel %vm3390_vm6, %v3392_v42, %v3394_v23  ;;  %v3405_v7 = vsel %vm3390_vm6, %v3402_v24, %v3404_v50 }
 0x121   : > { %4878 = vmatmul.mubr.msk.bf16.gmra.mrb[20].mxu0 %vm515_vm1, %v3056_v5  ;;  %v3110_v25 = vsel %vm2940_vm5, %v3100_v62, %v3109_v18  ;;  %v3397_v5 = vsel %vm3390_vm6, %v3394_v23, %v3396_v57 }
 0x122   : > { %4881 = vmatprep.mubr.msk.bf16.mxu0 %vm515_vm1, %v3065_v13  ;;  %v3393_v48 = vsel %vm3390_vm6, %v3391_v22, %v3392_v42  ;;  %v3403_v13 = vsel %vm3390_vm6, %v3400_v9, %v3402_v24  ;;  %v6239_v24 = vld [vmem:[%s6447_s2] ss:$0 sm:$0xff] }
 0x126   : > { %4730 = vmatmul.mubr.msk.bf16.gmra.mrb[24].mxu1 %vm515_vm1, %v1443_v32  ;;  %v3410_v32 = vrot.slane %v5909_v34, 3  ;;  %v3418_v34 = vrot.slane %v5945_v37, 3  ;;  %v3426_v37 = vrot.slane %v6101_v17, 3 }
 0x127   : > { %4733 = vmatprep.mubr.msk.bf16.mxu1 %vm515_vm1, %v1445_v40 }
 0x128   : > { %v3411_v19 = vsel %vm3390_vm6, %v3408_v3, %v3410_v32  ;;  %v3413_v40 = vsel %vm3390_vm6, %v3410_v32, %v3412_v46  ;;  %v3419_v59 = vsel %vm3390_vm6, %v3416_v30, %v3418_v34  ;;  %v3421_v55 = vsel %vm3390_vm6, %v3418_v34, %v3420_v6 }
 0x129   : > { %4882 = vmatmul.mubr.msk.bf16.gmra.mrb[24].mxu0 %vm515_vm1, %v3074_v51  ;;  %v3425_v51 = vsel %vm3390_vm6, %v3422_v8, %v3424_v15  ;;  %v3427_v44 = vsel %vm3390_vm6, %v3424_v15, %v3426_v37 }
 0x12a   : > { %4885 = vmatprep.mubr.msk.bf16.mxu0 %vm515_vm1, %v3083_v43 }
 0x12e   : > { %4734 = vmatmul.mubr.msk.bf16.gmra.mrb[28].mxu1 %vm515_vm1, %v1447_v35 }
 0x12f   : > { %4737 = vmatprep.mubr.msk.bf16.mxu1 %vm515_vm1, %v1449_v1 }
 0x131   : > { %4886 = vmatmul.mubr.msk.bf16.gmra.mrb[28].mxu0 %vm515_vm1, %v3092_v52 }
 0x132   : > { %4889 = vmatprep.mubr.msk.bf16.mxu0 %vm515_vm1, %v3101_v11 }
 0x136   : > { %4738 = vmatmul.mubr.msk.bf16.gmra.mrb[32].mxu1 %vm515_vm1, %v1451_v12 }
 0x139   : > { %4890 = vmatmul.mubr.msk.bf16.gmra.mrb[32].mxu0 %vm515_vm1, %v3110_v25 }
 0x13a   : > { %4895 = vmatprep.mubr.msk.bf16.mxu0 %vm515_vm1, %v3393_v48 }
 0x141   : > { %4896 = vmatmul.mubr.msk.bf16.vlgmr.msra.gmra.mrb[0].mxu0 %vm515_vm1, %v3395_v33 }
 0x142   : > { %4899 = vmatprep.mubr.msk.bf16.mxu0 %vm515_vm1, %v3397_v5 }
 0x149   : > { %4900 = vmatmul.mubr.msk.bf16.gmra.mrb[4].mxu0 %vm515_vm1, %v3399_v14 }
 0x14a   : > { %4903 = vmatprep.mubr.msk.bf16.mxu0 %vm515_vm1, %v3401_v16 }
 0x151   : > { %4904 = vmatmul.mubr.msk.bf16.gmra.mrb[8].mxu0 %vm515_vm1, %v3403_v13 }
 0x152   : > { %4907 = vmatprep.mubr.msk.bf16.mxu0 %vm515_vm1, %v3405_v7 }
 0x159   : > { %4908 = vmatmul.mubr.msk.bf16.gmra.mrb[12].mxu0 %vm515_vm1, %v3407_v36 }
 0x15a   : > { %4911 = vmatprep.mubr.msk.bf16.mxu0 %vm515_vm1, %v3409_v20 }
 0x161   : > { %4912 = vmatmul.mubr.msk.bf16.gmra.mrb[16].mxu0 %vm515_vm1, %v3411_v19 }
 0x162   : > { %4915 = vmatprep.mubr.msk.bf16.mxu0 %vm515_vm1, %v3413_v40 }
 0x169   : > { %4916 = vmatmul.mubr.msk.bf16.gmra.mrb[20].mxu0 %vm515_vm1, %v3415_v54 }
 0x16a   : > { %4919 = vmatprep.mubr.msk.bf16.mxu0 %vm515_vm1, %v3417_v58 }
 0x171   : > { %4920 = vmatmul.mubr.msk.bf16.gmra.mrb[24].mxu0 %vm515_vm1, %v3419_v59 }
 0x172   : > { %4923 = vmatprep.mubr.msk.bf16.mxu0 %vm515_vm1, %v3421_v55 }
 0x179   : > { %4924 = vmatmul.mubr.msk.bf16.gmra.mrb[28].mxu0 %vm515_vm1, %v3423_v53 }
 0x17a   : > { %4927 = vmatprep.mubr.msk.bf16.mxu0 %vm515_vm1, %v3425_v51 }
 0x181   : > { %4928 = vmatmul.mubr.msk.bf16.gmra.mrb[32].mxu0 %vm515_vm1, %v3427_v44 }
 0x1c9   : > { %v4707_v29 = vpop.f32.mrb[0].mxu1 }
 0x1ca   : > { %v1546_v10 = vpop.f32.mrb[1].mxu1 }
 0x1cb   : > { %v4708_v0 = vpop.f32.mrb[2].mxu1 }
 0x1cc   : > { %v1549_v63 = vpop.f32.mrb[3].mxu1 }
 0x1d1   : > { %v4711_v43 = vpop.f32.mrb[4].mxu1 }
 0x1d2   : > { %v1562_v60 = vpop.f32.mrb[5].mxu1 }
 0x1d3   : > { %v4712_v49 = vpop.f32.mrb[6].mxu1 }
 0x1d4   : > { %v1565_v61 = vpop.f32.mrb[7].mxu1 }
 0x1d9   : > { %v6180_v35 = vpop.f32.mrb[8].mxu1 }
 0x1da   : > { %v6182_v56 = vpop.f32.mrb[9].mxu1 }
 0x1db   : > { %v6184_v31 = vpop.f32.mrb[10].mxu1 }
 0x1dc   : > { %v6186_v1 = vpop.f32.mrb[11].mxu1 }
 0x1e1   : > { %v6188_v17 = vpop.f32.mrb[12].mxu1 }
 0x1e2   : > { %v6190_v28 = vpop.f32.mrb[13].mxu1 }
 0x1e3   : > { %v6192_v45 = vpop.f32.mrb[14].mxu1 }
 0x1e4   : > { %v6194_v62 = vpop.f32.mrb[15].mxu1 }
 0x1e9   : > { %v6196_v38 = vpop.f32.mrb[16].mxu1 }
 0x1ea   : > { %v6198_v4 = vpop.f32.mrb[17].mxu1 }
 0x1eb   : > { %v6200_v52 = vpop.f32.mrb[18].mxu1 }
 0x1ec   : > { %v6202_v47 = vpop.f32.mrb[19].mxu1 }
 0x1f1   : > { %v6204_v27 = vpop.f32.mrb[20].mxu1 }
 0x1f2   : > { %v6206_v11 = vpop.f32.mrb[21].mxu1 }
 0x1f3   : > { %v6208_v41 = vpop.f32.mrb[22].mxu1 }
 0x1f4   : > { %v6210_v12 = vpop.f32.mrb[23].mxu1 }
 0x1f9   : > { %v6212_v18 = vpop.f32.mrb[24].mxu1 }
 0x1fa   : > { %v6214_v22 = vpop.f32.mrb[25].mxu1 }
 0x1fb   : > { %v6216_v42 = vpop.f32.mrb[26].mxu1 }
 0x1fc   : > { %v6218_v25 = vpop.f32.mrb[27].mxu1 }
 0x201   : > { %v6220_v48 = vpop.f32.mrb[28].mxu1 }
 0x202   : > { %v6222_v23 = vpop.f32.mrb[29].mxu1 }
 0x203   : > { %v6224_v57 = vpop.f32.mrb[30].mxu1 }
 0x204   : > { %v6226_v33 = vpop.f32.mrb[31].mxu1 }
 0x209   : > { %v6228_v5 = vpop.f32.mrb[32].mxu1 }
 0x20a   : > { %v6230_v21 = vpop.f32.mrb[33].mxu1 }
 0x20b   : > { %v6232_v9 = vpop.f32.mrb[34].mxu1 }
 0x20c   : > { %v6234_v14 = vpop.f32.mrb[35].mxu1 }
 0x214   : > { %v4897_v16 = vpop.f32.mrb[0].mxu0 }
 0x215   : > { %v4969_v50 = vadd.f32 %v4897_v16, %v4707_v29  ;;  %v3522_v13 = vpop.f32.mrb[1].mxu0 }
 0x216   : > { %v4970_v7 = vadd.f32 %v3522_v13, %v1546_v10  ;;  %v4898_v39 = vpop.f32.mrb[2].mxu0 }
 0x217   : > { %v3710_v2 = vadd.f32 %v4969_v50, %v6239_v24  ;;  %v4971_v3 = vadd.f32 %v4898_v39, %v4708_v0  ;;  %v3525_v36 = vpop.f32.mrb[3].mxu0 }
 0x218   : > { %v3708_v20 = vadd.f32 %v4970_v7, %v6239_v24  ;;  %v4972_v32 = vadd.f32 %v3525_v36, %v1549_v63 }
 0x219   : > { %v3711_v46 = vadd.f32 %v4971_v3, %v6239_v24  ;;  %v3746_v40 = vmax.f32 %v3710_v2, 0.0 }
 0x21a   : > { %v3709_v19 = vadd.f32 %v4972_v32, %v6239_v24  ;;  %v3744_v30 = vmax.f32 %v3708_v20, 0.0 }
 0x21b   : > { %v3747_v26 = vmax.f32 %v3711_v46, 0.0 }
 0x21c   : > { %v3745_v54 = vmax.f32 %v3709_v19, 0.0  ;;  %v4901_v58 = vpop.f32.mrb[4].mxu0 }
 0x21d   : > { %v3781_v34 = vpack.c.bf16 %v3747_v26, %v3746_v40  ;;  %v4973_v6 = vadd.f32 %v4901_v58, %v4711_v43  ;;  %v3538_v59 = vpop.f32.mrb[5].mxu0 }
 0x21e   : > { %v3780_v55 = vpack.c.bf16 %v3745_v54, %v3744_v30  ;;  %v4974_v8 = vadd.f32 %v3538_v59, %v1562_v60  ;;  %v4902_v15 = vpop.f32.mrb[6].mxu0 }
 0x21f   : > { %v3714_v53 = vadd.f32 %v4973_v6, %v6239_v24  ;;  %v4975_v51 = vadd.f32 %v4902_v15, %v4712_v49  ;;  %v3541_v37 = vpop.f32.mrb[7].mxu0 }
 0x220   : > { %v3712_v44 = vadd.f32 %v4974_v8, %v6239_v24  ;;  %v4976_v29 = vadd.f32 %v3541_v37, %v1565_v61  ;;  %4933 = vmatprep.mubr.msk.bf16.mxu1 %vm515_vm1, %v3780_v55 }
 0x221   : > { %v3715_v10 = vadd.f32 %v4975_v51, %v6239_v24  ;;  %4934 = vmatmul.mubr.msk.bf16.vlgmr.msra.gmra.mrb[36].mxu1 %vm515_vm1, %v3781_v34  ;;  %v3750_v63 = vmax.f32 %v3714_v53, 0.0 }
 0x222   : > { %v3713_v0 = vadd.f32 %v4976_v29, %v6239_v24  ;;  %v3748_v16 = vmax.f32 %v3712_v44, 0.0 }
 0x223   : > { %v3751_v43 = vmax.f32 %v3715_v10, 0.0 }
 0x224   : > { %v3749_v60 = vmax.f32 %v3713_v0, 0.0  ;;  %v4905_v50 = vpop.f32.mrb[8].mxu0 }
 0x225   : > { %v3783_v13 = vpack.c.bf16 %v3751_v43, %v3750_v63  ;;  %v4977_v49 = vadd.f32 %v4905_v50, %v6180_v35  ;;  %v3554_v7 = vpop.f32.mrb[9].mxu0 }
 0x226   : > { %v3782_v39 = vpack.c.bf16 %v3749_v60, %v3748_v16  ;;  %v4978_v61 = vadd.f32 %v3554_v7, %v6182_v56  ;;  %v4906_v2 = vpop.f32.mrb[10].mxu0 }
 0x227   : > { %v3718_v3 = vadd.f32 %v4977_v49, %v6239_v24  ;;  %v4979_v36 = vadd.f32 %v4906_v2, %v6184_v31  ;;  %v3557_v20 = vpop.f32.mrb[11].mxu0 }
 0x228   : > { %v3716_v32 = vadd.f32 %v4978_v61, %v6239_v24  ;;  %v4980_v46 = vadd.f32 %v3557_v20, %v6186_v1  ;;  %4937 = vmatprep.mubr.msk.bf16.mxu1 %vm515_vm1, %v3782_v39 }
 0x229   : > { %v3719_v19 = vadd.f32 %v4979_v36, %v6239_v24  ;;  %4938 = vmatmul.mubr.msk.bf16.gmra.mrb[40].mxu1 %vm515_vm1, %v3783_v13  ;;  %v3754_v40 = vmax.f32 %v3718_v3, 0.0 }
 0x22a   : > { %v3717_v35 = vadd.f32 %v4980_v46, %v6239_v24  ;;  %v3752_v26 = vmax.f32 %v3716_v32, 0.0 }
 0x22b   : > { %v3755_v56 = vmax.f32 %v3719_v19, 0.0 }
 0x22c   : > { %v3753_v30 = vmax.f32 %v3717_v35, 0.0  ;;  %v4909_v54 = vpop.f32.mrb[12].mxu0 }
 0x22d   : > { %v3785_v58 = vpack.c.bf16 %v3755_v56, %v3754_v40  ;;  %v4981_v31 = vadd.f32 %v4909_v54, %v6188_v17  ;;  %v3570_v34 = vpop.f32.mrb[13].mxu0 }
 0x22e   : > { %v3784_v6 = vpack.c.bf16 %v3753_v30, %v3752_v26  ;;  %v4982_v1 = vadd.f32 %v3570_v34, %v6190_v28  ;;  %v4910_v59 = vpop.f32.mrb[14].mxu0 }
 0x22f   : > { %v3722_v55 = vadd.f32 %v4981_v31, %v6239_v24  ;;  %v4983_v8 = vadd.f32 %v4910_v59, %v6192_v45  ;;  %v3573_v15 = vpop.f32.mrb[15].mxu0 }
 0x230   : > { %v3720_v53 = vadd.f32 %v4982_v1, %v6239_v24  ;;  %v4984_v51 = vadd.f32 %v3573_v15, %v6194_v62  ;;  %4941 = vmatprep.mubr.msk.bf16.mxu1 %vm515_vm1, %v3784_v6 }
 0x231   : > { %v3723_v37 = vadd.f32 %v4983_v8, %v6239_v24  ;;  %4942 = vmatmul.mubr.msk.bf16.gmra.mrb[44].mxu1 %vm515_vm1, %v3785_v58  ;;  %v3758_v44 = vmax.f32 %v3722_v55, 0.0 }
 0x232   : > { %v3721_v17 = vadd.f32 %v4984_v51, %v6239_v24  ;;  %v3756_v29 = vmax.f32 %v3720_v53, 0.0 }
 0x233   : > { %v3759_v28 = vmax.f32 %v3723_v37, 0.0 }
 0x234   : > { %v3757_v10 = vmax.f32 %v3721_v17, 0.0  ;;  %v4913_v0 = vpop.f32.mrb[16].mxu0 }
 0x235   : > { %v3787_v63 = vpack.c.bf16 %v3759_v28, %v3758_v44  ;;  %v4985_v45 = vadd.f32 %v4913_v0, %v6196_v38  ;;  %v3586_v43 = vpop.f32.mrb[17].mxu0 }
 0x236   : > { %v3786_v16 = vpack.c.bf16 %v3757_v10, %v3756_v29  ;;  %v4986_v62 = vadd.f32 %v3586_v43, %v6198_v4  ;;  %v4914_v60 = vpop.f32.mrb[18].mxu0 }
 0x237   : > { %v3726_v50 = vadd.f32 %v4985_v45, %v6239_v24  ;;  %v4987_v13 = vadd.f32 %v4914_v60, %v6200_v52  ;;  %v3589_v49 = vpop.f32.mrb[19].mxu0 }
 0x238   : > { %v3724_v7 = vadd.f32 %v4986_v62, %v6239_v24  ;;  %v4988_v39 = vadd.f32 %v3589_v49, %v6202_v47  ;;  %4945 = vmatprep.mubr.msk.bf16.mxu1 %vm515_vm1, %v3786_v16 }
 0x239   : > { %v3727_v61 = vadd.f32 %v4987_v13, %v6239_v24  ;;  %4946 = vmatmul.mubr.msk.bf16.gmra.mrb[48].mxu1 %vm515_vm1, %v3787_v63  ;;  %v3762_v2 = vmax.f32 %v3726_v50, 0.0 }
 0x23a   : > { %v3725_v38 = vadd.f32 %v4988_v39, %v6239_v24  ;;  %v3760_v3 = vmax.f32 %v3724_v7, 0.0 }
 0x23b   : > { %v3763_v4 = vmax.f32 %v3727_v61, 0.0 }
 0x23c   : > { %v3761_v36 = vmax.f32 %v3725_v38, 0.0  ;;  %v4917_v20 = vpop.f32.mrb[20].mxu0 }
 0x23d   : > { %v3789_v32 = vpack.c.bf16 %v3763_v4, %v3762_v2  ;;  %v4989_v52 = vadd.f32 %v4917_v20, %v6204_v27  ;;  %v3602_v46 = vpop.f32.mrb[21].mxu0 }
 0x23e   : > { %v3788_v19 = vpack.c.bf16 %v3761_v36, %v3760_v3  ;;  %v4990_v47 = vadd.f32 %v3602_v46, %v6206_v11  ;;  %v4918_v35 = vpop.f32.mrb[22].mxu0 }
 0x23f   : > { %v3730_v40 = vadd.f32 %v4989_v52, %v6239_v24  ;;  %v4991_v56 = vadd.f32 %v4918_v35, %v6208_v41  ;;  %v3605_v26 = vpop.f32.mrb[23].mxu0 }
 0x240   : > { %v3728_v30 = vadd.f32 %v4990_v47, %v6239_v24  ;;  %v4992_v54 = vadd.f32 %v3605_v26, %v6210_v12  ;;  %4949 = vmatprep.mubr.msk.bf16.mxu1 %vm515_vm1, %v3788_v19 }
 0x241   : > { %v3731_v58 = vadd.f32 %v4991_v56, %v6239_v24  ;;  %4950 = vmatmul.mubr.msk.bf16.gmra.mrb[52].mxu1 %vm515_vm1, %v3789_v32  ;;  %v3766_v31 = vmax.f32 %v3730_v40, 0.0 }
 0x242   : > { %v3729_v27 = vadd.f32 %v4992_v54, %v6239_v24  ;;  %v3764_v34 = vmax.f32 %v3728_v30, 0.0 }
 0x243   : > { %v3767_v11 = vmax.f32 %v3731_v58, 0.0 }
 0x244   : > { %v3765_v6 = vmax.f32 %v3729_v27, 0.0  ;;  %v4921_v1 = vpop.f32.mrb[24].mxu0 }
 0x245   : > { %v3791_v59 = vpack.c.bf16 %v3767_v11, %v3766_v31  ;;  %v4993_v41 = vadd.f32 %v4921_v1, %v6212_v18  ;;  %v3618_v55 = vpop.f32.mrb[25].mxu0 }
 0x246   : > { %v3790_v8 = vpack.c.bf16 %v3765_v6, %v3764_v34  ;;  %v4994_v12 = vadd.f32 %v3618_v55, %v6214_v22  ;;  %v4922_v15 = vpop.f32.mrb[26].mxu0 }
 0x247   : > { %v3734_v53 = vadd.f32 %v4993_v41, %v6239_v24  ;;  %v4995_v51 = vadd.f32 %v4922_v15, %v6216_v42  ;;  %v3621_v37 = vpop.f32.mrb[27].mxu0 }
 0x248   : > { %v3732_v17 = vadd.f32 %v4994_v12, %v6239_v24  ;;  %v4996_v44 = vadd.f32 %v3621_v37, %v6218_v25  ;;  %4953 = vmatprep.mubr.msk.bf16.mxu1 %vm515_vm1, %v3790_v8 }
 0x249   : > { %v3735_v28 = vadd.f32 %v4995_v51, %v6239_v24  ;;  %4954 = vmatmul.mubr.msk.bf16.gmra.mrb[56].mxu1 %vm515_vm1, %v3791_v59  ;;  %v3770_v29 = vmax.f32 %v3734_v53, 0.0 }
 0x24a   : > { %v3733_v18 = vadd.f32 %v4996_v44, %v6239_v24  ;;  %v3768_v10 = vmax.f32 %v3732_v17, 0.0 }
 0x24b   : > { %v3771_v22 = vmax.f32 %v3735_v28, 0.0 }
 0x24c   : > { %v3769_v0 = vmax.f32 %v3733_v18, 0.0  ;;  %v4925_v63 = vpop.f32.mrb[28].mxu0 }
 0x24d   : > { %v3793_v45 = vpack.c.bf16 %v3771_v22, %v3770_v29  ;;  %v4997_v42 = vadd.f32 %v4925_v63, %v6220_v48  ;;  %v3634_v43 = vpop.f32.mrb[29].mxu0 }
 0x24e   : > { %v3792_v16 = vpack.c.bf16 %v3769_v0, %v3768_v10  ;;  %v4998_v25 = vadd.f32 %v3634_v43, %v6222_v23  ;;  %v4926_v62 = vpop.f32.mrb[30].mxu0 }
 0x24f   : > { %v3738_v60 = vadd.f32 %v4997_v42, %v6239_v24  ;;  %v4999_v50 = vadd.f32 %v4926_v62, %v6224_v57  ;;  %v3637_v13 = vpop.f32.mrb[31].mxu0 }
 0x250   : > { %v3736_v49 = vadd.f32 %v4998_v25, %v6239_v24  ;;  %v5000_v7 = vadd.f32 %v3637_v13, %v6226_v33  ;;  %4957 = vmatprep.mubr.msk.bf16.mxu1 %vm515_vm1, %v3792_v16 }
 0x251   : > { %v3739_v39 = vadd.f32 %v4999_v50, %v6239_v24  ;;  %4958 = vmatmul.mubr.msk.bf16.gmra.mrb[60].mxu1 %vm515_vm1, %v3793_v45  ;;  %v3774_v61 = vmax.f32 %v3738_v60, 0.0 }
 0x252   : > { %v3737_v48 = vadd.f32 %v5000_v7, %v6239_v24  ;;  %v3772_v38 = vmax.f32 %v3736_v49, 0.0 }
 0x253   : > { %v3775_v23 = vmax.f32 %v3739_v39, 0.0 }
 0x254   : > { %v3773_v2 = vmax.f32 %v3737_v48, 0.0  ;;  %v4929_v4 = vpop.f32.mrb[32].mxu0 }
 0x255   : > { %v3795_v3 = vpack.c.bf16 %v3775_v23, %v3774_v61  ;;  %v5001_v57 = vadd.f32 %v4929_v4, %v6228_v5  ;;  %v3650_v36 = vpop.f32.mrb[33].mxu0 }
 0x256   : > { %v3794_v20 = vpack.c.bf16 %v3773_v2, %v3772_v38  ;;  %v5002_v33 = vadd.f32 %v3650_v36, %v6230_v21  ;;  %v4930_v32 = vpop.f32.mrb[34].mxu0 }
 0x257   : > { %v3742_v52 = vadd.f32 %v5001_v57, %v6239_v24  ;;  %v5003_v46 = vadd.f32 %v4930_v32, %v6232_v9  ;;  %v3653_v19 = vpop.f32.mrb[35].mxu0 }
 0x258   : > { %v3740_v47 = vadd.f32 %v5002_v33, %v6239_v24  ;;  %v5004_v35 = vadd.f32 %v3653_v19, %v6234_v14  ;;  %4961 = vmatprep.mubr.msk.bf16.mxu1 %vm515_vm1, %v3794_v20  ;;  %v6327_v14 = vld [vmem:[%s6449_s4] ss:$0 sm:$0xff] }
 0x259   : > { %v3743_v40 = vadd.f32 %v5003_v46, %v6239_v24  ;;  %4962 = vmatmul.mubr.msk.bf16.gmra.mrb[64].mxu1 %vm515_vm1, %v3795_v3  ;;  %v3778_v21 = vmax.f32 %v3742_v52, 0.0 }
 0x25a   : > { %v3741_v5 = vadd.f32 %v5004_v35, %v6239_v24  ;;  %v3776_v26 = vmax.f32 %v3740_v47, 0.0 }
 0x25b   : > { %v3779_v56 = vmax.f32 %v3743_v40, 0.0 }
 0x25c   : > { %v3777_v30 = vmax.f32 %v3741_v5, 0.0 }
 0x25d   : > { %v3797_v54 = vpack.c.bf16 %v3779_v56, %v3778_v21 }
 0x25e   : > { %v3796_v9 = vpack.c.bf16 %v3777_v30, %v3776_v26 }
 0x260   : > { %4965 = vmatprep.mubr.msk.bf16.mxu1 %vm515_vm1, %v3796_v9 }
 0x261   : > { %4966 = vmatmul.mubr.msk.bf16.gmra.mrb[68].mxu1 %vm515_vm1, %v3797_v54 }
 0x2f4   : > { %v4935_v24 = vpop.f32.mrb[36].mxu1 }
 0x2f5   : > { %v3910_v58 = vadd.f32 %v4935_v24, %v6327_v14  ;;  %v3901_v27 = vpop.f32.mrb[37].mxu1 }
 0x2f6   : > { %v3902_v31 = vadd.f32 %v6327_v14, %v3901_v27  ;;  %v4936_v11 = vpop.f32.mrb[38].mxu1 }
 0x2f7   : > { %4047 = vst.msk [vmem:[%s6332_s28 + $0x10] sm:$0xff] %vm4044_vm7, %v3910_v58  ;;  %v3913_v34 = vadd.f32 %v4936_v11, %v6327_v14  ;;  %v3904_v6 = vpop.f32.mrb[39].mxu1 }
 0x2f8   : > { %4045 = vst.msk [vmem:[%s6332_s28] sm:$0xff] %vm4044_vm7, %v3902_v31  ;;  %v3905_v1 = vadd.f32 %v6327_v14, %v3904_v6 }
 0x2f9   : > { %4048 = vst.msk [vmem:[%s6332_s28 + $0x18] sm:$0xff] %vm4044_vm7, %v3913_v34 }
 0x2fa   : > { %4046 = vst.msk [vmem:[%s6332_s28 + $0x8] sm:$0xff] %vm4044_vm7, %v3905_v1 }
 0x2fc   : > { %v4939_v59 = vpop.f32.mrb[40].mxu1 }
 0x2fd   : > { %v3926_v41 = vadd.f32 %v4939_v59, %v6327_v14  ;;  %v3917_v55 = vpop.f32.mrb[41].mxu1 }
 0x2fe   : > { %v3918_v8 = vadd.f32 %v6327_v14, %v3917_v55  ;;  %v4940_v12 = vpop.f32.mrb[42].mxu1 }
 0x2ff   : > { %4051 = vst.msk [vmem:[%s6332_s28 + $0x30] sm:$0xff] %vm4044_vm7, %v3926_v41  ;;  %v3929_v15 = vadd.f32 %v4940_v12, %v6327_v14  ;;  %v3920_v53 = vpop.f32.mrb[43].mxu1 }
 0x300   : > { %4049 = vst.msk [vmem:[%s6332_s28 + $0x20] sm:$0xff] %vm4044_vm7, %v3918_v8  ;;  %v3921_v51 = vadd.f32 %v6327_v14, %v3920_v53 }
 0x301   : > { %4052 = vst.msk [vmem:[%s6332_s28 + $0x38] sm:$0xff] %vm4044_vm7, %v3929_v15 }
 0x302   : > { %4050 = vst.msk [vmem:[%s6332_s28 + $0x28] sm:$0xff] %vm4044_vm7, %v3921_v51 }
 0x304   : > { %v4943_v37 = vpop.f32.mrb[44].mxu1 }
 0x305   : > { %v3942_v17 = vadd.f32 %v4943_v37, %v6327_v14  ;;  %v3933_v44 = vpop.f32.mrb[45].mxu1 }
 0x306   : > { %v3934_v28 = vadd.f32 %v6327_v14, %v3933_v44  ;;  %v4944_v18 = vpop.f32.mrb[46].mxu1 }
 0x307   : > { %4055 = vst.msk [vmem:[%s6332_s28 + $0x50] sm:$0xff] %vm4044_vm7, %v3942_v17  ;;  %v3945_v29 = vadd.f32 %v4944_v18, %v6327_v14  ;;  %v3936_v22 = vpop.f32.mrb[47].mxu1 }
 0x308   : > { %4053 = vst.msk [vmem:[%s6332_s28 + $0x40] sm:$0xff] %vm4044_vm7, %v3934_v28  ;;  %v3937_v10 = vadd.f32 %v6327_v14, %v3936_v22 }
 0x309   : > { %4056 = vst.msk [vmem:[%s6332_s28 + $0x58] sm:$0xff] %vm4044_vm7, %v3945_v29 }
 0x30a   : > { %4054 = vst.msk [vmem:[%s6332_s28 + $0x48] sm:$0xff] %vm4044_vm7, %v3937_v10 }
 0x30c   : > { %v4947_v0 = vpop.f32.mrb[48].mxu1 }
 0x30d   : > { %v3958_v63 = vadd.f32 %v4947_v0, %v6327_v14  ;;  %v3949_v45 = vpop.f32.mrb[49].mxu1 }
 0x30e   : > { %v3950_v42 = vadd.f32 %v6327_v14, %v3949_v45  ;;  %v4948_v43 = vpop.f32.mrb[50].mxu1 }
 0x30f   : > { %4059 = vst.msk [vmem:[%s6332_s28 + $0x70] sm:$0xff] %vm4044_vm7, %v3958_v63  ;;  %v3961_v16 = vadd.f32 %v4948_v43, %v6327_v14  ;;  %v3952_v25 = vpop.f32.mrb[51].mxu1 }
 0x310   : > { %4057 = vst.msk [vmem:[%s6332_s28 + $0x60] sm:$0xff] %vm4044_vm7, %v3950_v42  ;;  %v3953_v62 = vadd.f32 %v6327_v14, %v3952_v25 }
 0x311   : > { %4060 = vst.msk [vmem:[%s6332_s28 + $0x78] sm:$0xff] %vm4044_vm7, %v3961_v16 }
 0x312   : > { %4058 = vst.msk [vmem:[%s6332_s28 + $0x68] sm:$0xff] %vm4044_vm7, %v3953_v62 }
 0x314   : > { %v4951_v60 = vpop.f32.mrb[52].mxu1 }
 0x315   : > { %v3974_v50 = vadd.f32 %v4951_v60, %v6327_v14  ;;  %v3965_v13 = vpop.f32.mrb[53].mxu1 }
 0x316   : > { %v3966_v49 = vadd.f32 %v6327_v14, %v3965_v13  ;;  %v4952_v7 = vpop.f32.mrb[54].mxu1 }
 0x317   : > { %4063 = vst.msk [vmem:[%s6332_s28 + $0x90] sm:$0xff] %vm4044_vm7, %v3974_v50  ;;  %v3977_v39 = vadd.f32 %v4952_v7, %v6327_v14  ;;  %v3968_v48 = vpop.f32.mrb[55].mxu1 }
 0x318   : > { %4061 = vst.msk [vmem:[%s6332_s28 + $0x80] sm:$0xff] %vm4044_vm7, %v3966_v49  ;;  %v3969_v61 = vadd.f32 %v6327_v14, %v3968_v48 }
 0x319   : > { %4064 = vst.msk [vmem:[%s6332_s28 + $0x98] sm:$0xff] %vm4044_vm7, %v3977_v39 }
 0x31a   : > { %4062 = vst.msk [vmem:[%s6332_s28 + $0x88] sm:$0xff] %vm4044_vm7, %v3969_v61 }
 0x31c   : > { %v4955_v23 = vpop.f32.mrb[56].mxu1 }
 0x31d   : > { %v3990_v38 = vadd.f32 %v4955_v23, %v6327_v14  ;;  %v3981_v2 = vpop.f32.mrb[57].mxu1 }
 0x31e   : > { %v3982_v4 = vadd.f32 %v6327_v14, %v3981_v2  ;;  %v4956_v3 = vpop.f32.mrb[58].mxu1 }
 0x31f   : > { %4067 = vst.msk [vmem:[%s6332_s28 + $0xb0] sm:$0xff] %vm4044_vm7, %v3990_v38  ;;  %v3993_v57 = vadd.f32 %v4956_v3, %v6327_v14  ;;  %v3984_v36 = vpop.f32.mrb[59].mxu1 }
 0x320   : > { %4065 = vst.msk [vmem:[%s6332_s28 + $0xa0] sm:$0xff] %vm4044_vm7, %v3982_v4  ;;  %v3985_v20 = vadd.f32 %v6327_v14, %v3984_v36 }
 0x321   : > { %4068 = vst.msk [vmem:[%s6332_s28 + $0xb8] sm:$0xff] %vm4044_vm7, %v3993_v57 }
 0x322   : > { %4066 = vst.msk [vmem:[%s6332_s28 + $0xa8] sm:$0xff] %vm4044_vm7, %v3985_v20 }
 0x324   : > { %v4959_v33 = vpop.f32.mrb[60].mxu1 }
 0x325   : > { %v4006_v32 = vadd.f32 %v4959_v33, %v6327_v14  ;;  %v3997_v52 = vpop.f32.mrb[61].mxu1 }
 0x326   : > { %v3998_v46 = vadd.f32 %v6327_v14, %v3997_v52  ;;  %v4960_v19 = vpop.f32.mrb[62].mxu1 }
 0x327   : > { %4071 = vst.msk [vmem:[%s6332_s28 + $0xd0] sm:$0xff] %vm4044_vm7, %v4006_v32  ;;  %v4009_v47 = vadd.f32 %v4960_v19, %v6327_v14  ;;  %v4000_v35 = vpop.f32.mrb[63].mxu1 }
 0x328   : > { %4069 = vst.msk [vmem:[%s6332_s28 + $0xc0] sm:$0xff] %vm4044_vm7, %v3998_v46  ;;  %v4001_v40 = vadd.f32 %v6327_v14, %v4000_v35 }
 0x329   : > { %4072 = vst.msk [vmem:[%s6332_s28 + $0xd8] sm:$0xff] %vm4044_vm7, %v4009_v47 }
 0x32a   : > { %4070 = vst.msk [vmem:[%s6332_s28 + $0xc8] sm:$0xff] %vm4044_vm7, %v4001_v40 }
 0x32c   : > { %v4963_v5 = vpop.f32.mrb[64].mxu1 }
 0x32d   : > { %v4022_v21 = vadd.f32 %v4963_v5, %v6327_v14  ;;  %v4013_v56 = vpop.f32.mrb[65].mxu1 }
 0x32e   : > { %v4014_v26 = vadd.f32 %v6327_v14, %v4013_v56  ;;  %v4964_v30 = vpop.f32.mrb[66].mxu1 }
 0x32f   : > { %4075 = vst.msk [vmem:[%s6332_s28 + $0xf0] sm:$0xff] %vm4044_vm7, %v4022_v21  ;;  %v4025_v54 = vadd.f32 %v4964_v30, %v6327_v14  ;;  %v4016_v9 = vpop.f32.mrb[67].mxu1 }
 0x330   : > { %4073 = vst.msk [vmem:[%s6332_s28 + $0xe0] sm:$0xff] %vm4044_vm7, %v4014_v26  ;;  %v4017_v24 = vadd.f32 %v6327_v14, %v4016_v9 }
 0x331   : > { %4076 = vst.msk [vmem:[%s6332_s28 + $0xf8] sm:$0xff] %vm4044_vm7, %v4025_v54 }
 0x332   : > { %4074 = vst.msk [vmem:[%s6332_s28 + $0xe8] sm:$0xff] %vm4044_vm7, %v4017_v24 }
 0x334   : > { %v4967_v58 = vpop.f32.mrb[68].mxu1 }
 0x335   : > { %v4038_v27 = vadd.f32 %v4967_v58, %v6327_v14  ;;  %v4029_v31 = vpop.f32.mrb[69].mxu1 }
 0x336   : > { %v4030_v11 = vadd.f32 %v6327_v14, %v4029_v31  ;;  %v4968_v34 = vpop.f32.mrb[70].mxu1 }
 0x337   : > { %4079 = vst.msk [vmem:[%s6332_s28 + $0x110] sm:$0xff] %vm4044_vm7, %v4038_v27  ;;  %v4041_v6 = vadd.f32 %v4968_v34, %v6327_v14  ;;  %v4032_v1 = vpop.f32.mrb[71].mxu1 }
 0x338   : > { %4077 = vst.msk [vmem:[%s6332_s28 + $0x100] sm:$0xff] %vm4044_vm7, %v4030_v11  ;;  %v4033_v59 = vadd.f32 %v6327_v14, %v4032_v1 }
 0x339   : > { %4080 = vst.msk [vmem:[%s6332_s28 + $0x118] sm:$0xff] %vm4044_vm7, %v4041_v6 }
 0x33a   : > { %4078 = vst.msk [vmem:[%s6332_s28 + $0x108] sm:$0xff] %vm4044_vm7, %v4033_v59 }
 0x33b PF: > { %s15_s18 = sadd.s32 1, %s5358_s18  }
 0x33c   : > { %p12_p4 = scmp.ge.s32.totalorder %s15_s18, 4  }
 0x33e   :  { %14 = sbr.rel (!%p12_p4) target bundleno = 1 (0x1), region = 70 }

// kernel: frcnn_forward.3
= control target key start
LH: loop header
LB: loop body
LE: loop exit
PB: predicated region body
PF: predicated region fallthrough
CT: control target
= control target key end

     0   :  { %8 = vsyncpa [#allocation3], 0  ;;  %s5087_s12 = smov 0   ;;  %s6007_s0 = inlined_call_operand.vmem [shape: bf16[2,342,3], index: 0, kind: input, shape index: {}]   ;;  %s6008_s1 = inlined_call_operand.hbm [shape: bf16[27,16], index: 1, kind: input, shape index: {}]   ;;  %s6009_s2 = inlined_call_operand.vmem [shape: f32[1,16], index: 2, kind: input, shape index: {}]   ;;  %s6010_s3 = inlined_call_operand.vmem [shape: bf16[2,288,16], index: 3, kind: output, shape index: {}]  }
   0x1 LB: > { %s5093_s13 = sadd.s32 4294967295, %s5061_s12   ;;  %p3876_p0 = scmp.ge.s32.totalorder %s5061_s12, 1  ;;  %s5061_s12 = sphi %s5087_s12, %s14_s12  }
   0x2   : > { %p113_p1 = scmp.lt.s32.totalorder %s5061_s12, 3  ;;  %s5063_s14 = smov [#allocation2]  }
   0x3   : > { %s125_s15 = sshll.u32 %s5063_s14, 4  ;;  %p6011_p3 = scmp.eq.s32.totalorder %s5093_s13, 0  ;;  %s126_s15 = int_to_ptr.vmem [resolvable:$true] %s125_s15 }
   0x4   : > { %p5097_p2 = pnand %p3876_p0, %p113_p1  ;;  %s5023_s20 = scalar_lea.hbm %s6008_s1, 256 }
   0x5   : > { %p5024_p6 = scmp.ne.s32.totalorder %s6008_s1, %s5023_s20  ;;  %p5030_p10 = scmp.lt.u32.totalorder %s5023_s20, %s6008_s1 }
   0x6   : > { %s6013_s16 = scalar_select %p5097_p2, 1, 0 }
   0x7   : > { %p4926_p4 = pneg %p5097_p2 }
   0x9   : > { %p5106_p5 = pnand %p6011_p3, %p4926_p4 }
   0xb   : > { %p5025_p7 = pneg %p5106_p5 }
   0xd   : > { %p5026_p8 = pnand %p5025_p7, %p5024_p6 }
   0xf   : > { %p5027_p9 = pneg %p5026_p8 }
  0x11   : > { %p5032_p11 = pnand %p5030_p10, %p5027_p9 }
  0x13   : > { %5035 = shalt.err (!%p5032_p11)
}
  0x14   : > { %s5036_s25 = scalar_lea.vmem %s126_s15, 256  ;;  %p5044_p1 = scmp.lt.s32.totalorder %s126_s15, %s126_s15 }
  0x15   : > { %p5037_p12 = scmp.ne.s32.totalorder %s126_s15, %s5036_s25  ;;  %p5045_p4 = scmp.lt.s32.totalorder %s5036_s25, %s5036_s25 }
  0x17   : > { %p5039_p13 = pnand %p5037_p12, %p5025_p7  ;;  %p5046_p3 = por %p5045_p4, %p5044_p1 }
  0x19   : > { %p5040_p0 = pneg %p5039_p13 }
  0x1b   : > { %p5047_p2 = pnand %p5046_p3, %p5040_p0 }
  0x1d   : > { %5050 = shalt.err (!%p5047_p2)
}
  0x1e   : > { %s5064_s26 = smov 64   ;;  %s5065_s27 = smov 4  }
  0x1f   : > { %4929 = dma.hbm_to_vmem [thread:$0]  (!%p5106_p5), %s6008_s1, 256, %s126_s15, [#allocation3], %s5064_s26, %s5064_s26, %s5065_s27  }
  0x20   : > { %p6015_p6 = scmp.ne.s32.totalorder %s6013_s16, 0 }
  0x21   : > { %p6016_p8 = scmp.eq.s32.totalorder (!%p6015_p6), %s5093_s13, 0 }
  0x22   : > { %152 = sbr.rel (%p6015_p6) target bundleno = 603 (0x25b), region = 32 }
  0x29   : > { %5056 = dma.done.wait (%p6016_p8), [#allocation3], 256   ;;  %p6017_p7 = pmov %p6016_p8 }
  0x2a   : > { %vm534_vm0 = vcmask 1040384   ;;  %p176_p2 = scmp.lt.s32.totalorder %s5093_s13, 1  ;;  %vm535_vm1 = vcmask 1041408   ;;  %v5066_v0 = vmov 65535   ;;  %vm1707_vm2 = vsmask.f32 6400 }
  0x2b   : > { %5058 = vsyncadd (%p6017_p7), [#allocation3], 4294967040  ;;  %v536_v1 = vsel %vm534_vm0, 4294967295, %v5066_v0  ;;  %v4944_v3 = vld [vmem:[#allocation2 + $0x4] ss:$0 sps:$4 sm:$0xcc]  }
  0x2c   : > { %s6019_s13 = smov (!%p176_p2, %s5093_s13), 1  ;;  %v5137_v2 = vsel %vm535_vm1, %v536_v1, 0  ;;  %vm479_vm3 = vcmask 23552   ;;  %v1881_v7 = vrot.slane %v4944_v3, 2  ;;  %vm319_vm4 = vsmask.f32 7424 }
  0x2d   : > { %s4920_s30 = smul.u32 172, %s6019_s13  ;;  %v4947_v12 = vld [vmem:[#allocation2] ss:$0 sps:$4 sm:$0x66]   ;;  %v4949_v34 = vld [vmem:[#allocation2 + $0x4] sm:$0x18]  }
  0x2e   : > { %v5163_v14 = vand.u32 %v1881_v7, %v5137_v2  ;;  %v472_v19 = vshrl.u32 %v4947_v12, 16  ;;  %v475_v20 = vshll.u32 %v4947_v12, 16  ;;  %v2202_v41 = vshrl.u32 %v4949_v34, 16  ;;  %v223_v51 = vld [vmem:[#allocation2] sm:$0x3]  ;;  %s4921_s9 = smul.u32 144, %s6019_s13 }
  0x2f   : > { %s5142_s6 = scalar_lea.vmem %s6007_s0, %s4920_s30  ;;  %v2205_v42 = vshll.u32 %v4949_v34, 16  ;;  %v755_v61 = vand.u32 %v5137_v2, %v223_v51  ;;  %vm2158_vm5 = vcmask 1045504   ;;  %vm940_vm6 = vcmask 1046528  }
  0x30   : > { %v5145_v4 = vld [vmem:[%s5142_s6 + $0x10] sm:$0xff]   ;;  %v1254_v5 = vld [vmem:[%s5142_s6 + $0x8] sm:$0xe]  ;;  %v5149_v6 = vld [vmem:[%s5142_s6 + $0xc] sm:$0xf]  ;;  %4440 = vmatprep.subr.bf16.mxu0 %v5163_v14  ;;  %v474_v28 = vrot.slane %v472_v19, 1  ;;  %s5926_s14 = scalar_lea.vmem %s6010_s3, %s4921_s9 }
  0x31   : > { %v5152_v8 = vcombine.low %v1254_v5, %v5149_v6  ;;  %v1717_v9 = vshrl.u32 %v5145_v4, 16  ;;  %v1720_v10 = vshll.u32 %v5145_v4, 16  ;;  %v5157_v11 = vld [vmem:[%s5142_s6 + $0x18] sm:$0xff]   ;;  %v5160_v13 = vld [vmem:[%s5142_s6 + $0x8] sm:$0xff]   ;;  %v5169_v22 = vld [vmem:[%s5142_s6 + $0x10] sm:$0xff]   ;;  %4441 = vmatpush3.bf16.msra.mxu0 %v5163_v14  ;;  %v477_v29 = vrot.slane %v475_v20, 2 }
  0x32   : > { %v1726_v21 = vshrl.u32 %v5157_v11, 16  ;;  %v1729_v25 = vshll.u32 %v5157_v11, 16  ;;  %v328_v26 = vshll.u32 %v5160_v13, 16  ;;  %v5176_v31 = vld [vmem:[%s5142_s6 + $0x20] sm:$0xff]   ;;  %v332_v45 = vshrl.u32 %v5160_v13, 16  ;;  %v5193_v52 = vld [vmem:[%s5142_s6 + $0x28] sm:$0xff]  }
  0x33   : > { %v1709_v15 = vshrl.u32 %v5152_v8, 16  ;;  %v1712_v16 = vshll.u32 %v5152_v8, 16  ;;  %v1719_v17 = vrot.slane %v1717_v9, 1  ;;  %v1722_v18 = vrot.slane %v1720_v10, 2  ;;  %v187_v35 = vld [vmem:[%s5142_s6] sm:$0xf] }
  0x34   : > { %v1728_v30 = vrot.slane %v1726_v21, 1  ;;  %v1731_v33 = vrot.slane %v1729_v25, 2  ;;  %v330_v36 = vrot.slane %v328_v26, 1  ;;  %v478_v37 = vor.u32 %v477_v29, %v474_v28  ;;  %v5180_v38 = vld [vmem:[%s5142_s6 + $0x4] sm:$0xf]  ;;  %v5199_v57 = vld [vmem:[%s5142_s6 + $0x18] sm:$0xff]  }
  0x35   : > { %v1711_v23 = vrot.slane %v1709_v15, 1  ;;  %v1714_v24 = vrot.slane %v1712_v16, 2  ;;  %v1723_v27 = vor.u32 %v1722_v18, %v1719_v17  ;;  %v5186_v44 = vcombine.low %v187_v35, %v5180_v38  ;;  %v5207_v3 = vld [vmem:[%s5142_s6 + $0x20] sm:$0xff]   ;;  %v5213_v12 = vld [vmem:[%s5142_s6 + $0x30] sm:$0xff]   ;;  %v5217_v19 = vld [vmem:[%s5142_s6 + $0x38] sm:$0xff]  }
  0x36   : > { %v1732_v40 = vor.u32 %v1731_v33, %v1728_v30  ;;  %v539_v43 = vand.u32 %v5137_v2, %v478_v37  ;;  %v336_v46 = vshll.u32 %v5169_v22, 16  ;;  %v2204_v48 = vrot.slane %v2202_v41, 3  ;;  %v5227_v34 = vld [vmem:[%s5142_s6 + $0x28] sm:$0xff]   ;;  %v5234_v41 = vld [vmem:[%s5142_s6 + $0x30] sm:$0xff]  }
  0x37   : > { %v1715_v32 = vor.u32 %v1714_v24, %v1711_v23  ;;  %v2207_v49 = vrot.slane %v2205_v42, 4  ;;  %v1735_v50 = vshrl.u32 %v5176_v31, 16  ;;  %v321_v53 = vshrl.u32 %v5186_v44, 16 }
  0x38   : > { %v1733_v47 = vsel %vm1707_vm2, %v1723_v27, %v1732_v40  ;;  %4288 = vmatprep.subr.bf16.mxu1 %v539_v43  ;;  %v323_v54 = vshll.u32 %v5186_v44, 16  ;;  %v334_v55 = vor.u32 %v332_v45, %v330_v36  ;;  %v338_v56 = vrot.slane %v336_v46, 1  ;;  %v5241_v45 = vld [vmem:[%s5142_s6 + $0x40] sm:$0xff]  }
  0x39   : > { %v1724_v39 = vsel %vm1707_vm2, %v1715_v32, %v1723_v27  ;;  %v2208_v58 = vor.u32 %v2207_v49, %v2204_v48  ;;  %4289 = vmatpush3.bf16.msra.mxu1 %v539_v43  ;;  %v1737_v59 = vrot.slane %v1735_v50, 1  ;;  %v1738_v60 = vshll.u32 %v5176_v31, 16  ;;  %v5247_v50 = vld [vmem:[%s5142_s6 + $0x48] sm:$0xff]  }
  0x3a   : > { %4442 = vmatprep.mubr.msk.bf16.mxu0 %vm479_vm3, %v1724_v39  ;;  %v325_v62 = vrot.slane %v323_v54, 1  ;;  %v339_v63 = vsel %vm319_vm4, %v334_v55, %v338_v56  ;;  %v1744_v0 = vshrl.u32 %v5193_v52, 16  ;;  %v1747_v1 = vshll.u32 %v5193_v52, 16  ;;  %4326 = vmatprep.subr.bf16.mxu1 %v755_v61 }
  0x3b   : > { %4443 = vmatmul.mubr.msk.bf16.vlgmr.msra.gmra.mrb[0].mxu0 %vm479_vm3, %v1733_v47  ;;  %v2264_v5 = vand.u32 %v2208_v58, %v5137_v2  ;;  %v1740_v7 = vrot.slane %v1738_v60, 2  ;;  %v340_v9 = vshrl.u32 %v5169_v22, 16  ;;  %v344_v10 = vshll.u32 %v5199_v57, 16 }
  0x3c   : > { %v326_v15 = vor.u32 %v325_v62, %v321_v53  ;;  %v1746_v16 = vrot.slane %v1744_v0, 1  ;;  %v1749_v17 = vrot.slane %v1747_v1, 2  ;;  %v348_v18 = vshrl.u32 %v5199_v57, 16 }
  0x3d   : > { %4478 = vmatprep.subr.bf16.mxu0 %v2264_v5  ;;  %v1741_v20 = vor.u32 %v1740_v7, %v1737_v59  ;;  %v342_v21 = vor.u32 %v340_v9, %v338_v56  ;;  %v346_v23 = vrot.slane %v344_v10, 1  ;;  %v352_v24 = vshll.u32 %v5207_v3, 16  ;;  %v5251_v56 = vld [vmem:[%s5142_s6 + $0x38] sm:$0xff]  }
  0x3e   : > { %4479 = vmatpush3.bf16.msra.mxu0 %v2264_v5  ;;  %v331_v25 = vsel %vm319_vm4, %v326_v15, %v330_v36  ;;  %v1750_v26 = vor.u32 %v1749_v17, %v1746_v16  ;;  %v1753_v27 = vshrl.u32 %v5213_v12, 16  ;;  %v1756_v28 = vshll.u32 %v5213_v12, 16  ;;  %v5264_v17 = vld [vmem:[%s5142_s6 + $0x40] sm:$0xff]  }
  0x3f   : > { %4290 = vmatprep.mubr.msk.bf16.mxu1 %vm479_vm3, %v331_v25  ;;  %v1742_v29 = vsel %vm1707_vm2, %v1732_v40, %v1741_v20  ;;  %v347_v30 = vsel %vm319_vm4, %v342_v21, %v346_v23  ;;  %v350_v32 = vor.u32 %v348_v18, %v346_v23  ;;  %v354_v33 = vrot.slane %v352_v24, 1  ;;  %v5268_v23 = vld [vmem:[%s5142_s6 + $0x50] sm:$0xff]   ;;  %v5271_v24 = vld [vmem:[%s5142_s6 + $0x58] sm:$0xff]  }
  0x40   : > { %4291 = vmatmul.mubr.msk.bf16.vlgmr.msra.gmra.mrb[0].mxu1 %vm479_vm3, %v339_v63  ;;  %4446 = vmatprep.mubr.msk.bf16.mxu0 %vm479_vm3, %v1742_v29  ;;  %v1751_v35 = vsel %vm1707_vm2, %v1741_v20, %v1750_v26  ;;  %v1755_v36 = vrot.slane %v1753_v27, 1  ;;  %v1758_v37 = vrot.slane %v1756_v28, 2  ;;  %v1762_v39 = vshrl.u32 %v5217_v19, 16 }
  0x41   : > { %4327 = vmatpush3.bf16.msra.mxu1 %v755_v61  ;;  %v1765_v40 = vshll.u32 %v5217_v19, 16  ;;  %v356_v42 = vshrl.u32 %v5207_v3, 16  ;;  %v360_v43 = vshll.u32 %v5227_v34, 16  ;;  %4294 = vmatprep.mubr.msk.bf16.mxu1 %vm479_vm3, %v347_v30  ;;  %v364_v48 = vshrl.u32 %v5227_v34, 16 }
  0x42   : > { %v1759_v46 = vor.u32 %v1758_v37, %v1755_v36  ;;  %v1764_v47 = vrot.slane %v1762_v39, 1  ;;  %v368_v49 = vshll.u32 %v5234_v41, 16  ;;  %v1771_v55 = vshrl.u32 %v5241_v45, 16 }
  0x43   : > { %4447 = vmatmul.mubr.msk.bf16.gmra.mrb[4].mxu0 %vm479_vm3, %v1751_v35  ;;  %v1767_v51 = vrot.slane %v1765_v40, 2  ;;  %v358_v53 = vor.u32 %v356_v42, %v354_v33  ;;  %v362_v54 = vrot.slane %v360_v43, 1  ;;  %v355_v58 = vsel %vm319_vm4, %v350_v32, %v354_v33  ;;  %v5282_v35 = vld [vmem:[%s5142_s6 + $0x48] sm:$0xff]  }
  0x44   : > { %v1760_v59 = vsel %vm1707_vm2, %v1750_v26, %v1759_v46  ;;  %v1774_v60 = vshll.u32 %v5241_v45, 16  ;;  %v370_v63 = vrot.slane %v368_v49, 1  ;;  %v1773_v0 = vrot.slane %v1771_v55, 1 }
  0x45   : > { %4450 = vmatprep.mubr.msk.bf16.mxu0 %vm479_vm3, %v1760_v59  ;;  %v1768_v61 = vor.u32 %v1767_v51, %v1764_v47  ;;  %v363_v62 = vsel %vm319_vm4, %v358_v53, %v362_v54  ;;  %v1780_v5 = vshrl.u32 %v5247_v50, 16  ;;  %v1783_v7 = vshll.u32 %v5247_v50, 16 }
  0x46   : > { %v1776_v1 = vrot.slane %v1774_v60, 2  ;;  %v372_v9 = vshrl.u32 %v5234_v41, 16  ;;  %v366_v15 = vor.u32 %v364_v48, %v362_v54  ;;  %v376_v16 = vshll.u32 %v5251_v56, 16  ;;  %v2152_v48 = vld [vmem:[%s5142_s6 + $0x8] sm:$0xc] }
  0x47   : > { %v1769_v10 = vsel %vm1707_vm2, %v1759_v46, %v1768_v61  ;;  %v1782_v20 = vrot.slane %v1780_v5, 1  ;;  %v1785_v21 = vrot.slane %v1783_v7, 2  ;;  %v1789_v29 = vshrl.u32 %v5268_v23, 16  ;;  %v5304_v5 = vld [vmem:[%s5142_s6 + $0x58] sm:$0xff]  }
  0x48   : > { %4295 = vmatmul.mubr.msk.bf16.gmra.mrb[4].mxu1 %vm479_vm3, %v355_v58  ;;  %v1777_v18 = vor.u32 %v1776_v1, %v1773_v0  ;;  %v374_v25 = vor.u32 %v372_v9, %v370_v63  ;;  %v378_v26 = vrot.slane %v376_v16, 1  ;;  %v1792_v30 = vshll.u32 %v5268_v23, 16  ;;  %v4970_v58 = vld [vmem:[#allocation2 + $0x8] ss:$0 sps:$4 sm:$0x66]  }
  0x49   : > { %4298 = vmatprep.mubr.msk.bf16.mxu1 %vm479_vm3, %v363_v62  ;;  %v1786_v28 = vor.u32 %v1785_v21, %v1782_v20  ;;  %v371_v32 = vsel %vm319_vm4, %v366_v15, %v370_v63  ;;  %v1798_v33 = vshrl.u32 %v5271_v24, 16  ;;  %v384_v36 = vshll.u32 %v5264_v17, 16 }
  0x4a   : > { %v1778_v27 = vsel %vm1707_vm2, %v1768_v61, %v1777_v18  ;;  %v1791_v37 = vrot.slane %v1789_v29, 1  ;;  %v1794_v39 = vrot.slane %v1792_v30, 2  ;;  %v1801_v40 = vshll.u32 %v5271_v24, 16  ;;  %v5296_v61 = vld [vmem:[%s5142_s6 + $0x50] sm:$0xff]   ;;  %v5324_v30 = vld [vmem:[%s5142_s6 + $0x68] sm:$0xff]  }
  0x4b   : > { %4451 = vmatmul.mubr.msk.bf16.gmra.mrb[8].mxu0 %vm479_vm3, %v1769_v10  ;;  %v1787_v42 = vsel %vm1707_vm2, %v1777_v18, %v1786_v28  ;;  %v379_v43 = vsel %vm319_vm4, %v374_v25, %v378_v26  ;;  %v380_v46 = vshrl.u32 %v5251_v56, 16  ;;  %v1800_v47 = vrot.slane %v1798_v33, 1 }
  0x4c   : > { %4454 = vmatprep.mubr.msk.bf16.mxu0 %vm479_vm3, %v1778_v27  ;;  %v1795_v49 = vor.u32 %v1794_v39, %v1791_v37  ;;  %v1803_v51 = vrot.slane %v1801_v40, 2  ;;  %v388_v53 = vshrl.u32 %v5264_v17, 16  ;;  %v392_v54 = vshll.u32 %v5282_v35, 16  ;;  %v4980_v40 = vld [vmem:[#allocation2] sm:$0x18]  }
  0x4d   : > { %v4017_v55 = vcombine.low %v2152_v48, %v5149_v6  ;;  %v386_v59 = vrot.slane %v384_v36, 1  ;;  %v382_v62 = vor.u32 %v380_v46, %v378_v26  ;;  %v2650_v63 = vrot.slane %v4970_v58, 1 }
  0x4e   : > { %v1796_v60 = vsel %vm1707_vm2, %v1786_v28, %v1795_v49  ;;  %v5301_v0 = vor.u32 %v1803_v51, %v1800_v47  ;;  %v394_v6 = vrot.slane %v392_v54, 1  ;;  %v2160_v9 = vrot.slane %v5145_v4, 2  ;;  %v5319_v28 = vld [vmem:[%s5142_s6 + $0x60] sm:$0xff]   ;;  %v5338_v51 = vld [vmem:[%s5142_s6 + $0x70] sm:$0xff]  }
  0x4f   : > { %v390_v1 = vor.u32 %v388_v53, %v386_v59  ;;  %v2159_v7 = vrot.slane %v4017_v55, 2  ;;  %v2706_v10 = vand.u32 %v2650_v63, %v5137_v2  ;;  %v400_v15 = vshll.u32 %v5296_v61, 16  ;;  %v5344_v55 = vld [vmem:[%s5142_s6 + $0x78] sm:$0xff]  }
  0x50   : > { %4299 = vmatmul.mubr.msk.bf16.gmra.mrb[8].mxu1 %vm479_vm3, %v371_v32  ;;  %v387_v16 = vsel %vm319_vm4, %v382_v62, %v386_v59  ;;  %v396_v18 = vshrl.u32 %v5282_v35, 16  ;;  %v1805_v20 = vsel %vm1707_vm2, %v1795_v49, %v5301_v0  ;;  %v404_v25 = vshrl.u32 %v5296_v61, 16 }
  0x51   : > { %4302 = vmatprep.mubr.msk.bf16.mxu1 %vm479_vm3, %v379_v43  ;;  %4516 = vmatprep.subr.bf16.mxu0 %v2706_v10  ;;  %v395_v21 = vsel %vm319_vm4, %v390_v1, %v394_v6  ;;  %v408_v4 = vshll.u32 %v5304_v5, 16  ;;  %v2161_v26 = vsel %vm2158_vm5, %v2159_v7, %v2160_v9  ;;  %v402_v27 = vrot.slane %v400_v15, 1 }
  0x52   : > { %v398_v29 = vor.u32 %v396_v18, %v394_v6  ;;  %v2162_v32 = vrot.slane %v5157_v11, 2  ;;  %v2164_v37 = vrot.slane %v5176_v31, 2  ;;  %v416_v39 = vshll.u32 %v5319_v28, 16 }
  0x53   : > { %4455 = vmatmul.mubr.msk.bf16.gmra.mrb[12].mxu0 %vm479_vm3, %v1787_v42  ;;  %v406_v33 = vor.u32 %v404_v25, %v402_v27  ;;  %v410_v36 = vrot.slane %v408_v4, 1  ;;  %v412_v43 = vshrl.u32 %v5304_v5, 16  ;;  %v420_v48 = vshrl.u32 %v5319_v28, 16  ;;  %v5369_v4 = vld [vmem:[%s5142_s6 + $0x88] sm:$0xff]  }
  0x54   : > { %4458 = vmatprep.mubr.msk.bf16.mxu0 %vm479_vm3, %v1796_v60  ;;  %v403_v42 = vsel %vm319_vm4, %v398_v29, %v402_v27  ;;  %v2163_v46 = vsel %vm2158_vm5, %v2160_v9, %v2162_v32  ;;  %v424_v11 = vshll.u32 %v5324_v30, 16  ;;  %v2165_v49 = vsel %vm2158_vm5, %v2162_v32, %v2164_v37 }
  0x55   : > { %v411_v47 = vsel %vm319_vm4, %v406_v33, %v410_v36  ;;  %v418_v31 = vrot.slane %v416_v39, 1  ;;  %v983_v53 = vrot.slane %v4980_v40, 3  ;;  %v414_v54 = vor.u32 %v412_v43, %v410_v36 }
  0x56   : > { %v2166_v58 = vrot.slane %v5193_v52, 2  ;;  %v426_v60 = vrot.slane %v424_v11, 1  ;;  %v2168_v63 = vrot.slane %v5213_v12, 2  ;;  %v432_v1 = vshll.u32 %v5338_v51, 16  ;;  %v5362_v12 = vld [vmem:[%s5142_s6 + $0x80] sm:$0xff]  }
  0x57   : > { %v422_v59 = vor.u32 %v420_v48, %v418_v31  ;;  %v5349_v62 = vand.u32 %v983_v53, %v5137_v2  ;;  %v419_v6 = vsel %vm319_vm4, %v414_v54, %v418_v31  ;;  %v428_v7 = vshrl.u32 %v5324_v30, 16  ;;  %v5388_v53 = vld [vmem:[%s5142_s6 + $0x90] ss:$0 sps:$4 sm:$0x11]  }
  0x58   : > { %4303 = vmatmul.mubr.msk.bf16.gmra.mrb[12].mxu1 %vm479_vm3, %v387_v16  ;;  %v436_v9 = vshrl.u32 %v5338_v51, 16  ;;  %v440_v52 = vshll.u32 %v5344_v55, 16  ;;  %v2169_v16 = vsel %vm2158_vm5, %v2166_v58, %v2168_v63  ;;  %v434_v18 = vrot.slane %v432_v1, 1 }
  0x59   : > { %4306 = vmatprep.mubr.msk.bf16.mxu1 %vm479_vm3, %v395_v21  ;;  %4364 = vmatprep.subr.bf16.mxu1 %v5349_v62  ;;  %v427_v15 = vsel %vm319_vm4, %v422_v59, %v426_v60  ;;  %v430_v21 = vor.u32 %v428_v7, %v426_v60  ;;  %v2170_v25 = vrot.slane %v5217_v19, 2  ;;  %v2172_v33 = vrot.slane %v5241_v45, 2 }
  0x5a   : > { %v442_v27 = vrot.slane %v440_v52, 1  ;;  %v444_v36 = vshrl.u32 %v5344_v55, 16  ;;  %v452_v19 = vshrl.u32 %v5362_v12, 16  ;;  %v456_v43 = vshll.u32 %v5369_v4, 16 }
  0x5b   : > { %4459 = vmatmul.mubr.msk.bf16.gmra.mrb[16].mxu0 %vm479_vm3, %v1805_v20  ;;  %v4991_v20 = vld [vmem:[#allocation2 + $0x8] ss:$0 sps:$4 sm:$0xcc]   ;;  %v2173_v45 = vsel %vm2158_vm5, %v2170_v25, %v2172_v33  ;;  %v2174_v54 = vrot.slane %v5247_v50, 2  ;;  %v2176_v60 = vrot.slane %v5268_v23, 2  ;;  %v460_v1 = vshrl.u32 %v5369_v4, 16 }
  0x5c   : > { %4480 = vmatprep.mubr.msk.bf16.mxu0 %vm479_vm3, %v2161_v26  ;;  %v438_v26 = vor.u32 %v436_v9, %v434_v18  ;;  %v3101_v29 = vshrl.u32 %v4991_v20, 16  ;;  %v3104_v32 = vshll.u32 %v4991_v20, 16  ;;  %v446_v31 = vor.u32 %v444_v36, %v442_v27  ;;  %v5401_v50 = vld [vmem:[%s5142_s6 + $0x60] sm:$0xff]  }
  0x5d   : > { %v458_v59 = vrot.slane %v456_v43, 1  ;;  %v2175_v7 = vsel %vm2158_vm5, %v2172_v33, %v2174_v54  ;;  %v2177_v52 = vsel %vm2158_vm5, %v2174_v54, %v2176_v60  ;;  %v2479_v54 = vld [vmem:[%s5142_s6 + $0x10] sm:$0xc]  ;;  %vm2926_vm7 = vsmask.f32 5376 }
  0x5e   : > { %v3103_v39 = vrot.slane %v3101_v29, 2  ;;  %v3106_v40 = vrot.slane %v3104_v32, 3  ;;  %v5416_v29 = vld [vmem:[%s5142_s6 + $0x70] sm:$0xff]   ;;  %vm3383_vm8 = vcmask 1044480   ;;  %vm3788_vm9 = vcmask 130048  }
  0x5f   : > { %v462_v23 = vor.u32 %v460_v1, %v458_v59  ;;  %v2184_v36 = vrot.slane %v5416_v29, 2 }
  0x60   : > { %4307 = vmatmul.mubr.msk.bf16.gmra.mrb[16].mxu1 %vm479_vm3, %v403_v42  ;;  %v435_v42 = vsel %vm319_vm4, %v430_v21, %v434_v18  ;;  %v3107_v48 = vor.u32 %v3106_v40, %v3103_v39  ;;  %v2180_v18 = vrot.slane %v5401_v50, 2  ;;  %v5427_v40 = vld [vmem:[%s5142_s6 + $0x78] sm:$0xff]  }
  0x61   : > { %4310 = vmatprep.mubr.msk.bf16.mxu1 %vm479_vm3, %v411_v47  ;;  %v443_v47 = vsel %vm319_vm4, %v438_v26, %v442_v27  ;;  %v5412_v26 = vld [vmem:[%s5142_s6 + $0x68] sm:$0xff]  }
  0x63   : > { %4481 = vmatmul.mubr.msk.bf16.vlgmr.msra.gmra.mrb[0].mxu0 %vm479_vm3, %v2163_v46  ;;  %v2171_v46 = vsel %vm2158_vm5, %v2168_v63, %v2170_v25 }
  0x64   : > { %4517 = vmatpush3.bf16.msra.mxu0 %v2706_v10  ;;  %4484 = vmatprep.mubr.msk.bf16.mxu0 %vm479_vm3, %v2165_v49  ;;  %v2167_v10 = vsel %vm2158_vm5, %v2164_v37, %v2166_v58  ;;  %v448_v37 = vshll.u32 %v5362_v12, 16  ;;  %v5383_v49 = vand.u32 %v3107_v48, %v5137_v2  ;;  %v5448_v48 = vld [vmem:[%s5142_s6 + $0x88] sm:$0xff]  }
  0x66   : > { %v450_v11 = vrot.slane %v448_v37, 1  ;;  %4554 = vmatprep.subr.bf16.mxu0 %v5383_v49 }
  0x68   : > { %4311 = vmatmul.mubr.msk.bf16.gmra.mrb[20].mxu1 %vm479_vm3, %v419_v6  ;;  %v454_v58 = vor.u32 %v452_v19, %v450_v11  ;;  %v451_v63 = vsel %vm319_vm4, %v446_v31, %v450_v11  ;;  %v464_v6 = vshll.u32 %v5388_v53, 16  ;;  %v5431_v19 = vld [vmem:[%s5142_s6 + $0x80] sm:$0xff]   ;;  %v2190_v11 = vrot.slane %v5448_v48, 2 }
  0x69   : > { %4314 = vmatprep.mubr.msk.bf16.mxu1 %vm479_vm3, %v427_v15 }
  0x6a   : > { %v459_v9 = vsel %vm319_vm4, %v454_v58, %v458_v59  ;;  %v466_v15 = vrot.slane %v464_v6, 1  ;;  %v5464_v58 = vld [vmem:[%s5142_s6 + $0x14] sm:$0xf]  ;;  %v5475_v6 = vld [vmem:[%s5142_s6 + $0x18] sm:$0xff]  }
  0x6b   : > { %4485 = vmatmul.mubr.msk.bf16.gmra.mrb[4].mxu0 %vm479_vm3, %v2167_v10  ;;  %v5002_v10 = vld [vmem:[#allocation2 + $0x4] ss:$0 sps:$4 sm:$0x33]   ;;  %v5472_v1 = vcombine.low %v2479_v54, %v5464_v58 }
  0x6c   : > { %4488 = vmatprep.mubr.msk.bf16.mxu0 %vm479_vm3, %v2169_v16  ;;  %v2178_v16 = vrot.slane %v5271_v24, 2  ;;  %v1428_v20 = vshll.u32 %v5002_v10, 16  ;;  %v467_v21 = vsel %vm319_vm4, %v462_v23, %v466_v15  ;;  %v1426_v32 = vshrl.u32 %v5002_v10, 16  ;;  %v5488_v23 = vld [vmem:[%s5142_s6 + $0x20] sm:$0xff]  }
  0x6d   : > { %v2182_v24 = vrot.slane %v5412_v26, 2 }
  0x6e   : > { %v2179_v25 = vsel %vm2158_vm5, %v2176_v60, %v2178_v16  ;;  %v2181_v27 = vsel %vm2158_vm5, %v2178_v16, %v2180_v18  ;;  %v1430_v33 = vrot.slane %v1428_v20, 1  ;;  %v5468_v60 = vld [vmem:[%s5142_s6 + $0x98] ss:$0 sps:$4 sm:$0x33]   ;;  %v5492_v16 = vld [vmem:[%s5142_s6 + $0x28] sm:$0xff]  }
  0x6f   : > { %v2183_v39 = vsel %vm2158_vm5, %v2180_v18, %v2182_v24  ;;  %v2613_v18 = vrot.slane %v5488_v23, 2  ;;  %v2615_v20 = vrot.slane %v5492_v16, 2 }
  0x70   : > { %4315 = vmatmul.mubr.msk.bf16.gmra.mrb[24].mxu1 %vm479_vm3, %v435_v42  ;;  %v1431_v37 = vor.u32 %v1430_v33, %v1426_v32  ;;  %v2185_v42 = vsel %vm2158_vm5, %v2182_v24, %v2184_v36  ;;  %v5508_v33 = vld [vmem:[%s5142_s6 + $0x38] sm:$0xff]  }
  0x71   : > { %4318 = vmatprep.mubr.msk.bf16.mxu1 %vm479_vm3, %v443_v47  ;;  %v2616_v32 = vsel %vm2158_vm5, %v2613_v18, %v2615_v20 }
  0x72   : > { %v5434_v43 = vand.u32 %v1431_v37, %v5137_v2  ;;  %v2619_v37 = vrot.slane %v5508_v33, 2 }
  0x73   : > { %4489 = vmatmul.mubr.msk.bf16.gmra.mrb[8].mxu0 %vm479_vm3, %v2171_v46  ;;  %v2188_v46 = vrot.slane %v5431_v19, 2 }
  0x74   : > { %4492 = vmatprep.mubr.msk.bf16.mxu0 %vm479_vm3, %v2173_v45  ;;  %v5452_v45 = vld [vmem:[%s5142_s6 + $0x90] sm:$0xff]  }
  0x75   : > { %v2192_v31 = vrot.slane %v5452_v45, 2  ;;  %v2191_v59 = vsel %vm2158_vm5, %v2188_v46, %v2190_v11 }
  0x78   : > { %4319 = vmatmul.mubr.msk.bf16.gmra.mrb[28].mxu1 %vm479_vm3, %v451_v63  ;;  %v2193_v63 = vsel %vm2158_vm5, %v2190_v11, %v2192_v31 }
  0x79   : > { %4322 = vmatprep.mubr.msk.bf16.mxu1 %vm479_vm3, %v459_v9  ;;  %v2610_v9 = vrot.slane %v5472_v1, 2 }
  0x7b   : > { %4493 = vmatmul.mubr.msk.bf16.gmra.mrb[12].mxu0 %vm479_vm3, %v2175_v7  ;;  %v2194_v7 = vrot.slane %v5468_v60, 2 }
  0x7c   : > { %4496 = vmatprep.mubr.msk.bf16.mxu0 %vm479_vm3, %v2177_v52  ;;  %v2611_v52 = vrot.slane %v5475_v6, 2 }
  0x7d   : > { %v2195_v10 = vsel %vm2158_vm5, %v2192_v31, %v2194_v7  ;;  %v5545_v31 = vld [vmem:[%s5142_s6 + $0x58] sm:$0xff]  }
  0x7e   : > { %v2612_v15 = vsel %vm2158_vm5, %v2610_v9, %v2611_v52  ;;  %v5558_v9 = vld [vmem:[%s5142_s6 + $0x60] sm:$0xff]  }
  0x80   : > { %4323 = vmatmul.mubr.msk.bf16.gmra.mrb[32].mxu1 %vm479_vm3, %v467_v21  ;;  %v3379_v21 = vld [vmem:[#allocation2 + $0xc] sm:$0x3] }
  0x81   : > { %4328 = vmatprep.mubr.msk.bf16.mxu1 %vm479_vm3, %v5186_v44  ;;  %v2186_v44 = vrot.slane %v5427_v40, 2  ;;  %v5511_v24 = vand.u32 %v3379_v21, %v5137_v2 }
  0x83   : > { %4497 = vmatmul.mubr.msk.bf16.gmra.mrb[16].mxu0 %vm479_vm3, %v2179_v25  ;;  %v2187_v47 = vsel %vm2158_vm5, %v2184_v36, %v2186_v44  ;;  %v2614_v25 = vsel %vm2158_vm5, %v2611_v52, %v2613_v18  ;;  %v2629_v18 = vrot.slane %v5558_v9, 2 }
  0x84   : > { %4500 = vmatprep.mubr.msk.bf16.mxu0 %vm479_vm3, %v2181_v27  ;;  %v5504_v27 = vld [vmem:[%s5142_s6 + $0x30] sm:$0xff]  }
  0x85   : > { %v2617_v36 = vrot.slane %v5504_v27, 2 }
  0x87   : > { %v2618_v2 = vsel %vm2158_vm5, %v2615_v20, %v2617_v36 }
  0x88   : > { %4329 = vmatmul.mubr.msk.bf16.vlgmr.msra.gmra.mrb[0].mxu1 %vm479_vm3, %v5160_v13 }
  0x89   : > { %4365 = vmatpush3.bf16.msra.mxu1 %v5349_v62  ;;  %4332 = vmatprep.mubr.msk.bf16.mxu1 %vm479_vm3, %v5169_v22  ;;  %v2189_v62 = vsel %vm2158_vm5, %v2186_v44, %v2188_v46  ;;  %v5529_v44 = vld [vmem:[%s5142_s6 + $0x48] sm:$0xff]  }
  0x8a   : > { %4402 = vmatprep.subr.bf16.mxu1 %v5434_v43  ;;  %v2623_v46 = vrot.slane %v5529_v44, 2 }
  0x8b   : > { %4501 = vmatmul.mubr.msk.bf16.gmra.mrb[20].mxu0 %vm479_vm3, %v2183_v39  ;;  %v5525_v39 = vld [vmem:[%s5142_s6 + $0x40] sm:$0xff]  }
  0x8c   : > { %4504 = vmatprep.mubr.msk.bf16.mxu0 %vm479_vm3, %v2185_v42  ;;  %v2620_v42 = vsel %vm2158_vm5, %v2617_v36, %v2619_v37  ;;  %v5577_v36 = vld [vmem:[%s5142_s6 + $0x70] sm:$0xff]  }
  0x90   : > { %4333 = vmatmul.mubr.msk.bf16.gmra.mrb[4].mxu1 %vm479_vm3, %v5199_v57 }
  0x91   : > { %4336 = vmatprep.mubr.msk.bf16.mxu1 %vm479_vm3, %v5207_v3 }
  0x93   : > { %4505 = vmatmul.mubr.msk.bf16.gmra.mrb[24].mxu0 %vm479_vm3, %v2187_v47 }
  0x94   : > { %4508 = vmatprep.mubr.msk.bf16.mxu0 %vm479_vm3, %v2189_v62  ;;  %v5541_v62 = vld [vmem:[%s5142_s6 + $0x50] sm:$0xff]  }
  0x95   : > { %v2625_v54 = vrot.slane %v5541_v62, 2 }
  0x97   : > { %v2626_v7 = vsel %vm2158_vm5, %v2623_v46, %v2625_v54 }
  0x98   : > { %4337 = vmatmul.mubr.msk.bf16.gmra.mrb[8].mxu1 %vm479_vm3, %v5227_v34 }
  0x99   : > { %4340 = vmatprep.mubr.msk.bf16.mxu1 %vm479_vm3, %v5234_v41 }
  0x9b   : > { %4509 = vmatmul.mubr.msk.bf16.gmra.mrb[28].mxu0 %vm479_vm3, %v2191_v59  ;;  %v2627_v59 = vrot.slane %v5545_v31, 2 }
  0x9c   : > { %4512 = vmatprep.mubr.msk.bf16.mxu0 %vm479_vm3, %v2193_v63  ;;  %v934_v63 = vld [vmem:[%s5142_s6] sm:$0xe] }
  0x9d   : > { %v3939_v52 = vcombine.low %v934_v63, %v5180_v38  ;;  %v942_v38 = vrot.slane %v5160_v13, 1  ;;  %v944_v13 = vrot.slane %v5169_v22, 1  ;;  %v5600_v22 = vld [vmem:[%s5142_s6 + $0x88] sm:$0xff]  }
  0x9f   : > { %v941_v20 = vrot.slane %v3939_v52, 1  ;;  %v950_v52 = vrot.slane %v5227_v34, 1  ;;  %v952_v34 = vrot.slane %v5234_v41, 1 }
  0xa0   : > { %4341 = vmatmul.mubr.msk.bf16.gmra.mrb[12].mxu1 %vm479_vm3, %v5251_v56 }
  0xa1   : > { %4344 = vmatprep.mubr.msk.bf16.mxu1 %vm479_vm3, %v5264_v17 }
  0xa3   : > { %4513 = vmatmul.mubr.msk.bf16.gmra.mrb[32].mxu0 %vm479_vm3, %v2195_v10  ;;  %v2628_v10 = vsel %vm2158_vm5, %v2625_v54, %v2627_v59  ;;  %v5595_v54 = vld [vmem:[%s5142_s6 + $0x80] sm:$0xff]  }
  0xa4   : > { %4518 = vmatprep.mubr.msk.bf16.mxu0 %vm479_vm3, %v2612_v15  ;;  %v5563_v15 = vld [vmem:[%s5142_s6 + $0x68] sm:$0xff]  }
  0xa5   : > { %v2631_v21 = vrot.slane %v5563_v15, 2 }
  0xa8   : > { %4345 = vmatmul.mubr.msk.bf16.gmra.mrb[16].mxu1 %vm479_vm3, %v5282_v35 }
  0xa9   : > { %4348 = vmatprep.mubr.msk.bf16.mxu1 %vm479_vm3, %v5296_v61 }
  0xab   : > { %4519 = vmatmul.mubr.msk.bf16.vlgmr.msra.gmra.mrb[0].mxu0 %vm479_vm3, %v2614_v25  ;;  %v2630_v25 = vsel %vm2158_vm5, %v2627_v59, %v2629_v18 }
  0xac   : > { %4555 = vmatpush3.bf16.msra.mxu0 %v5383_v49  ;;  %4522 = vmatprep.mubr.msk.bf16.mxu0 %vm479_vm3, %v2616_v32  ;;  %v2621_v49 = vrot.slane %v5525_v39, 2  ;;  %v943_v32 = vsel %vm940_vm6, %v941_v20, %v942_v38 }
  0xad   : > { %4592 = vmatprep.subr.bf16.mxu0 %v5511_v24 }
  0xae   : > { %v2622_v47 = vsel %vm2158_vm5, %v2619_v37, %v2621_v49  ;;  %v2624_v11 = vsel %vm2158_vm5, %v2621_v49, %v2623_v46  ;;  %v2632_v37 = vsel %vm2158_vm5, %v2629_v18, %v2631_v21  ;;  %v946_v49 = vrot.slane %v5199_v57, 1 }
  0xaf   : > { %v948_v57 = vrot.slane %v5207_v3, 1  ;;  %v5619_v3 = vld [vmem:[%s5142_s6 + $0x98] sm:$0xff]  }
  0xb0   : > { %4349 = vmatmul.mubr.msk.bf16.gmra.mrb[20].mxu1 %vm479_vm3, %v5304_v5  ;;  %v947_v59 = vsel %vm940_vm6, %v944_v13, %v946_v49 }
  0xb1   : > { %4352 = vmatprep.mubr.msk.bf16.mxu1 %vm479_vm3, %v5319_v28  ;;  %v949_v18 = vsel %vm940_vm6, %v946_v49, %v948_v57  ;;  %v2936_v49 = vshrl.u32 %v5475_v6, 16 }
  0xb3   : > { %4523 = vmatmul.mubr.msk.bf16.gmra.mrb[4].mxu0 %vm479_vm3, %v2618_v2  ;;  %v5581_v2 = vld [vmem:[%s5142_s6 + $0x78] sm:$0xff]  }
  0xb4   : > { %4526 = vmatprep.mubr.msk.bf16.mxu0 %vm479_vm3, %v2620_v42  ;;  %v2633_v42 = vrot.slane %v5577_v36, 2  ;;  %v2635_v46 = vrot.slane %v5581_v2, 2 }
  0xb6   : > { %v2636_v63 = vsel %vm2158_vm5, %v2633_v42, %v2635_v46 }
  0xb8   : > { %4353 = vmatmul.mubr.msk.bf16.gmra.mrb[24].mxu1 %vm479_vm3, %v5324_v30 }
  0xb9   : > { %4356 = vmatprep.mubr.msk.bf16.mxu1 %vm479_vm3, %v5338_v51 }
  0xbb   : > { %4527 = vmatmul.mubr.msk.bf16.gmra.mrb[8].mxu0 %vm479_vm3, %v2622_v47  ;;  %v945_v47 = vsel %vm940_vm6, %v942_v38, %v944_v13  ;;  %v5616_v38 = vld [vmem:[%s5142_s6 + $0x90] sm:$0xff]   ;;  %v2928_v13 = vshrl.u32 %v5472_v1, 16 }
  0xbc   : > { %4530 = vmatprep.mubr.msk.bf16.mxu0 %vm479_vm3, %v2624_v11  ;;  %v2634_v11 = vsel %vm2158_vm5, %v2631_v21, %v2633_v42  ;;  %v2931_v42 = vshll.u32 %v5472_v1, 16  ;;  %v956_v1 = vrot.slane %v5264_v17, 1 }
  0xc0   : > { %4357 = vmatmul.mubr.msk.bf16.gmra.mrb[28].mxu1 %vm479_vm3, %v5344_v55 }
  0xc1   : > { %4360 = vmatprep.mubr.msk.bf16.mxu1 %vm479_vm3, %v5362_v12 }
  0xc3   : > { %4531 = vmatmul.mubr.msk.bf16.gmra.mrb[12].mxu0 %vm479_vm3, %v2626_v7  ;;  %v2637_v7 = vrot.slane %v5595_v54, 2 }
  0xc4   : > { %4534 = vmatprep.mubr.msk.bf16.mxu0 %vm479_vm3, %v2628_v10  ;;  %v2639_v10 = vrot.slane %v5600_v22, 2 }
  0xc5   : > { %v2638_v20 = vsel %vm2158_vm5, %v2635_v46, %v2637_v7  ;;  %v2939_v46 = vshll.u32 %v5475_v6, 16 }
  0xc6   : > { %v2640_v21 = vsel %vm2158_vm5, %v2637_v7, %v2639_v10  ;;  %v2938_v7 = vrot.slane %v2936_v49, 2 }
  0xc8   : > { %4361 = vmatmul.mubr.msk.bf16.gmra.mrb[32].mxu1 %vm479_vm3, %v5369_v4 }
  0xc9   : > { %4366 = vmatprep.mubr.msk.bf16.mxu1 %vm479_vm3, %v943_v32  ;;  %v954_v32 = vrot.slane %v5251_v56, 1  ;;  %v2930_v56 = vrot.slane %v2928_v13, 2  ;;  %v2957_v13 = vshll.u32 %v5492_v16, 16 }
  0xcb   : > { %4535 = vmatmul.mubr.msk.bf16.gmra.mrb[16].mxu0 %vm479_vm3, %v2630_v25  ;;  %v2641_v25 = vrot.slane %v5616_v38, 2 }
  0xcc   : > { %4538 = vmatprep.mubr.msk.bf16.mxu0 %vm479_vm3, %v2632_v37  ;;  %v2643_v37 = vrot.slane %v5619_v3, 2 }
  0xcd   : > { %v2642_v41 = vsel %vm2158_vm5, %v2639_v10, %v2641_v25  ;;  %v958_v10 = vrot.slane %v5282_v35, 1 }
  0xcf   : > { %v959_v49 = vsel %vm940_vm6, %v956_v1, %v958_v10 }
  0xd0   : > { %4367 = vmatmul.mubr.msk.bf16.vlgmr.msra.gmra.mrb[0].mxu1 %vm479_vm3, %v945_v47  ;;  %v953_v47 = vsel %vm940_vm6, %v950_v52, %v952_v34 }
  0xd1   : > { %4403 = vmatpush3.bf16.msra.mxu1 %v5434_v43  ;;  %4370 = vmatprep.mubr.msk.bf16.mxu1 %vm479_vm3, %v947_v59  ;;  %v951_v43 = vsel %vm940_vm6, %v948_v57, %v950_v52  ;;  %v2644_v59 = vsel %vm2158_vm5, %v2641_v25, %v2643_v37  ;;  %v2933_v57 = vrot.slane %v2931_v42, 3  ;;  %v2954_v25 = vshrl.u32 %v5492_v16, 16 }
  0xd2   : > { %4630 = vmatprep.subr.bf16.mxu1 %v5163_v14  ;;  %v957_v42 = vsel %vm940_vm6, %v954_v32, %v956_v1 }
  0xd3   : > { %4539 = vmatmul.mubr.msk.bf16.gmra.mrb[20].mxu0 %vm479_vm3, %v2634_v11  ;;  %v955_v11 = vsel %vm940_vm6, %v952_v34, %v954_v32 }
  0xd4   : > { %4542 = vmatprep.mubr.msk.bf16.mxu0 %vm479_vm3, %v2636_v63  ;;  %v5009_v63 = vld [vmem:[%s5142_s6 + $0xa0] ss:$0 sps:$4 sm:$0x33]  }
  0xd5   : > { %v2645_v52 = vrot.slane %v5009_v63, 2  ;;  %v2963_v63 = vshrl.u32 %v5504_v27, 16 }
  0xd7   : > { %v2646_v17 = vsel %vm2158_vm5, %v2643_v37, %v2645_v52  ;;  %v962_v37 = vrot.slane %v5304_v5, 1 }
  0xd8   : > { %4371 = vmatmul.mubr.msk.bf16.gmra.mrb[4].mxu1 %vm479_vm3, %v949_v18  ;;  %v2941_v18 = vrot.slane %v2939_v46, 3 }
  0xd9   : > { %4374 = vmatprep.mubr.msk.bf16.mxu1 %vm479_vm3, %v951_v43  ;;  %v2948_v43 = vshll.u32 %v5488_v23, 16 }
  0xda   : > { %v2942_v34 = vor.u32 %v2941_v18, %v2938_v7  ;;  %v2972_v7 = vshrl.u32 %v5508_v33, 16  ;;  %v2975_v18 = vshll.u32 %v5508_v33, 16 }
  0xdb   : > { %4543 = vmatmul.mubr.msk.bf16.gmra.mrb[24].mxu0 %vm479_vm3, %v2638_v20  ;;  %v2945_v20 = vshrl.u32 %v5488_v23, 16 }
  0xdc   : > { %4546 = vmatprep.mubr.msk.bf16.mxu0 %vm479_vm3, %v2640_v21  ;;  %v2934_v21 = vor.u32 %v2933_v57, %v2930_v56  ;;  %v2966_v56 = vshll.u32 %v5504_v27, 16  ;;  %v2974_v5 = vrot.slane %v2972_v7, 2  ;;  %v3002_v7 = vshll.u32 %v5541_v62, 16 }
  0xdd   : > { %v2947_v46 = vrot.slane %v2945_v20, 2  ;;  %v2965_v20 = vrot.slane %v2963_v63, 2  ;;  %v968_v63 = vrot.slane %v5338_v51, 1 }
  0xde   : > { %v2943_v35 = vsel %vm2926_vm7, %v2934_v21, %v2942_v34 }
  0xe0   : > { %4375 = vmatmul.mubr.msk.bf16.gmra.mrb[8].mxu1 %vm479_vm3, %v953_v47  ;;  %v2950_v47 = vrot.slane %v2948_v43, 3  ;;  %v2968_v43 = vrot.slane %v2966_v56, 3  ;;  %v970_v56 = vrot.slane %v5344_v55, 1 }
  0xe1   : > { %4378 = vmatprep.mubr.msk.bf16.mxu1 %vm479_vm3, %v955_v11  ;;  %v2959_v11 = vrot.slane %v2957_v13, 3  ;;  %v964_v13 = vrot.slane %v5319_v28, 1 }
  0xe2   : > { %v2951_v32 = vor.u32 %v2950_v47, %v2947_v46  ;;  %v2990_v46 = vshrl.u32 %v5529_v44, 16  ;;  %v2993_v47 = vshll.u32 %v5529_v44, 16  ;;  %v971_v51 = vsel %vm940_vm6, %v968_v63, %v970_v56 }
  0xe3   : > { %4547 = vmatmul.mubr.msk.bf16.gmra.mrb[28].mxu0 %vm479_vm3, %v2642_v41  ;;  %v2956_v41 = vrot.slane %v2954_v25, 2  ;;  %v2977_v25 = vrot.slane %v2975_v18, 3 }
  0xe4   : > { %4550 = vmatprep.mubr.msk.bf16.mxu0 %vm479_vm3, %v2644_v59  ;;  %v960_v59 = vrot.slane %v5296_v61, 1  ;;  %v2952_v52 = vsel %vm2926_vm7, %v2942_v34, %v2951_v32  ;;  %v966_v34 = vrot.slane %v5324_v30, 1  ;;  %v2992_v30 = vrot.slane %v2990_v46, 2 }
  0xe5   : > { %v2960_v57 = vor.u32 %v2959_v11, %v2956_v41  ;;  %v3026_v46 = vshrl.u32 %v5563_v15, 16 }
  0xe6   : > { %v961_v1 = vsel %vm940_vm6, %v958_v10, %v960_v59  ;;  %v963_v61 = vsel %vm940_vm6, %v960_v59, %v962_v37  ;;  %v2969_v10 = vor.u32 %v2968_v43, %v2965_v20 }
  0xe7   : > { %v2961_v21 = vsel %vm2926_vm7, %v2951_v32, %v2960_v57  ;;  %v2995_v32 = vrot.slane %v2993_v47, 3  ;;  %v3029_v47 = vshll.u32 %v5563_v15, 16 }
  0xe8   : > { %4379 = vmatmul.mubr.msk.bf16.gmra.mrb[12].mxu1 %vm479_vm3, %v957_v42  ;;  %v2981_v42 = vshrl.u32 %v5525_v39, 16  ;;  %v2970_v28 = vsel %vm2926_vm7, %v2960_v57, %v2969_v10  ;;  %v2999_v57 = vshrl.u32 %v5541_v62, 16 }
  0xe9   : > { %4382 = vmatprep.mubr.msk.bf16.mxu1 %vm479_vm3, %v959_v49  ;;  %v2978_v49 = vor.u32 %v2977_v25, %v2974_v5  ;;  %v2996_v18 = vor.u32 %v2995_v32, %v2992_v30  ;;  %v976_v30 = vrot.slane %v5388_v53, 1  ;;  %v1385_v32 = vrot.slane %v5152_v8, 1 }
  0xea   : > { %v2983_v41 = vrot.slane %v2981_v42, 2  ;;  %v3001_v43 = vrot.slane %v2999_v57, 2  ;;  %v3017_v42 = vshrl.u32 %v5558_v9, 16  ;;  %v3035_v57 = vshrl.u32 %v5577_v36, 16 }
  0xeb   : > { %4551 = vmatmul.mubr.msk.bf16.gmra.mrb[32].mxu0 %vm479_vm3, %v2646_v17  ;;  %v2984_v17 = vshll.u32 %v5525_v39, 16  ;;  %v2979_v59 = vsel %vm2926_vm7, %v2969_v10, %v2978_v49 }
  0xec   : > { %4556 = vmatprep.mubr.msk.bf16.mxu0 %vm479_vm3, %v2943_v35  ;;  %v965_v35 = vsel %vm940_vm6, %v962_v37, %v964_v13 }
  0xed   : > { %v2986_v11 = vrot.slane %v2984_v17, 3  ;;  %v3020_v17 = vshll.u32 %v5558_v9, 16 }
  0xef   : > { %v2987_v37 = vor.u32 %v2986_v11, %v2983_v41  ;;  %v3022_v41 = vrot.slane %v3020_v17, 3  ;;  %v3028_v11 = vrot.slane %v3026_v46, 2  ;;  %v3062_v46 = vshrl.u32 %v5600_v22, 16 }
  0xf0   : > { %4383 = vmatmul.mubr.msk.bf16.gmra.mrb[16].mxu1 %vm479_vm3, %v961_v1  ;;  %v3008_v1 = vshrl.u32 %v5545_v31, 16 }
  0xf1   : > { %4386 = vmatprep.mubr.msk.bf16.mxu1 %vm479_vm3, %v963_v61  ;;  %v969_v61 = vsel %vm940_vm6, %v966_v34, %v968_v63  ;;  %v2988_v20 = vsel %vm2926_vm7, %v2978_v49, %v2987_v37  ;;  %v2997_v5 = vsel %vm2926_vm7, %v2987_v37, %v2996_v18  ;;  %v5013_v37 = vld [vmem:[%s5142_s6 + $0x10] sm:$0xff]  }
  0xf2   : > { %v3010_v55 = vrot.slane %v3008_v1, 2  ;;  %v3044_v1 = vshrl.u32 %v5581_v2, 16 }
  0xf3   : > { %4557 = vmatmul.mubr.msk.bf16.vlgmr.msra.gmra.mrb[0].mxu0 %vm479_vm3, %v2952_v52  ;;  %v3011_v52 = vshll.u32 %v5545_v31, 16 }
  0xf4   : > { %4593 = vmatpush3.bf16.msra.mxu0 %v5511_v24  ;;  %4560 = vmatprep.mubr.msk.bf16.mxu0 %vm479_vm3, %v2961_v21  ;;  %v967_v24 = vsel %vm940_vm6, %v964_v13, %v966_v34  ;;  %v3004_v21 = vrot.slane %v3002_v7, 3  ;;  %v972_v13 = vrot.slane %v5362_v12, 1  ;;  %v974_v34 = vrot.slane %v5369_v4, 1 }
  0xf5   : > { %v3013_v25 = vrot.slane %v3011_v52, 3  ;;  %v3038_v7 = vshll.u32 %v5577_v36, 16  ;;  %v3047_v52 = vshll.u32 %v5581_v2, 16 }
  0xf6   : > { %v3005_v10 = vor.u32 %v3004_v21, %v3001_v43  ;;  %v975_v12 = vsel %vm940_vm6, %v972_v13, %v974_v34  ;;  %v3046_v21 = vrot.slane %v3044_v1, 2  ;;  %v3080_v1 = vshrl.u32 %v5619_v3, 16 }
  0xf7   : > { %v3014_v49 = vor.u32 %v3013_v25, %v3010_v55  ;;  %v5014_v55 = vld [vmem:[%s5142_s6 + $0x18] sm:$0xff]  }
  0xf8   : > { %4387 = vmatmul.mubr.msk.bf16.gmra.mrb[20].mxu1 %vm479_vm3, %v965_v35  ;;  %v973_v35 = vsel %vm940_vm6, %v970_v56, %v972_v13  ;;  %v1386_v56 = vrot.slane %v5013_v37, 1  ;;  %v1388_v25 = vrot.slane %v5014_v55, 1  ;;  %v5017_v37 = vld [vmem:[%s5142_s6 + $0x30] sm:$0xff]   ;;  %v5018_v55 = vld [vmem:[%s5142_s6 + $0x38] sm:$0xff]  }
  0xf9   : > { %4390 = vmatprep.mubr.msk.bf16.mxu1 %vm479_vm3, %v967_v24  ;;  %v3019_v24 = vrot.slane %v3017_v42, 2  ;;  %v3015_v4 = vsel %vm2926_vm7, %v3005_v10, %v3014_v49  ;;  %v5015_v42 = vld [vmem:[%s5142_s6 + $0x20] sm:$0xff]  }
  0xfa   : > { %v1387_v8 = vsel %vm940_vm6, %v1385_v32, %v1386_v56  ;;  %v1390_v17 = vrot.slane %v5015_v42, 1 }
  0xfb   : > { %4561 = vmatmul.mubr.msk.bf16.gmra.mrb[4].mxu0 %vm479_vm3, %v2970_v28  ;;  %v3006_v28 = vsel %vm2926_vm7, %v2996_v18, %v3005_v10  ;;  %v3023_v63 = vor.u32 %v3022_v41, %v3019_v24  ;;  %v3053_v10 = vshrl.u32 %v5595_v54, 16 }
  0xfc   : > { %4564 = vmatprep.mubr.msk.bf16.mxu0 %vm479_vm3, %v2979_v59  ;;  %v3031_v59 = vrot.slane %v3029_v47, 3  ;;  %v3065_v47 = vshll.u32 %v5600_v22, 16  ;;  %v1391_v41 = vsel %vm940_vm6, %v1388_v25, %v1390_v17 }
  0xfd   : > { %v3024_v53 = vsel %vm2926_vm7, %v3014_v49, %v3023_v63 }
  0xfe   : > { %v3032_v18 = vor.u32 %v3031_v59, %v3028_v11  ;;  %v3064_v11 = vrot.slane %v3062_v46, 2  ;;  %v3067_v59 = vrot.slane %v3065_v47, 3  ;;  %v3378_v46 = vld [vmem:[%s5142_s6 + $0x10] sm:$0x8] }
 0x100   : > { %4391 = vmatmul.mubr.msk.bf16.gmra.mrb[24].mxu1 %vm479_vm3, %v969_v61  ;;  %v977_v61 = vsel %vm940_vm6, %v974_v34, %v976_v30  ;;  %v3033_v43 = vsel %vm2926_vm7, %v3023_v63, %v3032_v18  ;;  %v3056_v34 = vshll.u32 %v5595_v54, 16  ;;  %v5016_v30 = vld [vmem:[%s5142_s6 + $0x28] sm:$0xff]  }
 0x101   : > { %4394 = vmatprep.mubr.msk.bf16.mxu1 %vm479_vm3, %v971_v51  ;;  %v3040_v51 = vrot.slane %v3038_v7, 3  ;;  %v1392_v32 = vrot.slane %v5016_v30, 1  ;;  %v3074_v7 = vshll.u32 %v5616_v38, 16 }
 0x102   : > { %v3058_v24 = vrot.slane %v3056_v34, 3 }
 0x103   : > { %4565 = vmatmul.mubr.msk.bf16.gmra.mrb[8].mxu0 %vm479_vm3, %v2988_v20  ;;  %v3037_v20 = vrot.slane %v3035_v57, 2  ;;  %v3071_v57 = vshrl.u32 %v5616_v38, 16 }
 0x104   : > { %4568 = vmatprep.mubr.msk.bf16.mxu0 %vm479_vm3, %v2997_v5  ;;  %v3049_v5 = vrot.slane %v3047_v52, 3  ;;  %v1393_v52 = vsel %vm940_vm6, %v1390_v17, %v1392_v32 }
 0x105   : > { %v3041_v13 = vor.u32 %v3040_v51, %v3037_v20  ;;  %v3076_v20 = vrot.slane %v3074_v7, 3  ;;  %v5754_v51 = vld [vmem:[%s5142_s6 + $0xa0] ss:$0 sps:$4 sm:$0x77]  }
 0x106   : > { %v3050_v49 = vor.u32 %v3049_v5, %v3046_v21  ;;  %v3082_v21 = vrot.slane %v3080_v1, 2  ;;  %v3089_v42 = vshrl.u32 %v5754_v51, 16  ;;  %v3092_v17 = vshll.u32 %v5754_v51, 16  ;;  %v5022_v1 = vld [vmem:[%s5142_s6 + $0x58] sm:$0xff]  }
 0x108   : > { %4395 = vmatmul.mubr.msk.bf16.gmra.mrb[28].mxu1 %vm479_vm3, %v973_v35  ;;  %v1389_v35 = vsel %vm940_vm6, %v1386_v56, %v1388_v25  ;;  %v1394_v56 = vrot.slane %v5017_v37, 1  ;;  %v1396_v25 = vrot.slane %v5018_v55, 1 }
 0x109   : > { %4398 = vmatprep.mubr.msk.bf16.mxu1 %vm479_vm3, %v975_v12  ;;  %v3055_v12 = vrot.slane %v3053_v10, 2  ;;  %v5019_v10 = vld [vmem:[%s5142_s6 + $0x40] sm:$0xff]  }
 0x10a   : > { %v1398_v34 = vrot.slane %v5019_v10, 1  ;;  %v1397_v47 = vsel %vm940_vm6, %v1394_v56, %v1396_v25 }
 0x10b   : > { %4569 = vmatmul.mubr.msk.bf16.gmra.mrb[12].mxu0 %vm479_vm3, %v3006_v28  ;;  %v3042_v28 = vsel %vm2926_vm7, %v3032_v18, %v3041_v13  ;;  %v3059_v63 = vor.u32 %v3058_v24, %v3055_v12  ;;  %v3068_v18 = vor.u32 %v3067_v59, %v3064_v11  ;;  %v3091_v12 = vrot.slane %v3089_v42, 2  ;;  %v5020_v11 = vld [vmem:[%s5142_s6 + $0x48] sm:$0xff]  }
 0x10c   : > { %4572 = vmatprep.mubr.msk.bf16.mxu0 %vm479_vm3, %v3015_v4  ;;  %v3051_v4 = vsel %vm2926_vm7, %v3041_v13, %v3050_v49  ;;  %v3094_v24 = vrot.slane %v3092_v17, 3  ;;  %v1400_v59 = vrot.slane %v5020_v11, 1  ;;  %v3397_v42 = vrot.slane %v5529_v44, 3 }
 0x10d   : > { %v3399_v44 = vrot.slane %v5541_v62, 3  ;;  %v1816_v62 = vshrl.u32 %v5412_v26, 16 }
 0x10e   : > { %v3095_v30 = vor.u32 %v3094_v24, %v3091_v12  ;;  %v1810_v12 = vshll.u32 %v5401_v50, 16  ;;  %v3401_v24 = vrot.slane %v5545_v31, 3  ;;  %v1819_v31 = vshll.u32 %v5412_v26, 16 }
 0x10f   : > { %v3400_v11 = vsel %vm3383_vm8, %v3397_v42, %v3399_v44 }
 0x110   : > { %4399 = vmatmul.mubr.msk.bf16.gmra.mrb[32].mxu1 %vm479_vm3, %v977_v61  ;;  %v3060_v61 = vsel %vm2926_vm7, %v3050_v49, %v3059_v63 }
 0x111   : > { %4404 = vmatprep.mubr.msk.bf16.mxu1 %vm479_vm3, %v1387_v8  ;;  %v3073_v8 = vrot.slane %v3071_v57, 2 }
 0x113   : > { %4573 = vmatmul.mubr.msk.bf16.gmra.mrb[16].mxu0 %vm479_vm3, %v3024_v53  ;;  %v1395_v53 = vsel %vm940_vm6, %v1392_v32, %v1394_v56  ;;  %v3077_v13 = vor.u32 %v3076_v20, %v3073_v8  ;;  %v5021_v32 = vld [vmem:[%s5142_s6 + $0x50] sm:$0xff]   ;;  %v3385_v56 = vrot.slane %v5475_v6, 3  ;;  %v3387_v6 = vrot.slane %v5488_v23, 3 }
 0x114   : > { %4576 = vmatprep.mubr.msk.bf16.mxu0 %vm479_vm3, %v3033_v43  ;;  %v3069_v43 = vsel %vm2926_vm7, %v3059_v63, %v3068_v18  ;;  %v1402_v63 = vrot.slane %v5021_v32, 1  ;;  %v1408_v23 = vrot.slane %v5412_v26, 1  ;;  %v1812_v32 = vrot.slane %v1810_v12, 2 }
 0x115   : > { %v3388_v8 = vsel %vm3383_vm8, %v3385_v56, %v3387_v6  ;;  %v3415_v12 = vrot.slane %v5616_v38, 3  ;;  %v3419_v38 = vrot.slane %v5754_v51, 3 }
 0x116   : > { %v1403_v7 = vsel %vm940_vm6, %v1400_v59, %v1402_v63 }
 0x118   : > { %4405 = vmatmul.mubr.msk.bf16.vlgmr.msra.gmra.mrb[0].mxu1 %vm479_vm3, %v1389_v35  ;;  %v3078_v35 = vsel %vm2926_vm7, %v3068_v18, %v3077_v13 }
 0x119   : > { %4631 = vmatpush3.bf16.msra.mxu1 %v5163_v14  ;;  %4408 = vmatprep.mubr.msk.bf16.mxu1 %vm479_vm3, %v1391_v41  ;;  %v3083_v14 = vshll.u32 %v5619_v3, 16 }
 0x11b   : > { %4577 = vmatmul.mubr.msk.bf16.gmra.mrb[20].mxu0 %vm479_vm3, %v3042_v28  ;;  %v3085_v5 = vrot.slane %v3083_v14, 3  ;;  %v1399_v28 = vsel %vm940_vm6, %v1396_v25, %v1398_v34  ;;  %v1404_v14 = vrot.slane %v5022_v1, 1  ;;  %v1818_v1 = vrot.slane %v1816_v62, 1 }
 0x11c   : > { %4580 = vmatprep.mubr.msk.bf16.mxu0 %vm479_vm3, %v3051_v4  ;;  %v4095_v4 = vcombine.low %v3378_v46, %v5464_v58  ;;  %v1401_v58 = vsel %vm940_vm6, %v1398_v34, %v1400_v59  ;;  %v1414_v34 = vrot.slane %v5431_v19, 1 }
 0x11d   : > { %v3086_v49 = vor.u32 %v3085_v5, %v3082_v21  ;;  %v1410_v21 = vrot.slane %v5416_v29, 1  ;;  %v3393_v5 = vrot.slane %v5508_v33, 3  ;;  %v3395_v33 = vrot.slane %v5525_v39, 3 }
 0x11e   : > { %v3384_v37 = vrot.slane %v4095_v4, 3  ;;  %v1416_v39 = vrot.slane %v5448_v48, 1  ;;  %v5012_v4 = vld [vmem:[%s5142_s6 + $0x98] ss:$0 sps:$4 sm:$0x11]  }
 0x11f   : > { %v3087_v41 = vsel %vm2926_vm7, %v3077_v13, %v3086_v49  ;;  %v3096_v57 = vsel %vm2926_vm7, %v3086_v49, %v3095_v30  ;;  %v1411_v13 = vsel %vm940_vm6, %v1408_v23, %v1410_v21  ;;  %v3396_v49 = vsel %vm3383_vm8, %v3393_v5, %v3395_v33 }
 0x120   : > { %4409 = vmatmul.mubr.msk.bf16.gmra.mrb[4].mxu1 %vm479_vm3, %v1393_v52  ;;  %v3386_v18 = vsel %vm3383_vm8, %v3384_v37, %v3385_v56  ;;  %v1406_v52 = vrot.slane %v5401_v50, 1  ;;  %v3403_v37 = vrot.slane %v5558_v9, 3 }
 0x121   : > { %4412 = vmatprep.mubr.msk.bf16.mxu1 %vm479_vm3, %v1395_v53  ;;  %v1405_v53 = vsel %vm940_vm6, %v1402_v63, %v1404_v14  ;;  %v3402_v63 = vsel %vm3383_vm8, %v3399_v44, %v3401_v24 }
 0x122   : > { %v1407_v20 = vsel %vm940_vm6, %v1404_v14, %v1406_v52  ;;  %v1409_v55 = vsel %vm940_vm6, %v1406_v52, %v1408_v23  ;;  %v1821_v14 = vrot.slane %v1819_v31, 2  ;;  %v3409_v23 = vrot.slane %v5581_v2, 3 }
 0x123   : > { %4581 = vmatmul.mubr.msk.bf16.gmra.mrb[24].mxu0 %vm479_vm3, %v3060_v61  ;;  %v3389_v61 = vrot.slane %v5492_v16, 3  ;;  %v3391_v16 = vrot.slane %v5504_v27, 3  ;;  %v1412_v27 = vrot.slane %v5427_v40, 1  ;;  %v1855_v2 = vshll.u32 %v5448_v48, 16 }
 0x124   : > { %4584 = vmatprep.mubr.msk.bf16.mxu0 %vm479_vm3, %v3069_v43 }
 0x125   : > { %v3390_v43 = vsel %vm3383_vm8, %v3387_v6, %v3389_v61  ;;  %v3392_v25 = vsel %vm3383_vm8, %v3389_v61, %v3391_v16  ;;  %v3394_v10 = vsel %vm3383_vm8, %v3391_v16, %v3393_v5  ;;  %v1413_v17 = vsel %vm940_vm6, %v1410_v21, %v1412_v27 }
 0x126   : > { %v1415_v46 = vsel %vm940_vm6, %v1412_v27, %v1414_v34  ;;  %v3404_v6 = vsel %vm3383_vm8, %v3401_v24, %v3403_v37  ;;  %v3411_v27 = vrot.slane %v5595_v54, 3  ;;  %v1870_v54 = vshrl.u32 %v5468_v60, 16 }
 0x128   : > { %4413 = vmatmul.mubr.msk.bf16.gmra.mrb[8].mxu1 %vm479_vm3, %v1397_v47  ;;  %v3398_v47 = vsel %vm3383_vm8, %v3395_v33, %v3397_v42  ;;  %v1864_v42 = vshll.u32 %v5452_v45, 16 }
 0x129   : > { %4416 = vmatprep.mubr.msk.bf16.mxu1 %vm479_vm3, %v1399_v28  ;;  %v1807_v28 = vshrl.u32 %v5401_v50, 16  ;;  %v1420_v50 = vrot.slane %v5012_v4, 1 }
 0x12b   : > { %4585 = vmatmul.mubr.msk.bf16.gmra.mrb[28].mxu0 %vm479_vm3, %v3078_v35  ;;  %v1418_v35 = vrot.slane %v5452_v45, 1  ;;  %v1809_v30 = vrot.slane %v1807_v28, 1 }
 0x12c   : > { %4588 = vmatprep.mubr.msk.bf16.mxu0 %vm479_vm3, %v3087_v41  ;;  %v1417_v41 = vsel %vm940_vm6, %v1414_v34, %v1416_v39  ;;  %v1861_v34 = vshrl.u32 %v5452_v45, 16 }
 0x12d   : > { %v1419_v59 = vsel %vm940_vm6, %v1416_v39, %v1418_v35  ;;  %v1813_v56 = vor.u32 %v1812_v32, %v1809_v30  ;;  %v3412_v39 = vsel %vm3383_vm8, %v3409_v23, %v3411_v27 }
 0x12f   : > { %v1814_v26 = vsel %vm1707_vm2, %v5301_v0, %v1813_v56 }
 0x130   : > { %4417 = vmatmul.mubr.msk.bf16.gmra.mrb[12].mxu1 %vm479_vm3, %v1401_v58  ;;  %v1825_v58 = vshrl.u32 %v5416_v29, 16 }
 0x131   : > { %4420 = vmatprep.mubr.msk.bf16.mxu1 %vm479_vm3, %v1403_v7  ;;  %v3405_v7 = vrot.slane %v5563_v15, 3  ;;  %v1834_v15 = vshrl.u32 %v5427_v40, 16 }
 0x132   : > { %v1827_v52 = vrot.slane %v1825_v58, 1 }
 0x133   : > { %4589 = vmatmul.mubr.msk.bf16.gmra.mrb[32].mxu0 %vm479_vm3, %v3096_v57  ;;  %v1828_v57 = vshll.u32 %v5416_v29, 16  ;;  %v3406_v9 = vsel %vm3383_vm8, %v3403_v37, %v3405_v7  ;;  %v1822_v29 = vor.u32 %v1821_v14, %v1818_v1  ;;  %v1836_v21 = vrot.slane %v1834_v15, 1 }
 0x134   : > { %4594 = vmatprep.mubr.msk.bf16.mxu0 %vm479_vm3, %v3386_v18  ;;  %v1421_v18 = vsel %vm940_vm6, %v1418_v35, %v1420_v50  ;;  %v1866_v35 = vrot.slane %v1864_v42, 2 }
 0x135   : > { %v1830_v61 = vrot.slane %v1828_v57, 2  ;;  %v1823_v16 = vsel %vm1707_vm2, %v1813_v56, %v1822_v29 }
 0x137   : > { %v1831_v0 = vor.u32 %v1830_v61, %v1827_v52 }
 0x138   : > { %4421 = vmatmul.mubr.msk.bf16.gmra.mrb[16].mxu1 %vm479_vm3, %v1405_v53  ;;  %v1837_v53 = vshll.u32 %v5427_v40, 16 }
 0x139   : > { %4424 = vmatprep.mubr.msk.bf16.mxu1 %vm479_vm3, %v1407_v20  ;;  %v1843_v20 = vshrl.u32 %v5431_v19, 16 }
 0x13a   : > { %v1839_v5 = vrot.slane %v1837_v53, 2 }
 0x13b   : > { %4595 = vmatmul.mubr.msk.bf16.vlgmr.msra.gmra.mrb[0].mxu0 %vm479_vm3, %v3388_v8  ;;  %v3407_v8 = vrot.slane %v5577_v36, 3  ;;  %v1845_v40 = vrot.slane %v1843_v20, 1  ;;  %v1852_v36 = vshrl.u32 %v5448_v48, 16  ;;  %v1863_v48 = vrot.slane %v1861_v34, 1 }
 0x13c   : > { %4598 = vmatprep.mubr.msk.bf16.mxu0 %vm479_vm3, %v3390_v43  ;;  %v1846_v43 = vshll.u32 %v5431_v19, 16  ;;  %v1840_v19 = vor.u32 %v1839_v5, %v1836_v21 }
 0x13d   : > { %v1867_v24 = vor.u32 %v1866_v35, %v1863_v48 }
 0x140   : > { %4425 = vmatmul.mubr.msk.bf16.gmra.mrb[20].mxu1 %vm479_vm3, %v1409_v55  ;;  %v3408_v55 = vsel %vm3383_vm8, %v3405_v7, %v3407_v8 }
 0x141   : > { %4428 = vmatprep.mubr.msk.bf16.mxu1 %vm479_vm3, %v1411_v13  ;;  %v1848_v13 = vrot.slane %v1846_v43, 2 }
 0x143   : > { %4599 = vmatmul.mubr.msk.bf16.gmra.mrb[4].mxu0 %vm479_vm3, %v3392_v25  ;;  %v1832_v25 = vsel %vm1707_vm2, %v1822_v29, %v1831_v0  ;;  %v1849_v33 = vor.u32 %v1848_v13, %v1845_v40 }
 0x144   : > { %4602 = vmatprep.mubr.msk.bf16.mxu0 %vm479_vm3, %v3394_v10  ;;  %v3410_v10 = vsel %vm3383_vm8, %v3407_v8, %v3409_v23  ;;  %v5912_v8 = vld [vmem:[%s6009_s2] ss:$0 sm:$0xff] }
 0x145   : > { %v1850_v44 = vsel %vm1707_vm2, %v1840_v19, %v1849_v33 }
 0x148   : > { %4429 = vmatmul.mubr.msk.bf16.gmra.mrb[24].mxu1 %vm479_vm3, %v1413_v17  ;;  %v3413_v17 = vrot.slane %v5600_v22, 3  ;;  %v1873_v22 = vshll.u32 %v5468_v60, 16 }
 0x149   : > { %4432 = vmatprep.mubr.msk.bf16.mxu1 %vm479_vm3, %v1415_v46  ;;  %v1854_v46 = vrot.slane %v1852_v36, 1 }
 0x14a   : > { %v3414_v28 = vsel %vm3383_vm8, %v3411_v27, %v3413_v17  ;;  %v3416_v30 = vsel %vm3383_vm8, %v3413_v17, %v3415_v12 }
 0x14b   : > { %4603 = vmatmul.mubr.msk.bf16.gmra.mrb[8].mxu0 %vm479_vm3, %v3396_v49  ;;  %v1841_v49 = vsel %vm1707_vm2, %v1831_v0, %v1840_v19 }
 0x14c   : > { %4606 = vmatprep.mubr.msk.bf16.mxu0 %vm479_vm3, %v3398_v47  ;;  %v1857_v47 = vrot.slane %v1855_v2, 2 }
 0x14e   : > { %v1858_v45 = vor.u32 %v1857_v47, %v1854_v46 }
 0x150   : > { %4433 = vmatmul.mubr.msk.bf16.gmra.mrb[28].mxu1 %vm479_vm3, %v1417_v41  ;;  %v3417_v41 = vrot.slane %v5619_v3, 3  ;;  %v1859_v4 = vsel %vm1707_vm2, %v1849_v33, %v1858_v45  ;;  %v1868_v32 = vsel %vm1707_vm2, %v1858_v45, %v1867_v24 }
 0x151   : > { %4436 = vmatprep.mubr.msk.bf16.mxu1 %vm479_vm3, %v1419_v59  ;;  %v1875_v59 = vrot.slane %v1873_v22, 2 }
 0x152   : > { %v3420_v50 = vsel %vm3383_vm8, %v3417_v41, %v3419_v38 }
 0x153   : > { %4607 = vmatmul.mubr.msk.bf16.gmra.mrb[12].mxu0 %vm479_vm3, %v3400_v11  ;;  %v1872_v11 = vrot.slane %v1870_v54, 1 }
 0x154   : > { %4610 = vmatprep.mubr.msk.bf16.mxu0 %vm479_vm3, %v3402_v63  ;;  %v3418_v63 = vsel %vm3383_vm8, %v3415_v12, %v3417_v41 }
 0x155   : > { %v1876_v60 = vor.u32 %v1875_v59, %v1872_v11 }
 0x157   : > { %v1877_v3 = vsel %vm1707_vm2, %v1867_v24, %v1876_v60 }
 0x158   : > { %4437 = vmatmul.mubr.msk.bf16.gmra.mrb[32].mxu1 %vm479_vm3, %v1421_v18 }
 0x159   : > { %4462 = vmatprep.mubr.msk.bf16.mxu1 %vm479_vm3, %v1814_v26 }
 0x15b   : > { %4611 = vmatmul.mubr.msk.bf16.gmra.mrb[16].mxu0 %vm479_vm3, %v3404_v6 }
 0x15c   : > { %4614 = vmatprep.mubr.msk.bf16.mxu0 %vm479_vm3, %v3406_v9 }
 0x160   : > { %4463 = vmatmul.mubr.msk.bf16.vlgmr.msra.gmra.mrb[20].mxu1 %vm479_vm3, %v1823_v16 }
 0x161   : > { %4466 = vmatprep.mubr.msk.bf16.mxu1 %vm479_vm3, %v1832_v25 }
 0x163   : > { %4615 = vmatmul.mubr.msk.bf16.gmra.mrb[20].mxu0 %vm479_vm3, %v3408_v55 }
 0x164   : > { %4618 = vmatprep.mubr.msk.bf16.mxu0 %vm479_vm3, %v3410_v10 }
 0x168   : > { %4467 = vmatmul.mubr.msk.bf16.gmra.mrb[24].mxu1 %vm479_vm3, %v1841_v49 }
 0x169   : > { %4470 = vmatprep.mubr.msk.bf16.mxu1 %vm479_vm3, %v1850_v44 }
 0x16b   : > { %4619 = vmatmul.mubr.msk.bf16.gmra.mrb[24].mxu0 %vm479_vm3, %v3412_v39 }
 0x16c   : > { %4622 = vmatprep.mubr.msk.bf16.mxu0 %vm479_vm3, %v3414_v28 }
 0x170   : > { %4471 = vmatmul.mubr.msk.bf16.gmra.mrb[28].mxu1 %vm479_vm3, %v1859_v4 }
 0x171   : > { %4474 = vmatprep.mubr.msk.bf16.mxu1 %vm479_vm3, %v1868_v32 }
 0x173   : > { %4623 = vmatmul.mubr.msk.bf16.gmra.mrb[28].mxu0 %vm479_vm3, %v3416_v30 }
 0x174   : > { %4626 = vmatprep.mubr.msk.bf16.mxu0 %vm479_vm3, %v3418_v63 }
 0x178   : > { %4475 = vmatmul.mubr.msk.bf16.gmra.mrb[32].mxu1 %vm479_vm3, %v1877_v3 }
 0x17b   : > { %4627 = vmatmul.mubr.msk.bf16.gmra.mrb[32].mxu0 %vm479_vm3, %v3420_v50 }
 0x1eb   : > { %v4406_v62 = vpop.f32.mrb[0].mxu1 }
 0x1ec   : > { %v1523_v31 = vpop.f32.mrb[1].mxu1 }
 0x1ed   : > { %v4407_v37 = vpop.f32.mrb[2].mxu1 }
 0x1ee   : > { %v1526_v56 = vpop.f32.mrb[3].mxu1 }
 0x1f3   : > { %v4410_v58 = vpop.f32.mrb[4].mxu1 }
 0x1f4   : > { %v1539_v57 = vpop.f32.mrb[5].mxu1 }
 0x1f5   : > { %v4411_v7 = vpop.f32.mrb[6].mxu1 }
 0x1f6   : > { %v1542_v18 = vpop.f32.mrb[7].mxu1 }
 0x1fb   : > { %v4414_v1 = vpop.f32.mrb[8].mxu1 }
 0x1fc   : > { %v1555_v14 = vpop.f32.mrb[9].mxu1 }
 0x1fd   : > { %v4415_v6 = vpop.f32.mrb[10].mxu1 }
 0x1fe   : > { %v1558_v51 = vpop.f32.mrb[11].mxu1 }
 0x203   : > { %v5897_v26 = vpop.f32.mrb[12].mxu1 }
 0x204   : > { %v5899_v52 = vpop.f32.mrb[13].mxu1 }
 0x205   : > { %v5901_v61 = vpop.f32.mrb[14].mxu1 }
 0x206   : > { %v5903_v9 = vpop.f32.mrb[15].mxu1 }
 0x20b   : > { %v5905_v29 = vpop.f32.mrb[16].mxu1 }
 0x20c   : > { %v5907_v15 = vpop.f32.mrb[17].mxu1 }
 0x20d   : > { %v5914_v0 = vpop.f32.mrb[18].mxu1 }
 0x20e   : > { %v4596_v53 = vpop.f32.mrb[0].mxu0  ;;  %v5916_v23 = vpop.f32.mrb[19].mxu1 }
 0x20f   : > { %v4632_v20 = vadd.f32 %v4596_v53, %v4406_v62  ;;  %v3512_v43 = vpop.f32.mrb[1].mxu0 }
 0x210   : > { %v4633_v16 = vadd.f32 %v3512_v43, %v1523_v31  ;;  %v4597_v21 = vpop.f32.mrb[2].mxu0 }
 0x211   : > { %v3700_v5 = vadd.f32 %v4632_v20, %v5912_v8  ;;  %v4634_v55 = vadd.f32 %v4597_v21, %v4407_v37  ;;  %v3515_v25 = vpop.f32.mrb[3].mxu0 }
 0x212   : > { %v3698_v40 = vadd.f32 %v4633_v16, %v5912_v8  ;;  %v4635_v13 = vadd.f32 %v3515_v25, %v1526_v56 }
 0x213   : > { %v3701_v10 = vadd.f32 %v4634_v55, %v5912_v8  ;;  %v3736_v36 = vmax.f32 %v3700_v5, 0.0 }
 0x214   : > { %v3699_v19 = vadd.f32 %v4635_v13, %v5912_v8  ;;  %v3734_v27 = vmax.f32 %v3698_v40, 0.0 }
 0x215   : > { %v3737_v2 = vmax.f32 %v3701_v10, 0.0 }
 0x216   : > { %v3735_v33 = vmax.f32 %v3699_v19, 0.0  ;;  %v4600_v34 = vpop.f32.mrb[4].mxu0 }
 0x217   : > { %v3771_v42 = vpack.c.bf16 %v3737_v2, %v3736_v36  ;;  %v4636_v17 = vadd.f32 %v4600_v34, %v4410_v58  ;;  %v3528_v49 = vpop.f32.mrb[5].mxu0 }
 0x218   : > { %v3770_v46 = vpack.c.bf16 %v3735_v33, %v3734_v27  ;;  %v4637_v47 = vadd.f32 %v3528_v49, %v1539_v57  ;;  %v4601_v39 = vpop.f32.mrb[6].mxu0 }
 0x219   : > { %3790 = vst.msk [vmem:[%s5926_s14 + $0x8] sm:$0xff] %vm3788_vm9, %v3771_v42  ;;  %v3704_v44 = vadd.f32 %v4636_v17, %v5912_v8  ;;  %v4638_v48 = vadd.f32 %v4601_v39, %v4411_v7  ;;  %v3531_v35 = vpop.f32.mrb[7].mxu0 }
 0x21a   : > { %3789 = vst.msk [vmem:[%s5926_s14] sm:$0xff] %vm3788_vm9, %v3770_v46  ;;  %v3702_v28 = vadd.f32 %v4637_v47, %v5912_v8  ;;  %v4639_v45 = vadd.f32 %v3531_v35, %v1542_v18 }
 0x21b   : > { %v3705_v54 = vadd.f32 %v4638_v48, %v5912_v8  ;;  %v3740_v12 = vmax.f32 %v3704_v44, 0.0 }
 0x21c   : > { %v3703_v22 = vadd.f32 %v4639_v45, %v5912_v8  ;;  %v3738_v41 = vmax.f32 %v3702_v28, 0.0 }
 0x21d   : > { %v3741_v24 = vmax.f32 %v3705_v54, 0.0 }
 0x21e   : > { %v3739_v4 = vmax.f32 %v3703_v22, 0.0  ;;  %v4604_v11 = vpop.f32.mrb[8].mxu0 }
 0x21f   : > { %v3773_v59 = vpack.c.bf16 %v3741_v24, %v3740_v12  ;;  %v4640_v30 = vadd.f32 %v4604_v11, %v4414_v1  ;;  %v3544_v32 = vpop.f32.mrb[9].mxu0 }
 0x220   : > { %v3772_v63 = vpack.c.bf16 %v3739_v4, %v3738_v41  ;;  %v4641_v60 = vadd.f32 %v3544_v32, %v1555_v14  ;;  %v4605_v38 = vpop.f32.mrb[10].mxu0 }
 0x221   : > { %3792 = vst.msk [vmem:[%s5926_s14 + $0x18] sm:$0xff] %vm3788_vm9, %v3773_v59  ;;  %v3708_v3 = vadd.f32 %v4640_v30, %v5912_v8  ;;  %v4642_v50 = vadd.f32 %v4605_v38, %v4415_v6  ;;  %v3547_v62 = vpop.f32.mrb[11].mxu0 }
 0x222   : > { %3791 = vst.msk [vmem:[%s5926_s14 + $0x10] sm:$0xff] %vm3788_vm9, %v3772_v63  ;;  %v3706_v31 = vadd.f32 %v4641_v60, %v5912_v8  ;;  %v4643_v37 = vadd.f32 %v3547_v62, %v1558_v51 }
 0x223   : > { %v3709_v56 = vadd.f32 %v4642_v50, %v5912_v8  ;;  %v3744_v57 = vmax.f32 %v3708_v3, 0.0 }
 0x224   : > { %v3707_v58 = vadd.f32 %v4643_v37, %v5912_v8  ;;  %v3742_v18 = vmax.f32 %v3706_v31, 0.0 }
 0x225   : > { %v3745_v7 = vmax.f32 %v3709_v56, 0.0 }
 0x226   : > { %v3743_v1 = vmax.f32 %v3707_v58, 0.0  ;;  %v4608_v14 = vpop.f32.mrb[12].mxu0 }
 0x227   : > { %v3775_v53 = vpack.c.bf16 %v3745_v7, %v3744_v57  ;;  %v4644_v6 = vadd.f32 %v4608_v14, %v5897_v26  ;;  %v3560_v20 = vpop.f32.mrb[13].mxu0 }
 0x228   : > { %v3774_v43 = vpack.c.bf16 %v3743_v1, %v3742_v18  ;;  %v4645_v16 = vadd.f32 %v3560_v20, %v5899_v52  ;;  %v4609_v21 = vpop.f32.mrb[14].mxu0 }
 0x229   : > { %3794 = vst.msk [vmem:[%s5926_s14 + $0x28] sm:$0xff] %vm3788_vm9, %v3775_v53  ;;  %v3712_v51 = vadd.f32 %v4644_v6, %v5912_v8  ;;  %v4646_v5 = vadd.f32 %v4609_v21, %v5901_v61  ;;  %v3563_v55 = vpop.f32.mrb[15].mxu0 }
 0x22a   : > { %3793 = vst.msk [vmem:[%s5926_s14 + $0x20] sm:$0xff] %vm3788_vm9, %v3774_v43  ;;  %v3710_v25 = vadd.f32 %v4645_v16, %v5912_v8  ;;  %v4647_v40 = vadd.f32 %v3563_v55, %v5903_v9 }
 0x22b   : > { %v3713_v26 = vadd.f32 %v4646_v5, %v5912_v8  ;;  %v3748_v52 = vmax.f32 %v3712_v51, 0.0 }
 0x22c   : > { %v3711_v13 = vadd.f32 %v4647_v40, %v5912_v8  ;;  %v3746_v19 = vmax.f32 %v3710_v25, 0.0 }
 0x22d   : > { %v3749_v10 = vmax.f32 %v3713_v26, 0.0 }
 0x22e   : > { %v3747_v36 = vmax.f32 %v3711_v13, 0.0  ;;  %v4612_v2 = vpop.f32.mrb[16].mxu0 }
 0x22f   : > { %v3777_v27 = vpack.c.bf16 %v3749_v10, %v3748_v52  ;;  %v4648_v61 = vadd.f32 %v4612_v2, %v5905_v29  ;;  %v3576_v33 = vpop.f32.mrb[17].mxu0 }
 0x230   : > { %v3776_v34 = vpack.c.bf16 %v3747_v36, %v3746_v19  ;;  %v4649_v42 = vadd.f32 %v3576_v33, %v5907_v15  ;;  %v4613_v17 = vpop.f32.mrb[18].mxu0 }
 0x231   : > { %3796 = vst.msk [vmem:[%s5926_s14 + $0x38] sm:$0xff] %vm3788_vm9, %v3777_v27  ;;  %v3716_v9 = vadd.f32 %v4648_v61, %v5912_v8  ;;  %v4650_v49 = vadd.f32 %v4613_v17, %v5914_v0  ;;  %v3579_v46 = vpop.f32.mrb[19].mxu0 }
 0x232   : > { %3795 = vst.msk [vmem:[%s5926_s14 + $0x30] sm:$0xff] %vm3788_vm9, %v3776_v34  ;;  %v3714_v47 = vadd.f32 %v4649_v42, %v5912_v8  ;;  %v4651_v39 = vadd.f32 %v3579_v46, %v5916_v23 }
 0x233   : > { %v3717_v29 = vadd.f32 %v4650_v49, %v5912_v8  ;;  %v3752_v15 = vmax.f32 %v3716_v9, 0.0  ;;  %v4464_v35 = vpop.f32.mrb[20].mxu1 }
 0x234   : > { %v3715_v44 = vadd.f32 %v4651_v39, %v5912_v8  ;;  %v3750_v28 = vmax.f32 %v3714_v47, 0.0  ;;  %v2053_v54 = vpop.f32.mrb[21].mxu1 }
 0x235   : > { %v3753_v48 = vmax.f32 %v3717_v29, 0.0  ;;  %v4465_v12 = vpop.f32.mrb[22].mxu1 }
 0x236   : > { %v3751_v45 = vmax.f32 %v3715_v44, 0.0  ;;  %v4616_v0 = vpop.f32.mrb[20].mxu0  ;;  %v2056_v11 = vpop.f32.mrb[23].mxu1 }
 0x237   : > { %v3779_v22 = vpack.c.bf16 %v3753_v48, %v3752_v15  ;;  %v4652_v24 = vadd.f32 %v4616_v0, %v4464_v35  ;;  %v3592_v41 = vpop.f32.mrb[21].mxu0 }
 0x238   : > { %v3778_v4 = vpack.c.bf16 %v3751_v45, %v3750_v28  ;;  %v4653_v23 = vadd.f32 %v3592_v41, %v2053_v54  ;;  %v4617_v59 = vpop.f32.mrb[22].mxu0 }
 0x239   : > { %3798 = vst.msk [vmem:[%s5926_s14 + $0x48] sm:$0xff] %vm3788_vm9, %v3779_v22  ;;  %v3720_v30 = vadd.f32 %v4652_v24, %v5912_v8  ;;  %v4654_v32 = vadd.f32 %v4617_v59, %v4465_v12  ;;  %v3595_v63 = vpop.f32.mrb[23].mxu0 }
 0x23a   : > { %3797 = vst.msk [vmem:[%s5926_s14 + $0x40] sm:$0xff] %vm3788_vm9, %v3778_v4  ;;  %v3718_v60 = vadd.f32 %v4653_v23, %v5912_v8  ;;  %v4655_v38 = vadd.f32 %v3595_v63, %v2056_v11 }
 0x23b   : > { %v3721_v3 = vadd.f32 %v4654_v32, %v5912_v8  ;;  %v3756_v62 = vmax.f32 %v3720_v30, 0.0  ;;  %v4468_v37 = vpop.f32.mrb[24].mxu1 }
 0x23c   : > { %v3719_v50 = vadd.f32 %v4655_v38, %v5912_v8  ;;  %v3754_v56 = vmax.f32 %v3718_v60, 0.0  ;;  %v2069_v57 = vpop.f32.mrb[25].mxu1 }
 0x23d   : > { %v3757_v31 = vmax.f32 %v3721_v3, 0.0  ;;  %v4469_v1 = vpop.f32.mrb[26].mxu1 }
 0x23e   : > { %v3755_v58 = vmax.f32 %v3719_v50, 0.0  ;;  %v4620_v7 = vpop.f32.mrb[24].mxu0  ;;  %v2072_v20 = vpop.f32.mrb[27].mxu1 }
 0x23f   : > { %v3781_v18 = vpack.c.bf16 %v3757_v31, %v3756_v62  ;;  %v4656_v14 = vadd.f32 %v4620_v7, %v4468_v37  ;;  %v3608_v53 = vpop.f32.mrb[25].mxu0 }
 0x240   : > { %v3780_v6 = vpack.c.bf16 %v3755_v58, %v3754_v56  ;;  %v4657_v43 = vadd.f32 %v3608_v53, %v2069_v57  ;;  %v4621_v16 = vpop.f32.mrb[26].mxu0 }
 0x241   : > { %3800 = vst.msk [vmem:[%s5926_s14 + $0x58] sm:$0xff] %vm3788_vm9, %v3781_v18  ;;  %v3724_v21 = vadd.f32 %v4656_v14, %v5912_v8  ;;  %v4658_v51 = vadd.f32 %v4621_v16, %v4469_v1  ;;  %v3611_v5 = vpop.f32.mrb[27].mxu0 }
 0x242   : > { %3799 = vst.msk [vmem:[%s5926_s14 + $0x50] sm:$0xff] %vm3788_vm9, %v3780_v6  ;;  %v3722_v55 = vadd.f32 %v4657_v43, %v5912_v8  ;;  %v4659_v25 = vadd.f32 %v3611_v5, %v2072_v20 }
 0x243   : > { %v3725_v40 = vadd.f32 %v4658_v51, %v5912_v8  ;;  %v3760_v13 = vmax.f32 %v3724_v21, 0.0  ;;  %v4472_v10 = vpop.f32.mrb[28].mxu1 }
 0x244   : > { %v3723_v26 = vadd.f32 %v4659_v25, %v5912_v8  ;;  %v3758_v19 = vmax.f32 %v3722_v55, 0.0  ;;  %v2085_v2 = vpop.f32.mrb[29].mxu1 }
 0x245   : > { %v3761_v52 = vmax.f32 %v3725_v40, 0.0  ;;  %v4473_v33 = vpop.f32.mrb[30].mxu1 }
 0x246   : > { %v3759_v36 = vmax.f32 %v3723_v26, 0.0  ;;  %v4624_v27 = vpop.f32.mrb[28].mxu0  ;;  %v2088_v9 = vpop.f32.mrb[31].mxu1 }
 0x247   : > { %v3783_v61 = vpack.c.bf16 %v3761_v52, %v3760_v13  ;;  %v4660_v34 = vadd.f32 %v4624_v27, %v4472_v10  ;;  %v3624_v42 = vpop.f32.mrb[29].mxu0 }
 0x248   : > { %v3782_v17 = vpack.c.bf16 %v3759_v36, %v3758_v19  ;;  %v4661_v49 = vadd.f32 %v3624_v42, %v2085_v2  ;;  %v4625_v46 = vpop.f32.mrb[30].mxu0 }
 0x249   : > { %3802 = vst.msk [vmem:[%s5926_s14 + $0x68] sm:$0xff] %vm3788_vm9, %v3783_v61  ;;  %v3728_v47 = vadd.f32 %v4660_v34, %v5912_v8  ;;  %v4662_v39 = vadd.f32 %v4625_v46, %v4473_v33  ;;  %v3627_v29 = vpop.f32.mrb[31].mxu0 }
 0x24a   : > { %3801 = vst.msk [vmem:[%s5926_s14 + $0x60] sm:$0xff] %vm3788_vm9, %v3782_v17  ;;  %v3726_v44 = vadd.f32 %v4661_v49, %v5912_v8  ;;  %v4663_v15 = vadd.f32 %v3627_v29, %v2088_v9 }
 0x24b   : > { %v3729_v48 = vadd.f32 %v4662_v39, %v5912_v8  ;;  %v3764_v28 = vmax.f32 %v3728_v47, 0.0  ;;  %v4476_v54 = vpop.f32.mrb[32].mxu1 }
 0x24c   : > { %v3727_v35 = vadd.f32 %v4663_v15, %v5912_v8  ;;  %v3762_v0 = vmax.f32 %v3726_v44, 0.0  ;;  %v2101_v12 = vpop.f32.mrb[33].mxu1 }
 0x24d   : > { %v3765_v45 = vmax.f32 %v3729_v48, 0.0  ;;  %v4477_v4 = vpop.f32.mrb[34].mxu1 }
 0x24e   : > { %v3763_v22 = vmax.f32 %v3727_v35, 0.0  ;;  %v4628_v24 = vpop.f32.mrb[32].mxu0  ;;  %v2104_v30 = vpop.f32.mrb[35].mxu1 }
 0x24f   : > { %v3785_v41 = vpack.c.bf16 %v3765_v45, %v3764_v28  ;;  %v4664_v11 = vadd.f32 %v4628_v24, %v4476_v54  ;;  %v3640_v23 = vpop.f32.mrb[33].mxu0 }
 0x250   : > { %v3784_v59 = vpack.c.bf16 %v3763_v22, %v3762_v0  ;;  %v4665_v32 = vadd.f32 %v3640_v23, %v2101_v12  ;;  %v4629_v63 = vpop.f32.mrb[34].mxu0 }
 0x251   : > { %3804 = vst.msk [vmem:[%s5926_s14 + $0x78] sm:$0xff] %vm3788_vm9, %v3785_v41  ;;  %v3732_v60 = vadd.f32 %v4664_v11, %v5912_v8  ;;  %v4666_v38 = vadd.f32 %v4629_v63, %v4477_v4  ;;  %v3643_v3 = vpop.f32.mrb[35].mxu0 }
 0x252   : > { %3803 = vst.msk [vmem:[%s5926_s14 + $0x70] sm:$0xff] %vm3788_vm9, %v3784_v59  ;;  %v3730_v50 = vadd.f32 %v4665_v32, %v5912_v8  ;;  %v4667_v62 = vadd.f32 %v3643_v3, %v2104_v30 }
 0x253   : > { %v3733_v31 = vadd.f32 %v4666_v38, %v5912_v8  ;;  %v3768_v56 = vmax.f32 %v3732_v60, 0.0 }
 0x254   : > { %v3731_v37 = vadd.f32 %v4667_v62, %v5912_v8  ;;  %v3766_v57 = vmax.f32 %v3730_v50, 0.0 }
 0x255   : > { %v3769_v58 = vmax.f32 %v3733_v31, 0.0 }
 0x256   : > { %v3767_v7 = vmax.f32 %v3731_v37, 0.0 }
 0x257   : > { %v3787_v18 = vpack.c.bf16 %v3769_v58, %v3768_v56 }
 0x258   : > { %v3786_v1 = vpack.c.bf16 %v3767_v7, %v3766_v57 }
 0x259   : > { %3806 = vst.msk [vmem:[%s5926_s14 + $0x88] sm:$0xff] %vm3788_vm9, %v3787_v18 }
 0x25a   : > { %3805 = vst.msk [vmem:[%s5926_s14 + $0x80] sm:$0xff] %vm3788_vm9, %v3786_v1 }
 0x25b PF: > { %s14_s12 = sadd.s32 1, %s5061_s12  }
 0x25c   : > { %p11_p3 = scmp.ge.s32.totalorder %s14_s12, 4  }
 0x25e   :  { %13 = sbr.rel (!%p11_p3) target bundleno = 1 (0x1), region = 67 }
 0x265   :  { %3828 = vsyncpa [#allocation3], 1 }
 0x266   :  { %3830 = vsyncpa [#allocation3 + $0x1], 1 }

// kernel: frcnn_forward.5
= control target key start
LH: loop header
LB: loop body
LE: loop exit
PB: predicated region body
PF: predicated region fallthrough
CT: control target
= control target key end

     0   :  { %vm598_vm0 = vcmask 130048   ;;  %vm922_vm1 = vcmask 523264   ;;  %vm1128_vm2 = vcmask 203776   ;;  %s1897_s1 = inlined_call_operand.vmem [shape: bf16[784,64], index: 1, kind: input, shape index: {}]   ;;  %s1898_s0 = inlined_call_operand.vmem [shape: bf16[64,784], index: 0, kind: input, shape index: {}]   ;;  %s1899_s3 = inlined_call_operand.vmem [shape: bf16[64,64], index: 3, kind: input, shape index: {}]   ;;  %s1900_s5 = inlined_call_operand.vmem [shape: bf16[64,25], index: 5, kind: input, shape index: {}]   ;;  %s1901_s2 = inlined_call_operand.vmem [shape: f32[1,64], index: 2, kind: input, shape index: {}, may-alias: {2,4}]   ;;  %s1902_s4 = inlined_call_operand.vmem [shape: f32[1,64], index: 4, kind: input, shape index: {}, may-alias: {2,4}]   ;;  %s1903_s6 = inlined_call_operand.vmem [shape: f32[1,25], index: 6, kind: input, shape index: {}]   ;;  %s1904_s7 = inlined_call_operand.vmem [shape: f32[64,25], index: 7, kind: output, shape index: {}]  }
   0x1   :  { %v1440_v0 = vld [vmem:[%s1897_s1 + $0x40] sm:$0xff]   ;;  %v1444_v4 = vld [vmem:[%s1897_s1 + $0x48] sm:$0xff]   ;;  %v1448_v8 = vld [vmem:[%s1897_s1 + $0x50] sm:$0xff]  }
   0x2   :  { %v1441_v1 = vld [vmem:[%s1897_s1 + $0xc0] sm:$0xff]   ;;  %1241 = vmatprep.subr.bf16.mxu0 %v1440_v0  ;;  %v1445_v5 = vld [vmem:[%s1897_s1 + $0xc8] sm:$0xff]   ;;  %v1449_v9 = vld [vmem:[%s1897_s1 + $0xd0] sm:$0xff]  }
   0x3   :  { %v1442_v2 = vld [vmem:[%s1897_s1] sm:$0xff]   ;;  %1281 = vmatprep.subr.bf16.mxu1 %v1441_v1  ;;  %v1446_v6 = vld [vmem:[%s1897_s1 + $0x8] sm:$0xff]   ;;  %v1450_v10 = vld [vmem:[%s1897_s1 + $0x10] sm:$0xff]  }
   0x4   :  { %v1443_v3 = vld [vmem:[%s1897_s1 + $0x80] sm:$0xff]   ;;  %1242 = vmatpush3.bf16.msra.mxu0 %v1442_v2  ;;  %v1447_v7 = vld [vmem:[%s1897_s1 + $0x88] sm:$0xff]   ;;  %v1451_v11 = vld [vmem:[%s1897_s1 + $0x90] sm:$0xff]  }
   0x5   :  { %1282 = vmatpush3.bf16.msra.mxu1 %v1443_v3  ;;  %1243 = vmatprep.subr.bf16.mxu0 %v1444_v4  ;;  %v1452_v12 = vld [vmem:[%s1897_s1 + $0x58] sm:$0xff]   ;;  %v1456_v16 = vld [vmem:[%s1897_s1 + $0x60] sm:$0xff]   ;;  %v1460_v20 = vld [vmem:[%s1897_s1 + $0x68] sm:$0xff]  }
   0x6   :  { %1283 = vmatprep.subr.bf16.mxu1 %v1445_v5  ;;  %v1453_v13 = vld [vmem:[%s1897_s1 + $0xd8] sm:$0xff]   ;;  %v1457_v17 = vld [vmem:[%s1897_s1 + $0xe0] sm:$0xff]   ;;  %v1461_v21 = vld [vmem:[%s1897_s1 + $0xe8] sm:$0xff]  }
   0x7   :  { %v1454_v14 = vld [vmem:[%s1897_s1 + $0x18] sm:$0xff]   ;;  %v1458_v18 = vld [vmem:[%s1897_s1 + $0x20] sm:$0xff]   ;;  %v1462_v22 = vld [vmem:[%s1897_s1 + $0x28] sm:$0xff]  }
   0x8   :  { %1244 = vmatpush3.bf16.msra.mxu0 %v1446_v6  ;;  %v1455_v15 = vld [vmem:[%s1897_s1 + $0x98] sm:$0xff]   ;;  %v1459_v19 = vld [vmem:[%s1897_s1 + $0xa0] sm:$0xff]   ;;  %v1463_v23 = vld [vmem:[%s1897_s1 + $0xa8] sm:$0xff]  }
   0x9   :  { %1284 = vmatpush3.bf16.msra.mxu1 %v1447_v7  ;;  %1245 = vmatprep.subr.bf16.mxu0 %v1448_v8  ;;  %v1464_v24 = vld [vmem:[%s1897_s1 + $0x70] sm:$0xff]   ;;  %v1468_v28 = vld [vmem:[%s1897_s1 + $0x78] sm:$0xff]   ;;  %v1474_v33 = vld [vmem:[%s1898_s0 + $0x4] ss:$28 sps:$4 sm:$0xff]  }
   0xa   :  { %1285 = vmatprep.subr.bf16.mxu1 %v1449_v9  ;;  %v1465_v25 = vld [vmem:[%s1897_s1 + $0xf0] sm:$0xff]   ;;  %v1469_v29 = vld [vmem:[%s1897_s1 + $0xf8] sm:$0xff]   ;;  %v1475_v34 = vld [vmem:[%s1898_s0 + $0x8] ss:$28 sps:$4 sm:$0xff]   ;;  %643 = vmatprep.mubr.bf16.mxu0 %v1474_v33 }
   0xb   :  { %v1466_v26 = vld [vmem:[%s1897_s1 + $0x30] sm:$0xff]   ;;  %v1470_v30 = vld [vmem:[%s1897_s1 + $0x38] sm:$0xff]   ;;  %v1477_v35 = vld [vmem:[%s1898_s0 + $0xc] ss:$28 sps:$4 sm:$0xff]  }
   0xc   :  { %1246 = vmatpush3.bf16.msra.mxu0 %v1450_v10  ;;  %v1467_v27 = vld [vmem:[%s1897_s1 + $0xb0] sm:$0xff]   ;;  %v1471_v31 = vld [vmem:[%s1897_s1 + $0xb8] sm:$0xff]   ;;  %v1478_v36 = vld [vmem:[%s1897_s1 + $0x140] sm:$0xff]   ;;  %708 = vmatprep.mubr.bf16.mxu1 %v1477_v35 }
   0xd   :  { %1286 = vmatpush3.bf16.msra.mxu1 %v1451_v11  ;;  %1247 = vmatprep.subr.bf16.mxu0 %v1452_v12  ;;  %v1472_v32 = vld [vmem:[%s1898_s0] ss:$28 sps:$4 sm:$0xff]   ;;  %v1480_v38 = vld [vmem:[%s1897_s1 + $0x148] sm:$0xff]   ;;  %v1486_v42 = vld [vmem:[%s1898_s0 + $0x38] ss:$28 sps:$4 sm:$0xff]  }
   0xe   :  { %1287 = vmatprep.subr.bf16.mxu1 %v1453_v13  ;;  %v1479_v37 = vld [vmem:[%s1897_s1 + $0x100] sm:$0xff]   ;;  %v1481_v39 = vld [vmem:[%s1897_s1 + $0x108] sm:$0xff]   ;;  %v1482_v40 = vld [vmem:[%s1898_s0 + $0x3c] ss:$28 sps:$4 sm:$0xff]  }
   0xf   :  { %v1484_v41 = vld [vmem:[%s1898_s0 + $0x44] ss:$28 sps:$4 sm:$0xff]   ;;  %v1488_v44 = vld [vmem:[%s1897_s1 + $0x150] sm:$0xff]   ;;  %v1490_v46 = vld [vmem:[%s1897_s1 + $0x158] sm:$0xff]  }
  0x10   :  { %1248 = vmatpush3.bf16.msra.mxu0 %v1454_v14  ;;  %v1487_v43 = vld [vmem:[%s1898_s0 + $0x40] ss:$28 sps:$4 sm:$0xff]   ;;  %v1489_v45 = vld [vmem:[%s1897_s1 + $0x110] sm:$0xff]   ;;  %v1500_v54 = vld [vmem:[%s1897_s1 + $0x168] sm:$0xff]  }
  0x11   :  { %1288 = vmatpush3.bf16.msra.mxu1 %v1455_v15  ;;  %1249 = vmatprep.subr.bf16.mxu0 %v1456_v16  ;;  %v1491_v47 = vld [vmem:[%s1897_s1 + $0x118] sm:$0xff]   ;;  %v1492_v48 = vld [vmem:[%s1898_s0 + $0x74] ss:$28 sps:$4 sm:$0xff]   ;;  %v1498_v51 = vld [vmem:[%s1897_s1 + $0x160] sm:$0xff]  }
  0x12   :  { %1289 = vmatprep.subr.bf16.mxu1 %v1457_v17  ;;  %v1494_v49 = vld [vmem:[%s1898_s0 + $0x7c] ss:$28 sps:$4 sm:$0xff]   ;;  %v1496_v50 = vld [vmem:[%s1898_s0 + $0x70] ss:$28 sps:$4 sm:$0xff]   ;;  %v1499_v53 = vld [vmem:[%s1897_s1 + $0x120] sm:$0xff]  }
  0x13   :  { %v1497_v52 = vld [vmem:[%s1898_s0 + $0x78] ss:$28 sps:$4 sm:$0xff]   ;;  %v1502_v55 = vld [vmem:[%s1898_s0 + $0xac] ss:$28 sps:$4 sm:$0xff]   ;;  %v1518_v3 = vld [vmem:[%s1897_s1 + $0x180] sm:$0xff]  }
  0x14   :  { %1250 = vmatpush3.bf16.msra.mxu0 %v1458_v18  ;;  %v1504_v56 = vld [vmem:[%s1898_s0 + $0xb4] ss:$28 sps:$4 sm:$0xff]   ;;  %v1501_v57 = vld [vmem:[%s1897_s1 + $0x128] sm:$0xff]   ;;  %v1510_v62 = vld [vmem:[%s1897_s1 + $0x178] sm:$0xff]  }
  0x15   :  { %1290 = vmatpush3.bf16.msra.mxu1 %v1459_v19  ;;  %1251 = vmatprep.subr.bf16.mxu0 %v1460_v20  ;;  %v1508_v58 = vld [vmem:[%s1897_s1 + $0x170] sm:$0xff]   ;;  %v1506_v59 = vld [vmem:[%s1898_s0 + $0xa8] ss:$28 sps:$4 sm:$0xff]   ;;  %v1517_v0 = vld [vmem:[%s1898_s0 + $0xbc] ss:$28 sps:$4 sm:$0xff]  }
  0x16   :  { %1291 = vmatprep.subr.bf16.mxu1 %v1461_v21  ;;  %v1507_v60 = vld [vmem:[%s1898_s0 + $0xb0] ss:$28 sps:$4 sm:$0xff]   ;;  %v1511_v1 = vld [vmem:[%s1897_s1 + $0x138] sm:$0xff]   ;;  %v1522_v7 = vld [vmem:[%s1898_s0 + $0x48] ss:$28 sps:$4 sm:$0xff]  }
  0x17   :  { %v1509_v61 = vld [vmem:[%s1897_s1 + $0x130] sm:$0xff]   ;;  %v1519_v5 = vld [vmem:[%s1898_s0 + $0x4c] ss:$28 sps:$4 sm:$0xff]   ;;  %v1524_v9 = vld [vmem:[%s1898_s0 + $0x84] ss:$28 sps:$4 sm:$0xff]  }
  0x18   :  { %1252 = vmatpush3.bf16.msra.mxu0 %v1462_v22  ;;  %v1514_v63 = vld [vmem:[%s1898_s0 + $0x14] ss:$28 sps:$4 sm:$0xff]   ;;  %v1526_v10 = vld [vmem:[%s1898_s0 + $0x88] ss:$28 sps:$4 sm:$0xff]   ;;  %v1527_v11 = vld [vmem:[%s1898_s0 + $0x80] ss:$28 sps:$4 sm:$0xff]  }
  0x19   :  { %1292 = vmatpush3.bf16.msra.mxu1 %v1463_v23  ;;  %1253 = vmatprep.subr.bf16.mxu0 %v1464_v24  ;;  %v1512_v2 = vld [vmem:[%s1898_s0 + $0x10] ss:$28 sps:$4 sm:$0xff]   ;;  %v1515_v4 = vld [vmem:[%s1898_s0 + $0xb8] ss:$28 sps:$4 sm:$0xff]   ;;  %v1528_v12 = vld [vmem:[%s1898_s0 + $0xc0] ss:$28 sps:$4 sm:$0xff]  }
  0x1a   :  { %1293 = vmatprep.subr.bf16.mxu1 %v1465_v25  ;;  %v1521_v6 = vld [vmem:[%s1898_s0 + $0x18] ss:$28 sps:$4 sm:$0xff]   ;;  %v1523_v8 = vld [vmem:[%s1898_s0 + $0x50] ss:$28 sps:$4 sm:$0xff]   ;;  %v1529_v13 = vld [vmem:[%s1899_s3] sm:$0xff]  }
  0x1b   :  { %v1530_v14 = vld [vmem:[%s1899_s3 + $0x8] sm:$0xff]   ;;  %v1531_v15 = vld [vmem:[%s1899_s3 + $0x10] sm:$0xff]   ;;  %v1532_v16 = vld [vmem:[%s1899_s3 + $0x18] sm:$0xff]  }
  0x1c   :  { %1254 = vmatpush3.bf16.msra.mxu0 %v1466_v26  ;;  %v1533_v17 = vld [vmem:[%s1900_s5] sm:$0xff]   ;;  %v1534_v18 = vld [vmem:[%s1900_s5 + $0x8] sm:$0xff]  }
  0x1d   :  { %1294 = vmatpush3.bf16.msra.mxu1 %v1467_v27  ;;  %1255 = vmatprep.subr.bf16.mxu0 %v1468_v28  ;;  %v1141_v20 = vld [vmem:[%s1901_s2] ss:$0 sm:$0xff] }
  0x1e   :  { %1295 = vmatprep.subr.bf16.mxu1 %v1469_v29 }
  0x20   :  { %1256 = vmatpush3.bf16.msra.mxu0 %v1470_v30 }
  0x21   :  { %1296 = vmatpush3.bf16.msra.mxu1 %v1471_v31  ;;  %1321 = vmatprep.subr.bf16.mxu0 %v1478_v36 }
  0x22   :  { %1424 = vmatprep.subr.bf16.mxu1 %v1478_v36 }
  0x23   :  { %644 = vmatmul.mubr.bf16.vlgmr.msra.gmra.mrb[0].mxu0 %v1472_v32 }
  0x24   :  { %709 = vmatmul.mubr.bf16.vlgmr.msra.gmra.mrb[0].mxu1 %v1475_v34  ;;  %1322 = vmatpush3.bf16.msra.mxu0 %v1479_v37 }
  0x25   :  { %1432 = vmatpush3.bf16.msra.mxu1 %v1479_v37  ;;  %1323 = vmatprep.subr.bf16.mxu0 %v1480_v38 }
  0x26   :  { %1425 = vmatprep.subr.bf16.mxu1 %v1480_v38  ;;  %651 = vmatprep.mubr.bf16.mxu0 %v1482_v40 }
  0x27   :  { %716 = vmatprep.mubr.bf16.mxu1 %v1484_v41 }
  0x28   :  { %1324 = vmatpush3.bf16.msra.mxu0 %v1481_v39 }
  0x29   :  { %1433 = vmatpush3.bf16.msra.mxu1 %v1481_v39  ;;  %1325 = vmatprep.subr.bf16.mxu0 %v1488_v44 }
  0x2a   :  { %1426 = vmatprep.subr.bf16.mxu1 %v1488_v44 }
  0x2b   :  { %652 = vmatmul.mubr.bf16.gmra.mrb[4].mxu0 %v1486_v42 }
  0x2c   :  { %717 = vmatmul.mubr.bf16.gmra.mrb[4].mxu1 %v1487_v43  ;;  %1326 = vmatpush3.bf16.msra.mxu0 %v1489_v45 }
  0x2d   :  { %1434 = vmatpush3.bf16.msra.mxu1 %v1489_v45  ;;  %1327 = vmatprep.subr.bf16.mxu0 %v1490_v46 }
  0x2e   :  { %1427 = vmatprep.subr.bf16.mxu1 %v1490_v46  ;;  %659 = vmatprep.mubr.bf16.mxu0 %v1492_v48 }
  0x2f   :  { %724 = vmatprep.mubr.bf16.mxu1 %v1494_v49 }
  0x30   :  { %1328 = vmatpush3.bf16.msra.mxu0 %v1491_v47 }
  0x31   :  { %1435 = vmatpush3.bf16.msra.mxu1 %v1491_v47  ;;  %1329 = vmatprep.subr.bf16.mxu0 %v1498_v51 }
  0x32   :  { %1428 = vmatprep.subr.bf16.mxu1 %v1498_v51 }
  0x33   :  { %660 = vmatmul.mubr.bf16.gmra.mrb[8].mxu0 %v1496_v50 }
  0x34   :  { %725 = vmatmul.mubr.bf16.gmra.mrb[8].mxu1 %v1497_v52  ;;  %1330 = vmatpush3.bf16.msra.mxu0 %v1499_v53 }
  0x35   :  { %667 = vmatprep.mubr.bf16.mxu0 %v1502_v55  ;;  %1436 = vmatpush3.bf16.msra.mxu1 %v1499_v53 }
  0x36   :  { %1331 = vmatprep.subr.bf16.mxu0 %v1500_v54  ;;  %1429 = vmatprep.subr.bf16.mxu1 %v1500_v54 }
  0x37   :  { %732 = vmatprep.mubr.bf16.mxu1 %v1504_v56 }
  0x38   :  { %1332 = vmatpush3.bf16.msra.mxu0 %v1501_v57 }
  0x39   :  { %1437 = vmatpush3.bf16.msra.mxu1 %v1501_v57  ;;  %1333 = vmatprep.subr.bf16.mxu0 %v1508_v58 }
  0x3a   :  { %1430 = vmatprep.subr.bf16.mxu1 %v1508_v58 }
  0x3b   :  { %668 = vmatmul.mubr.bf16.gmra.mrb[12].mxu0 %v1506_v59 }
  0x3c   :  { %733 = vmatmul.mubr.bf16.gmra.mrb[12].mxu1 %v1507_v60  ;;  %773 = vmatprep.mubr.bf16.mxu0 %v1514_v63 }
  0x3d   :  { %1334 = vmatpush3.bf16.msra.mxu0 %v1509_v61  ;;  %1438 = vmatpush3.bf16.msra.mxu1 %v1509_v61 }
  0x3e   :  { %1335 = vmatprep.subr.bf16.mxu0 %v1510_v62  ;;  %1431 = vmatprep.subr.bf16.mxu1 %v1510_v62 }
  0x3f   :  { %797 = vmatprep.mubr.bf16.mxu1 %v1517_v0 }
  0x41   :  { %1336 = vmatpush3.bf16.msra.mxu0 %v1511_v1  ;;  %1439 = vmatpush3.bf16.msra.mxu1 %v1511_v1 }
  0x42   :  { %1382 = vmatprep.subr.bf16.mxu1 %v1518_v3  ;;  %1408 = vmatprep.subr.bf16.mxu0 %v1533_v17 }
  0x44   :  { %774 = vmatmul.mubr.bf16.vlgmr.msra.gmra.mrb[16].mxu0 %v1512_v2  ;;  %798 = vmatmul.mubr.bf16.vlgmr.msra.gmra.mrb[16].mxu1 %v1515_v4 }
  0x45   :  { %781 = vmatprep.mubr.bf16.mxu0 %v1519_v5  ;;  %1383 = vmatpush3.bf16.msra.mxu1 %v1518_v3 }
  0x46   :  { %1384 = vmatprep.mubr.msk.bf16.mxu1 %vm598_vm0, %v1521_v6  ;;  %1392 = vmatprep.subr.bf16.mxu1 %v1529_v13 }
  0x47   :  { %1409 = vmatpush3.bf16.msra.mxu0 %v1533_v17 }
  0x48   :  { %1410 = vmatprep.subr.bf16.mxu0 %v1534_v18 }
  0x4b   :  { %1411 = vmatpush3.bf16.msra.mxu0 %v1534_v18 }
  0x4c   :  { %782 = vmatmul.mubr.bf16.gmra.mrb[20].mxu0 %v1522_v7  ;;  %1385 = vmatmul.mubr.msk.bf16.vlgmr.msra.gmra.mrb[20].mxu1 %vm598_vm0, %v1523_v8 }
  0x4d   :  { %789 = vmatprep.mubr.bf16.mxu0 %v1524_v9  ;;  %1388 = vmatprep.mubr.msk.bf16.mxu1 %vm598_vm0, %v1526_v10 }
  0x4e   :  { %1393 = vmatpush3.bf16.msra.mxu1 %v1529_v13 }
  0x4f   :  { %1394 = vmatprep.subr.bf16.mxu1 %v1530_v14 }
  0x52   :  { %1395 = vmatpush3.bf16.msra.mxu1 %v1530_v14 }
  0x53   :  { %1396 = vmatprep.subr.bf16.mxu1 %v1531_v15 }
  0x54   :  { %790 = vmatmul.mubr.bf16.gmra.mrb[24].mxu0 %v1527_v11  ;;  %1389 = vmatmul.mubr.msk.bf16.gmra.mrb[24].mxu1 %vm598_vm0, %v1528_v12 }
  0x56   :  { %1397 = vmatpush3.bf16.msra.mxu1 %v1531_v15 }
  0x57   :  { %1398 = vmatprep.subr.bf16.mxu1 %v1532_v16 }
  0x5a   :  { %1399 = vmatpush3.bf16.msra.mxu1 %v1532_v16 }
  0xf6   :  { %v1257_v19 = vpop.f32.mrb[0].mxu0 }
  0xf7   :  { %v1258_v21 = vpop.f32.mrb[1].mxu0  ;;  %v1297_v22 = vpop.f32.mrb[0].mxu1 }
  0xf8   :  { %v1259_v23 = vadd.f32 %v1258_v21, %v1257_v19  ;;  %v1260_v24 = vpop.f32.mrb[2].mxu0  ;;  %v1298_v25 = vpop.f32.mrb[1].mxu1 }
  0xf9   :  { %v1261_v26 = vpop.f32.mrb[3].mxu0  ;;  %v1299_v27 = vadd.f32 %v1298_v25, %v1297_v22  ;;  %v1300_v28 = vpop.f32.mrb[2].mxu1 }
  0xfa   :  { %v646_v29 = vadd.f32 %v1259_v23, %v1141_v20  ;;  %v1262_v30 = vadd.f32 %v1261_v26, %v1260_v24  ;;  %v1301_v31 = vpop.f32.mrb[3].mxu1 }
  0xfb   :  { %v1302_v32 = vadd.f32 %v1301_v31, %v1300_v28 }
  0xfc   :  { %v649_v33 = vadd.f32 %v1262_v30, %v1141_v20  ;;  %v711_v34 = vadd.f32 %v1299_v27, %v646_v29 }
  0xfe   :  { %v1833_v35 = vadd.f32 %v1302_v32, %v649_v33  ;;  %v1263_v36 = vpop.f32.mrb[4].mxu0 }
  0xff   :  { %v1264_v37 = vpop.f32.mrb[5].mxu0  ;;  %v1303_v38 = vpop.f32.mrb[4].mxu1 }
 0x100   :  { %v1265_v39 = vadd.f32 %v1264_v37, %v1263_v36  ;;  %v1266_v40 = vpop.f32.mrb[6].mxu0  ;;  %v1304_v41 = vpop.f32.mrb[5].mxu1 }
 0x101   :  { %v1267_v42 = vpop.f32.mrb[7].mxu0  ;;  %v1305_v43 = vadd.f32 %v1304_v41, %v1303_v38  ;;  %v1306_v44 = vpop.f32.mrb[6].mxu1 }
 0x102   :  { %v654_v45 = vadd.f32 %v1265_v39, %v1141_v20  ;;  %v1268_v46 = vadd.f32 %v1267_v42, %v1266_v40  ;;  %v1307_v47 = vpop.f32.mrb[7].mxu1 }
 0x103   :  { %v1308_v48 = vadd.f32 %v1307_v47, %v1306_v44 }
 0x104   :  { %v657_v49 = vadd.f32 %v1268_v46, %v1141_v20  ;;  %v719_v50 = vadd.f32 %v1305_v43, %v654_v45 }
 0x106   :  { %v1835_v51 = vadd.f32 %v1308_v48, %v657_v49  ;;  %v1269_v52 = vpop.f32.mrb[8].mxu0 }
 0x107   :  { %v1270_v53 = vpop.f32.mrb[9].mxu0  ;;  %v1309_v54 = vpop.f32.mrb[8].mxu1 }
 0x108   :  { %v1271_v55 = vadd.f32 %v1270_v53, %v1269_v52  ;;  %v1272_v56 = vpop.f32.mrb[10].mxu0  ;;  %v1310_v57 = vpop.f32.mrb[9].mxu1 }
 0x109   :  { %v1273_v58 = vpop.f32.mrb[11].mxu0  ;;  %v1311_v59 = vadd.f32 %v1310_v57, %v1309_v54  ;;  %v1312_v60 = vpop.f32.mrb[10].mxu1 }
 0x10a   :  { %v662_v61 = vadd.f32 %v1271_v55, %v1141_v20  ;;  %v1274_v62 = vadd.f32 %v1273_v58, %v1272_v56  ;;  %v1313_v63 = vpop.f32.mrb[11].mxu1 }
 0x10b   :  { %v1314_v0 = vadd.f32 %v1313_v63, %v1312_v60 }
 0x10c   :  { %v665_v1 = vadd.f32 %v1274_v62, %v1141_v20  ;;  %v1837_v2 = vadd.f32 %v1311_v59, %v662_v61 }
 0x10e   :  { %v1839_v3 = vadd.f32 %v1314_v0, %v665_v1  ;;  %v1275_v4 = vpop.f32.mrb[12].mxu0 }
 0x10f   :  { %v1276_v5 = vpop.f32.mrb[13].mxu0  ;;  %v1315_v6 = vpop.f32.mrb[12].mxu1 }
 0x110   :  { %v1277_v7 = vadd.f32 %v1276_v5, %v1275_v4  ;;  %v1278_v8 = vpop.f32.mrb[14].mxu0  ;;  %v1316_v9 = vpop.f32.mrb[13].mxu1 }
 0x111   :  { %v1279_v10 = vpop.f32.mrb[15].mxu0  ;;  %v1317_v11 = vadd.f32 %v1316_v9, %v1315_v6  ;;  %v1318_v12 = vpop.f32.mrb[14].mxu1 }
 0x112   :  { %v670_v13 = vadd.f32 %v1277_v7, %v1141_v20  ;;  %v1280_v14 = vadd.f32 %v1279_v10, %v1278_v8  ;;  %v1319_v15 = vpop.f32.mrb[15].mxu1 }
 0x113   :  { %v1320_v16 = vadd.f32 %v1319_v15, %v1318_v12 }
 0x114   :  { %v673_v17 = vadd.f32 %v1280_v14, %v1141_v20  ;;  %v735_v18 = vadd.f32 %v1317_v11, %v670_v13 }
 0x116   :  { %v738_v19 = vadd.f32 %v1320_v16, %v673_v17 }
 0x117   :  { %v1337_v21 = vpop.f32.mrb[16].mxu0  ;;  %v1355_v22 = vpop.f32.mrb[16].mxu1 }
 0x118   :  { %v1338_v23 = vpop.f32.mrb[17].mxu0  ;;  %v1356_v25 = vpop.f32.mrb[17].mxu1 }
 0x119   :  { %v1339_v24 = vadd.f32 %v1338_v23, %v1337_v21  ;;  %v1340_v26 = vpop.f32.mrb[18].mxu0  ;;  %v1357_v27 = vadd.f32 %v1356_v25, %v1355_v22  ;;  %v1358_v28 = vpop.f32.mrb[18].mxu1 }
 0x11a   :  { %v1341_v29 = vpop.f32.mrb[19].mxu0  ;;  %v1359_v31 = vpop.f32.mrb[19].mxu1 }
 0x11b   :  { %v1342_v30 = vadd.f32 %v1341_v29, %v1340_v26  ;;  %v776_v32 = vadd.f32 %v1339_v24, %v711_v34  ;;  %v1360_v33 = vadd.f32 %v1359_v31, %v1358_v28  ;;  %v800_v36 = vadd.f32 %v1357_v27, %v735_v18  ;;  %v1536_v18 = vld [vmem:[%s1900_s5 + $0x18] sm:$0xff]  }
 0x11d   :  { %v779_v37 = vadd.f32 %v1342_v30, %v1833_v35  ;;  %v803_v38 = vadd.f32 %v1360_v33, %v738_v19 }
 0x11f   :  { %v1343_v20 = vpop.f32.mrb[20].mxu0  ;;  %v1386_v39 = vpop.f32.mrb[20].mxu1 }
 0x120   :  { %v1344_v40 = vpop.f32.mrb[21].mxu0  ;;  %v840_v42 = vpop.f32.mrb[21].mxu1 }
 0x121   :  { %v1345_v41 = vadd.f32 %v1344_v40, %v1343_v20  ;;  %v1346_v43 = vpop.f32.mrb[22].mxu0  ;;  %v841_v44 = vadd.f32 %v840_v42, %v776_v32  ;;  %v1387_v45 = vpop.f32.mrb[22].mxu1 }
 0x122   :  { %v1347_v46 = vpop.f32.mrb[23].mxu0  ;;  %v843_v49 = vpop.f32.mrb[23].mxu1 }
 0x123   :  { %v784_v47 = vadd.f32 %v1345_v41, %v719_v50  ;;  %v1348_v48 = vadd.f32 %v1347_v46, %v1346_v43  ;;  %v844_v52 = vadd.f32 %v843_v49, %v779_v37  ;;  %v871_v54 = vmax.f32 %v841_v44, 0.0  ;;  %v1232_v49 = vld [vmem:[%s1903_s6] ss:$0 sm:$0xff] }
 0x125   :  { %v849_v53 = vadd.f32 %v1386_v39, %v784_v47  ;;  %v787_v34 = vadd.f32 %v1348_v48, %v1835_v51  ;;  %v872_v55 = vmax.f32 %v844_v52, 0.0 }
 0x127   :  { %v852_v35 = vadd.f32 %v1387_v45, %v787_v34  ;;  %v1349_v56 = vpop.f32.mrb[24].mxu0  ;;  %v879_v57 = vpack.c.bf16 %v872_v55, %v871_v54  ;;  %v1390_v58 = vpop.f32.mrb[24].mxu1  ;;  %v873_v60 = vmax.f32 %v849_v53, 0.0 }
 0x128   :  { %v1350_v59 = vpop.f32.mrb[25].mxu0  ;;  %v865_v62 = vadd.f32 %v1390_v58, %v800_v36  ;;  %v856_v0 = vpop.f32.mrb[25].mxu1 }
 0x129   :  { %v874_v61 = vmax.f32 %v852_v35, 0.0  ;;  %v1351_v63 = vadd.f32 %v1350_v59, %v1349_v56  ;;  %v1352_v50 = vpop.f32.mrb[26].mxu0  ;;  %v1391_v1 = vpop.f32.mrb[26].mxu1  ;;  %1400 = vmatprep.mubr.msk.bf16.mxu1 %vm922_vm1, %v879_v57 }
 0x12a   :  { %v1353_v4 = vpop.f32.mrb[27].mxu0  ;;  %v868_v6 = vadd.f32 %v1391_v1, %v803_v38  ;;  %v859_v7 = vpop.f32.mrb[27].mxu1  ;;  %v877_v9 = vmax.f32 %v865_v62, 0.0 }
 0x12b   :  { %v880_v5 = vpack.c.bf16 %v874_v61, %v873_v60  ;;  %v792_v51 = vadd.f32 %v1351_v63, %v1837_v2  ;;  %v1354_v8 = vadd.f32 %v1353_v4, %v1352_v50  ;;  %v1535_v2 = vld [vmem:[%s1900_s5 + $0x10] sm:$0xff]  }
 0x12c   :  { %v878_v11 = vmax.f32 %v868_v6, 0.0  ;;  %1412 = vmatprep.subr.bf16.mxu0 %v1535_v2 }
 0x12d   :  { %v857_v10 = vadd.f32 %v856_v0, %v792_v51  ;;  %1401 = vmatmul.mubr.msk.bf16.vlgmr.msra.gmra.mrb[28].mxu1 %vm922_vm1, %v880_v5  ;;  %v795_v12 = vadd.f32 %v1354_v8, %v1839_v3  ;;  %1413 = vmatpush3.bf16.msra.mxu0 %v1535_v2  ;;  %v1223_v3 = vld [vmem:[%s1902_s4] ss:$0 sm:$0xff] }
 0x12e   :  { %v882_v13 = vpack.c.bf16 %v878_v11, %v877_v9  ;;  %1414 = vmatprep.subr.bf16.mxu0 %v1536_v18 }
 0x12f   :  { %v860_v14 = vadd.f32 %v859_v7, %v795_v12  ;;  %v875_v15 = vmax.f32 %v857_v10, 0.0 }
 0x131   :  { %v876_v16 = vmax.f32 %v860_v14, 0.0  ;;  %1415 = vmatpush3.bf16.msra.mxu0 %v1536_v18 }
 0x133   :  { %v881_v17 = vpack.c.bf16 %v876_v16, %v875_v15 }
 0x135   :  { %1404 = vmatprep.mubr.msk.bf16.mxu1 %vm922_vm1, %v881_v17 }
 0x136   :  { %1405 = vmatmul.mubr.msk.bf16.gmra.mrb[32].mxu1 %vm922_vm1, %v882_v13 }
 0x200   :  { %v1402_v19 = vpop.f32.mrb[28].mxu1 }
 0x201   :  { %v978_v21 = vadd.f32 %v1402_v19, %v1223_v3  ;;  %v969_v22 = vpop.f32.mrb[29].mxu1 }
 0x202   :  { %v970_v23 = vadd.f32 %v1223_v3, %v969_v22  ;;  %v1403_v24 = vpop.f32.mrb[30].mxu1 }
 0x203   :  { %v981_v25 = vadd.f32 %v1403_v24, %v1223_v3  ;;  %v972_v26 = vpop.f32.mrb[31].mxu1  ;;  %v1002_v28 = vmax.f32 %v978_v21, 0.0 }
 0x204   :  { %v973_v27 = vadd.f32 %v1223_v3, %v972_v26  ;;  %v1000_v30 = vmax.f32 %v970_v23, 0.0 }
 0x205   :  { %v1003_v29 = vmax.f32 %v981_v25, 0.0 }
 0x206   :  { %v1001_v31 = vmax.f32 %v973_v27, 0.0 }
 0x207   :  { %v1009_v32 = vpack.c.bf16 %v1003_v29, %v1002_v28 }
 0x208   :  { %v1008_v33 = vpack.c.bf16 %v1001_v31, %v1000_v30 }
 0x209   :  { %v1406_v36 = vpop.f32.mrb[32].mxu1 }
 0x20a   :  { %1416 = vmatprep.mubr.msk.bf16.mxu0 %vm922_vm1, %v1008_v33  ;;  %v994_v37 = vadd.f32 %v1406_v36, %v1223_v3  ;;  %v985_v38 = vpop.f32.mrb[33].mxu1 }
 0x20b   :  { %1417 = vmatmul.mubr.msk.bf16.vlgmr.msra.gmra.mrb[28].mxu0 %vm922_vm1, %v1009_v32  ;;  %v986_v20 = vadd.f32 %v1223_v3, %v985_v38  ;;  %v1407_v39 = vpop.f32.mrb[34].mxu1 }
 0x20c   :  { %v997_v40 = vadd.f32 %v1407_v39, %v1223_v3  ;;  %v988_v41 = vpop.f32.mrb[35].mxu1  ;;  %v1006_v43 = vmax.f32 %v994_v37, 0.0 }
 0x20d   :  { %v989_v42 = vadd.f32 %v1223_v3, %v988_v41  ;;  %v1004_v45 = vmax.f32 %v986_v20, 0.0 }
 0x20e   :  { %v1007_v44 = vmax.f32 %v997_v40, 0.0 }
 0x20f   :  { %v1005_v46 = vmax.f32 %v989_v42, 0.0 }
 0x210   :  { %v1011_v47 = vpack.c.bf16 %v1007_v44, %v1006_v43 }
 0x211   :  { %v1010_v48 = vpack.c.bf16 %v1005_v46, %v1004_v45 }
 0x213   :  { %1420 = vmatprep.mubr.msk.bf16.mxu0 %vm922_vm1, %v1010_v48 }
 0x214   :  { %1421 = vmatmul.mubr.msk.bf16.gmra.mrb[32].mxu0 %vm922_vm1, %v1011_v47 }
 0x2de   :  { %v1418_v52 = vpop.f32.mrb[28].mxu0 }
 0x2df   :  { %v1106_v53 = vadd.f32 %v1418_v52, %v1232_v49  ;;  %v1097_v34 = vpop.f32.mrb[29].mxu0 }
 0x2e0   :  { %v1098_v54 = vadd.f32 %v1232_v49, %v1097_v34  ;;  %v1419_v55 = vpop.f32.mrb[30].mxu0 }
 0x2e1   :  { %1131 = vst.msk [vmem:[%s1904_s7 + $0x10] sm:$0xff] %vm1128_vm2, %v1106_v53  ;;  %v1109_v35 = vadd.f32 %v1419_v55, %v1232_v49  ;;  %v1100_v56 = vpop.f32.mrb[31].mxu0 }
 0x2e2   :  { %1129 = vst.msk [vmem:[%s1904_s7] sm:$0xff] %vm1128_vm2, %v1098_v54  ;;  %v1101_v57 = vadd.f32 %v1232_v49, %v1100_v56 }
 0x2e3   :  { %1132 = vst.msk [vmem:[%s1904_s7 + $0x18] sm:$0xff] %vm1128_vm2, %v1109_v35 }
 0x2e4   :  { %1130 = vst.msk [vmem:[%s1904_s7 + $0x8] sm:$0xff] %vm1128_vm2, %v1101_v57 }
 0x2e7   :  { %v1422_v58 = vpop.f32.mrb[32].mxu0 }
 0x2e8   :  { %v1122_v59 = vadd.f32 %v1422_v58, %v1232_v49  ;;  %v1113_v60 = vpop.f32.mrb[33].mxu0 }
 0x2e9   :  { %v1114_v61 = vadd.f32 %v1232_v49, %v1113_v60  ;;  %v1423_v62 = vpop.f32.mrb[34].mxu0 }
 0x2ea   :  { %1135 = vst.msk [vmem:[%s1904_s7 + $0x30] sm:$0xff] %vm1128_vm2, %v1122_v59  ;;  %v1125_v63 = vadd.f32 %v1423_v62, %v1232_v49  ;;  %v1116_v0 = vpop.f32.mrb[35].mxu0 }
 0x2eb   :  { %1133 = vst.msk [vmem:[%s1904_s7 + $0x20] sm:$0xff] %vm1128_vm2, %v1114_v61  ;;  %v1117_v50 = vadd.f32 %v1232_v49, %v1116_v0 }
 0x2ec   :  { %1136 = vst.msk [vmem:[%s1904_s7 + $0x38] sm:$0xff] %vm1128_vm2, %v1125_v63 }
 0x2ed   :  { %1134 = vst.msk [vmem:[%s1904_s7 + $0x28] sm:$0xff] %vm1128_vm2, %v1117_v50 }

</bundles_post_ra>
